<compile_context>
chip_gen: v7x
topology: tpu7x:2x2x1
jax: 0.10.0
libtpu: 0.0.40
codegen_flags: <defaults>
</compile_context>

<pallas_src>
import functools

import jax
import jax.numpy as jnp
from jax.experimental import pallas as pl
from jax.experimental.pallas import tpu as pltpu

SOS_TOKEN = 1


# ------------------------------ fused kernel -------------------------------
def seq2seq_kernel(x_enc_ref, x_dec_ref,
                   enc_wih_ref, enc_whh_ref, enc_bi_ref, enc_bhn_ref,
                   dec_wih_ref, dec_whh_ref, dec_bi_ref, dec_bhn_ref,
                   wout_ref, bout_ref,
                   logits_ref, ids_ref,
                   gi_enc_ref, gi_dec_ref, hs_ref,
                   *, batch, t_in, t_out):
    """Fused encoder+decoder GRU forward (single invocation, grid=()).

    x_enc_ref: (T_in*B, H)  bf16 embedded encoder inputs, row = t*B + b
    x_dec_ref: (T_out*B, H) bf16 embedded (teacher-forced) decoder inputs
    *_wih_ref: (H, 3H) bf16     input->gates weights,  cols [r | z | n]
    *_whh_ref: (H, 3H) bf16     hidden->gates weights, cols [r | z | n]
    *_bi_ref:  (1, 3H) f32      [b_ih_r+b_hh_r | b_ih_z+b_hh_z | b_ih_n]
    *_bhn_ref: (1, H)  f32      b_hh_n (kept separate: multiplied by r)
    wout_ref:  (H, V)  bf16,  bout_ref: (1, V) f32
    logits_ref: (B, T_out*V) f32  batch-major, lane-dense logits slab
    ids_ref:    (B, T_out)   i32  greedy argmax token ids
    gi_*_ref / hs_ref: VMEM scratch (precomputed input projections, stashed
                       decoder hidden states).
    """
    B = batch
    H = x_enc_ref.shape[1]
    H2 = 2 * H
    V = wout_ref.shape[1]

    # ---- batched input projections (one MXU pass each, off the serial path);
    #      r/z biases and the input n-gate bias are folded in here. ----
    gi_enc_ref[...] = (
        jnp.dot(x_enc_ref[...], enc_wih_ref[...],
                preferred_element_type=jnp.float32)
        + jnp.broadcast_to(enc_bi_ref[...], (t_in * B, 3 * H)))
    gi_dec_ref[...] = (
        jnp.dot(x_dec_ref[...], dec_wih_ref[...],
                preferred_element_type=jnp.float32)
        + jnp.broadcast_to(dec_bi_ref[...], (t_out * B, 3 * H)))

    # Hoist only the small broadcasts; weight matrices stay in VMEM and are
    # read at their point of use inside gru_step.
    enc_bhn = jnp.broadcast_to(enc_bhn_ref[...], (B, H))
    dec_bhn = jnp.broadcast_to(dec_bhn_ref[...], (B, H))
    lane = jax.lax.broadcasted_iota(jnp.int32, (B, V), 1)

    def gru_step(h, gi, whh_ref, b_hn):
        # Serial critical path: one (B,H)x(H,3H) K=128 matmul + gate math.
        gh = jnp.dot(h.astype(jnp.bfloat16), whh_ref[...],
                     preferred_element_type=jnp.float32)           # (B, 3H)
        rz = jax.nn.sigmoid(gi[:, :H2] + gh[:, :H2])
        r = rz[:, :H]
        z = rz[:, H:]
        n = jnp.tanh(gi[:, H2:] + r * (gh[:, H2:] + b_hn))
        return (1.0 - z) * n + z * h

    # ---- encoder: hidden carried in registers; attn_mode='none' so encoder
    #      outputs are never materialized. ----
    h = jnp.zeros((B, H), jnp.float32)
    for t in range(t_in):                         # static unroll (small T)
        h = gru_step(h, gi_enc_ref[t * B:(t + 1) * B, :], enc_whh_ref, enc_bhn)

    # ---- decoder recurrence: GRU step + one 1-vreg hidden stash per step ----
    for t in range(t_out):                        # static unroll (small T)
        h = gru_step(h, gi_dec_ref[t * B:(t + 1) * B, :], dec_whh_ref, dec_bhn)
        hs_ref[t * B:(t + 1) * B, :] = h

    # ---- epilogue (off the recurrence): batched output projection + argmax.
    #      Lane-dense 256-wide logit stores, single ids store. ----
    logits = (jnp.dot(hs_ref[...].astype(jnp.bfloat16), wout_ref[...],
                      preferred_element_type=jnp.float32)
              + jnp.broadcast_to(bout_ref[...], (t_out * B, V)))   # (T*B, V)
    ids_cols = []
    for t in range(t_out):
        lg = logits[t * B:(t + 1) * B, :]                          # (B, V)
        logits_ref[:, t * V:(t + 1) * V] = lg      # unmasked 128-aligned store
        # greedy id = argmax of logits (== top-1 of softmax), first-occurrence
        # tie-break via max + masked-iota min (XLU reduces).
        maxv = jnp.max(lg, axis=-1, keepdims=True)
        ids_cols.append(jnp.min(jnp.where(lg == maxv, lane, V),
                                axis=-1, keepdims=True))
    ids_ref[...] = jnp.concatenate(ids_cols, axis=1)


def run_seq2seq(x_enc2d, x_dec2d,
                enc_wih, enc_whh, enc_bi, enc_bhn,
                dec_wih, dec_whh, dec_bi, dec_bhn,
                wout, bout, *, batch, t_in, t_out):
    H = x_enc2d.shape[1]
    V = wout.shape[1]
    vmem = lambda: pl.BlockSpec(memory_space=pltpu.MemorySpace.VMEM)
    kernel = functools.partial(seq2seq_kernel,
                               batch=batch, t_in=t_in, t_out=t_out)
    logits2d, ids = pl.pallas_call(
        kernel,
        out_shape=(jax.ShapeDtypeStruct((batch, t_out * V), jnp.float32),
                   jax.ShapeDtypeStruct((batch, t_out), jnp.int32)),
        in_specs=[vmem() for _ in range(12)],
        out_specs=(vmem(), vmem()),
        scratch_shapes=[
            pltpu.VMEM((t_in * batch, 3 * H), jnp.float32),   # gi_enc
            pltpu.VMEM((t_out * batch, 3 * H), jnp.float32),  # gi_dec
            pltpu.VMEM((t_out * batch, H), jnp.float32),      # hs
        ],
    )(x_enc2d, x_dec2d,
      enc_wih, enc_whh, enc_bi, enc_bhn,
      dec_wih, dec_whh, dec_bi, dec_bhn,
      wout, bout)
    return logits2d, ids


# ----------------------------- parameter prep ------------------------------
def _prep_gru_params(wih_t, whh_t, bih, bhh, hidden):
    """bf16 weight views + folded biases for the kernel.

    wih_t/whh_t: (H, 3H) PyTorch-convention transposed weights, cols [r|z|n].
    Returns: wih (H,3H) bf16, whh (H,3H) bf16,
             b_i (1,3H) f32 = [b_ih_rz + b_hh_rz | b_ih_n]  (folded into the
             batched input projection), b_hn (1,H) f32 (stays on the step path).
    """
    H = hidden
    b_i = jnp.concatenate([bih[:, :2 * H] + bhh[:, :2 * H], bih[:, 2 * H:]],
                          axis=1)
    b_hn = bhh[:, 2 * H:]
    return (wih_t.astype(jnp.bfloat16), whh_t.astype(jnp.bfloat16),
            b_i.astype(jnp.float32), b_hn.astype(jnp.float32))


def init_params(key, enc_vocab, dec_vocab, hidden):
    ks = jax.random.split(key, 10)
    bound = 1.0 / jnp.sqrt(hidden)
    u = lambda k, shape: jax.random.uniform(k, shape, jnp.float32, -bound, bound)
    return dict(
        emb_enc=u(ks[0], (enc_vocab, hidden)),
        enc_wih_t=u(ks[1], (hidden, 3 * hidden)),
        enc_whh_t=u(ks[2], (hidden, 3 * hidden)),
        enc_bih=u(ks[3], (1, 3 * hidden)),
        enc_bhh=u(ks[4], (1, 3 * hidden)),
        emb_dec=u(ks[5], (dec_vocab, hidden)),
        dec_wih_t=u(ks[6], (hidden, 3 * hidden)),
        dec_whh_t=u(ks[7], (hidden, 3 * hidden)),
        dec_bih=u(ks[8], (1, 3 * hidden)),
        dec_bhh=u(ks[9], (1, 3 * hidden)),
        out_w_t=u(jax.random.fold_in(key, 100), (hidden, dec_vocab)),
        out_b=u(jax.random.fold_in(key, 101), (1, dec_vocab)),
    )


# ----------------------------- seq2seq forward -----------------------------
def seq2seq_forward(params, input_seq, target_seq, hidden):
    """input_seq: (B, T_in) int32; target_seq: (B, T_out) int32.
    Returns (all_decoder_outputs (B, T_out, V), greedy token ids (B, T_out))."""
    B, T_in = input_seq.shape
    _, T_out = target_seq.shape
    V = params["out_w_t"].shape[1]

    # Embedding gathers stay in XLA (cheap gather).  Time-major, row = t*B + b,
    # cast to bf16 (halves the HBM->VMEM entry DMA; gate math stays f32).
    x_enc = jnp.take(params["emb_enc"], input_seq, axis=0)            # (B,T,H)
    x_enc = jnp.transpose(x_enc, (1, 0, 2)).reshape(T_in * B, hidden)
    x_enc = x_enc.astype(jnp.bfloat16)

    sos = jnp.full((B, 1), SOS_TOKEN, dtype=target_seq.dtype)
    dec_tokens = jnp.concatenate([sos, target_seq[:, :-1]], axis=1)   # teacher forcing
    x_dec = jnp.take(params["emb_dec"], dec_tokens, axis=0)
    x_dec = jnp.transpose(x_dec, (1, 0, 2)).reshape(T_out * B, hidden)
    x_dec = x_dec.astype(jnp.bfloat16)

    enc_wih, enc_whh, enc_bi, enc_bhn = _prep_gru_params(
        params["enc_wih_t"], params["enc_whh_t"],
        params["enc_bih"], params["enc_bhh"], hidden)
    dec_wih, dec_whh, dec_bi, dec_bhn = _prep_gru_params(
        params["dec_wih_t"], params["dec_whh_t"],
        params["dec_bih"], params["dec_bhh"], hidden)

    logits2d, decoded_ids = run_seq2seq(
        x_enc, x_dec,
        enc_wih, enc_whh, enc_bi, enc_bhn,
        dec_wih, dec_whh, dec_bi, dec_bhn,
        params["out_w_t"].astype(jnp.bfloat16), params["out_b"],
        batch=B, t_in=T_in, t_out=T_out)

    # Batch-major (B, T*V) -> (B, T, V) is a free metadata reshape.
    all_decoder_outputs = logits2d.reshape(B, T_out, V)
    return all_decoder_outputs, decoded_ids


if __name__ == "__main__":
    B, T_in, T_out = 8, 8, 8
    H = 128                      # lane-aligned hidden size
    ENC_VOCAB, DEC_VOCAB = 50, 256

    key = jax.random.PRNGKey(0)
    k_params, k_in, k_tgt = jax.random.split(key, 3)

    params = init_params(k_params, ENC_VOCAB, DEC_VOCAB, H)
    input_seq = jax.random.randint(k_in, (B, T_in), 0, ENC_VOCAB, dtype=jnp.int32)
    target_seq = jax.random.randint(k_tgt, (B, T_out), 0, DEC_VOCAB, dtype=jnp.int32)

    fwd = jax.jit(functools.partial(seq2seq_forward, hidden=H))
    all_outputs, decoded_ids = fwd(params, input_seq, target_seq)
    jax.block_until_ready((all_outputs, decoded_ids))

    assert all_outputs.shape == (B, T_out, DEC_VOCAB)
    assert decoded_ids.shape == (B, T_out)
    assert bool(jnp.isfinite(all_outputs).all())
    assert bool((decoded_ids >= 0).all()) and bool((decoded_ids < DEC_VOCAB).all())
    print("KERNEL_OK")
</pallas_src>

<mosaic_0001>
module attributes {stable_mosaic.version = 11 : i64} {
  func.func @seq2seq_kernel(%arg0: memref<64x128xbf16, #tpu.memory_space<vmem>>, %arg1: memref<64x128xbf16, #tpu.memory_space<vmem>>, %arg2: memref<128x384xbf16, #tpu.memory_space<vmem>>, %arg3: memref<128x384xbf16, #tpu.memory_space<vmem>>, %arg4: memref<1x384xf32, #tpu.memory_space<vmem>>, %arg5: memref<1x128xf32, #tpu.memory_space<vmem>>, %arg6: memref<128x384xbf16, #tpu.memory_space<vmem>>, %arg7: memref<128x384xbf16, #tpu.memory_space<vmem>>, %arg8: memref<1x384xf32, #tpu.memory_space<vmem>>, %arg9: memref<1x128xf32, #tpu.memory_space<vmem>>, %arg10: memref<128x256xbf16, #tpu.memory_space<vmem>>, %arg11: memref<1x256xf32, #tpu.memory_space<vmem>>, %arg12: memref<8x2048xf32, #tpu.memory_space<vmem>>, %arg13: memref<8x8xi32, #tpu.memory_space<vmem>>, %arg14: memref<64x384xf32, #tpu.memory_space<vmem>>, %arg15: memref<64x384xf32, #tpu.memory_space<vmem>>, %arg16: memref<64x128xf32, #tpu.memory_space<vmem>>) attributes {dimension_semantics = [], scalar_prefetch = 0 : i64, scratch_operands = 3 : i64, tpu.core_type = #tpu.core_type<tc>} {
    %c0 = arith.constant 0 : index
    %c0_0 = arith.constant 0 : index
    %0 = vector.load %arg0[%c0, %c0_0] : memref<64x128xbf16, #tpu.memory_space<vmem>>, vector<64x128xbf16>
    %c0_1 = arith.constant 0 : index
    %c0_2 = arith.constant 0 : index
    %1 = vector.load %arg2[%c0_1, %c0_2] : memref<128x384xbf16, #tpu.memory_space<vmem>>, vector<128x384xbf16>
    %cst = arith.constant dense<0.000000e+00> : vector<64x384xf32>
    %2 = tpu.matmul %0, %1, %cst {dimension_numbers = #tpu.dot_dimension_numbers<[1], [0], [0], [1], [0, 0, 1, 1], [], []>} : vector<64x128xbf16>, vector<128x384xbf16>, vector<64x384xf32> -> vector<64x384xf32>
    %c0_3 = arith.constant 0 : index
    %c0_4 = arith.constant 0 : index
    %3 = vector.load %arg4[%c0_3, %c0_4] : memref<1x384xf32, #tpu.memory_space<vmem>>, vector<1x384xf32>
    %4 = vector.shape_cast %3 : vector<1x384xf32> to vector<1x384xf32>
    %5 = vector.broadcast %4 : vector<1x384xf32> to vector<64x384xf32>
    %6 = arith.addf %2, %5 : vector<64x384xf32>
    %c0_5 = arith.constant 0 : index
    %c0_6 = arith.constant 0 : index
    %7 = vector.load %arg14[%c0_5, %c0_6] : memref<64x384xf32, #tpu.memory_space<vmem>>, vector<64x384xf32>
    tpu.vector_store %arg14[%c0_5, %c0_6], %6 {strides = array<i32>} : memref<64x384xf32, #tpu.memory_space<vmem>>, vector<64x384xf32>,
    %c0_7 = arith.constant 0 : index
    %c0_8 = arith.constant 0 : index
    %8 = vector.load %arg1[%c0_7, %c0_8] : memref<64x128xbf16, #tpu.memory_space<vmem>>, vector<64x128xbf16>
    %c0_9 = arith.constant 0 : index
    %c0_10 = arith.constant 0 : index
    %9 = vector.load %arg6[%c0_9, %c0_10] : memref<128x384xbf16, #tpu.memory_space<vmem>>, vector<128x384xbf16>
    %cst_11 = arith.constant dense<0.000000e+00> : vector<64x384xf32>
    %10 = tpu.matmul %8, %9, %cst_11 {dimension_numbers = #tpu.dot_dimension_numbers<[1], [0], [0], [1], [0, 0, 1, 1], [], []>} : vector<64x128xbf16>, vector<128x384xbf16>, vector<64x384xf32> -> vector<64x384xf32>
    %c0_12 = arith.constant 0 : index
    %c0_13 = arith.constant 0 : index
    %11 = vector.load %arg8[%c0_12, %c0_13] : memref<1x384xf32, #tpu.memory_space<vmem>>, vector<1x384xf32>
    %12 = vector.shape_cast %11 : vector<1x384xf32> to vector<1x384xf32>
    %13 = vector.broadcast %12 : vector<1x384xf32> to vector<64x384xf32>
    %14 = arith.addf %10, %13 : vector<64x384xf32>
    %c0_14 = arith.constant 0 : index
    %c0_15 = arith.constant 0 : index
    %15 = vector.load %arg15[%c0_14, %c0_15] : memref<64x384xf32, #tpu.memory_space<vmem>>, vector<64x384xf32>
    tpu.vector_store %arg15[%c0_14, %c0_15], %14 {strides = array<i32>} : memref<64x384xf32, #tpu.memory_space<vmem>>, vector<64x384xf32>,
    %c0_16 = arith.constant 0 : index
    %c0_17 = arith.constant 0 : index
    %16 = vector.load %arg5[%c0_16, %c0_17] : memref<1x128xf32, #tpu.memory_space<vmem>>, vector<1x128xf32>
    %17 = vector.shape_cast %16 : vector<1x128xf32> to vector<1x128xf32>
    %18 = vector.broadcast %17 : vector<1x128xf32> to vector<8x128xf32>
    %c0_18 = arith.constant 0 : index
    %c0_19 = arith.constant 0 : index
    %19 = vector.load %arg9[%c0_18, %c0_19] : memref<1x128xf32, #tpu.memory_space<vmem>>, vector<1x128xf32>
    %20 = vector.shape_cast %19 : vector<1x128xf32> to vector<1x128xf32>
    %21 = vector.broadcast %20 : vector<1x128xf32> to vector<8x128xf32>
    %22 = tpu.iota {dimensions = array<i32: 1>} : vector<8x256xi32>
    %cst_20 = arith.constant 0.000000e+00 : f32
    %23 = vector.broadcast %cst_20 : f32 to vector<8x128xf32>
    %c0_21 = arith.constant 0 : index
    %c0_22 = arith.constant 0 : index
    %24 = vector.load %arg14[%c0_21, %c0_22] : memref<64x384xf32, #tpu.memory_space<vmem>>, vector<8x384xf32>
    %25 = arith.truncf %23 : vector<8x128xf32> to vector<8x128xbf16>
    %c0_23 = arith.constant 0 : index
    %c0_24 = arith.constant 0 : index
    %26 = vector.load %arg3[%c0_23, %c0_24] : memref<128x384xbf16, #tpu.memory_space<vmem>>, vector<128x384xbf16>
    %cst_25 = arith.constant dense<0.000000e+00> : vector<8x384xf32>
    %27 = tpu.matmul %25, %26, %cst_25 {dimension_numbers = #tpu.dot_dimension_numbers<[1], [0], [0], [1], [0, 0, 1, 1], [], []>} : vector<8x128xbf16>, vector<128x384xbf16>, vector<8x384xf32> -> vector<8x384xf32>
    %28 = vector.extract_strided_slice %24 {offsets = [0, 0], sizes = [8, 256], strides = [1, 1]} : vector<8x384xf32> to vector<8x256xf32>
    %29 = vector.extract_strided_slice %27 {offsets = [0, 0], sizes = [8, 256], strides = [1, 1]} : vector<8x384xf32> to vector<8x256xf32>
    %30 = arith.addf %28, %29 : vector<8x256xf32>
    %31 = arith.negf %30 : vector<8x256xf32>
    %32 = math.exp %31 : vector<8x256xf32>
    %cst_26 = arith.constant 1.000000e+00 : f32
    %33 = vector.broadcast %cst_26 : f32 to vector<8x256xf32>
    %34 = arith.addf %33, %32 : vector<8x256xf32>
    %35 = arith.divf %33, %34 : vector<8x256xf32>
    %36 = vector.extract_strided_slice %35 {offsets = [0, 0], sizes = [8, 128], strides = [1, 1]} : vector<8x256xf32> to vector<8x128xf32>
    %37 = vector.extract_strided_slice %35 {offsets = [0, 128], sizes = [8, 128], strides = [1, 1]} : vector<8x256xf32> to vector<8x128xf32>
    %38 = vector.extract_strided_slice %24 {offsets = [0, 256], sizes = [8, 128], strides = [1, 1]} : vector<8x384xf32> to vector<8x128xf32>
    %39 = vector.extract_strided_slice %27 {offsets = [0, 256], sizes = [8, 128], strides = [1, 1]} : vector<8x384xf32> to vector<8x128xf32>
    %40 = arith.addf %39, %18 : vector<8x128xf32>
    %41 = arith.mulf %36, %40 : vector<8x128xf32>
    %42 = arith.addf %38, %41 : vector<8x128xf32>
    %43 = math.tanh %42 : vector<8x128xf32>
    %cst_27 = arith.constant 1.000000e+00 : f32
    %44 = vector.broadcast %cst_27 : f32 to vector<8x128xf32>
    %45 = arith.subf %44, %37 : vector<8x128xf32>
    %46 = arith.mulf %45, %43 : vector<8x128xf32>
    %47 = arith.mulf %37, %23 : vector<8x128xf32>
    %48 = arith.addf %46, %47 : vector<8x128xf32>
    %c8 = arith.constant 8 : index
    %c0_28 = arith.constant 0 : index
    %49 = vector.load %arg14[%c8, %c0_28] : memref<64x384xf32, #tpu.memory_space<vmem>>, vector<8x384xf32>
    %50 = arith.truncf %48 : vector<8x128xf32> to vector<8x128xbf16>
    %c0_29 = arith.constant 0 : index
    %c0_30 = arith.constant 0 : index
    %51 = vector.load %arg3[%c0_29, %c0_30] : memref<128x384xbf16, #tpu.memory_space<vmem>>, vector<128x384xbf16>
    %cst_31 = arith.constant dense<0.000000e+00> : vector<8x384xf32>
    %52 = tpu.matmul %50, %51, %cst_31 {dimension_numbers = #tpu.dot_dimension_numbers<[1], [0], [0], [1], [0, 0, 1, 1], [], []>} : vector<8x128xbf16>, vector<128x384xbf16>, vector<8x384xf32> -> vector<8x384xf32>
    %53 = vector.extract_strided_slice %49 {offsets = [0, 0], sizes = [8, 256], strides = [1, 1]} : vector<8x384xf32> to vector<8x256xf32>
    %54 = vector.extract_strided_slice %52 {offsets = [0, 0], sizes = [8, 256], strides = [1, 1]} : vector<8x384xf32> to vector<8x256xf32>
    %55 = arith.addf %53, %54 : vector<8x256xf32>
    %56 = arith.negf %55 : vector<8x256xf32>
    %57 = math.exp %56 : vector<8x256xf32>
    %cst_32 = arith.constant 1.000000e+00 : f32
    %58 = vector.broadcast %cst_32 : f32 to vector<8x256xf32>
    %59 = arith.addf %58, %57 : vector<8x256xf32>
    %60 = arith.divf %58, %59 : vector<8x256xf32>
    %61 = vector.extract_strided_slice %60 {offsets = [0, 0], sizes = [8, 128], strides = [1, 1]} : vector<8x256xf32> to vector<8x128xf32>
    %62 = vector.extract_strided_slice %60 {offsets = [0, 128], sizes = [8, 128], strides = [1, 1]} : vector<8x256xf32> to vector<8x128xf32>
    %63 = vector.extract_strided_slice %49 {offsets = [0, 256], sizes = [8, 128], strides = [1, 1]} : vector<8x384xf32> to vector<8x128xf32>
    %64 = vector.extract_strided_slice %52 {offsets = [0, 256], sizes = [8, 128], strides = [1, 1]} : vector<8x384xf32> to vector<8x128xf32>
    %65 = arith.addf %64, %18 : vector<8x128xf32>
    %66 = arith.mulf %61, %65 : vector<8x128xf32>
    %67 = arith.addf %63, %66 : vector<8x128xf32>
    %68 = math.tanh %67 : vector<8x128xf32>
    %cst_33 = arith.constant 1.000000e+00 : f32
    %69 = vector.broadcast %cst_33 : f32 to vector<8x128xf32>
    %70 = arith.subf %69, %62 : vector<8x128xf32>
    %71 = arith.mulf %70, %68 : vector<8x128xf32>
    %72 = arith.mulf %62, %48 : vector<8x128xf32>
    %73 = arith.addf %71, %72 : vector<8x128xf32>
    %c16 = arith.constant 16 : index
    %c0_34 = arith.constant 0 : index
    %74 = vector.load %arg14[%c16, %c0_34] : memref<64x384xf32, #tpu.memory_space<vmem>>, vector<8x384xf32>
    %75 = arith.truncf %73 : vector<8x128xf32> to vector<8x128xbf16>
    %c0_35 = arith.constant 0 : index
    %c0_36 = arith.constant 0 : index
    %76 = vector.load %arg3[%c0_35, %c0_36] : memref<128x384xbf16, #tpu.memory_space<vmem>>, vector<128x384xbf16>
    %cst_37 = arith.constant dense<0.000000e+00> : vector<8x384xf32>
    %77 = tpu.matmul %75, %76, %cst_37 {dimension_numbers = #tpu.dot_dimension_numbers<[1], [0], [0], [1], [0, 0, 1, 1], [], []>} : vector<8x128xbf16>, vector<128x384xbf16>, vector<8x384xf32> -> vector<8x384xf32>
    %78 = vector.extract_strided_slice %74 {offsets = [0, 0], sizes = [8, 256], strides = [1, 1]} : vector<8x384xf32> to vector<8x256xf32>
    %79 = vector.extract_strided_slice %77 {offsets = [0, 0], sizes = [8, 256], strides = [1, 1]} : vector<8x384xf32> to vector<8x256xf32>
    %80 = arith.addf %78, %79 : vector<8x256xf32>
    %81 = arith.negf %80 : vector<8x256xf32>
    %82 = math.exp %81 : vector<8x256xf32>
    %cst_38 = arith.constant 1.000000e+00 : f32
    %83 = vector.broadcast %cst_38 : f32 to vector<8x256xf32>
    %84 = arith.addf %83, %82 : vector<8x256xf32>
    %85 = arith.divf %83, %84 : vector<8x256xf32>
    %86 = vector.extract_strided_slice %85 {offsets = [0, 0], sizes = [8, 128], strides = [1, 1]} : vector<8x256xf32> to vector<8x128xf32>
    %87 = vector.extract_strided_slice %85 {offsets = [0, 128], sizes = [8, 128], strides = [1, 1]} : vector<8x256xf32> to vector<8x128xf32>
    %88 = vector.extract_strided_slice %74 {offsets = [0, 256], sizes = [8, 128], strides = [1, 1]} : vector<8x384xf32> to vector<8x128xf32>
    %89 = vector.extract_strided_slice %77 {offsets = [0, 256], sizes = [8, 128], strides = [1, 1]} : vector<8x384xf32> to vector<8x128xf32>
    %90 = arith.addf %89, %18 : vector<8x128xf32>
    %91 = arith.mulf %86, %90 : vector<8x128xf32>
    %92 = arith.addf %88, %91 : vector<8x128xf32>
    %93 = math.tanh %92 : vector<8x128xf32>
    %cst_39 = arith.constant 1.000000e+00 : f32
    %94 = vector.broadcast %cst_39 : f32 to vector<8x128xf32>
    %95 = arith.subf %94, %87 : vector<8x128xf32>
    %96 = arith.mulf %95, %93 : vector<8x128xf32>
    %97 = arith.mulf %87, %73 : vector<8x128xf32>
    %98 = arith.addf %96, %97 : vector<8x128xf32>
    %c24 = arith.constant 24 : index
    %c0_40 = arith.constant 0 : index
    %99 = vector.load %arg14[%c24, %c0_40] : memref<64x384xf32, #tpu.memory_space<vmem>>, vector<8x384xf32>
    %100 = arith.truncf %98 : vector<8x128xf32> to vector<8x128xbf16>
    %c0_41 = arith.constant 0 : index
    %c0_42 = arith.constant 0 : index
    %101 = vector.load %arg3[%c0_41, %c0_42] : memref<128x384xbf16, #tpu.memory_space<vmem>>, vector<128x384xbf16>
    %cst_43 = arith.constant dense<0.000000e+00> : vector<8x384xf32>
    %102 = tpu.matmul %100, %101, %cst_43 {dimension_numbers = #tpu.dot_dimension_numbers<[1], [0], [0], [1], [0, 0, 1, 1], [], []>} : vector<8x128xbf16>, vector<128x384xbf16>, vector<8x384xf32> -> vector<8x384xf32>
    %103 = vector.extract_strided_slice %99 {offsets = [0, 0], sizes = [8, 256], strides = [1, 1]} : vector<8x384xf32> to vector<8x256xf32>
    %104 = vector.extract_strided_slice %102 {offsets = [0, 0], sizes = [8, 256], strides = [1, 1]} : vector<8x384xf32> to vector<8x256xf32>
    %105 = arith.addf %103, %104 : vector<8x256xf32>
    %106 = arith.negf %105 : vector<8x256xf32>
    %107 = math.exp %106 : vector<8x256xf32>
    %cst_44 = arith.constant 1.000000e+00 : f32
    %108 = vector.broadcast %cst_44 : f32 to vector<8x256xf32>
    %109 = arith.addf %108, %107 : vector<8x256xf32>
    %110 = arith.divf %108, %109 : vector<8x256xf32>
    %111 = vector.extract_strided_slice %110 {offsets = [0, 0], sizes = [8, 128], strides = [1, 1]} : vector<8x256xf32> to vector<8x128xf32>
    %112 = vector.extract_strided_slice %110 {offsets = [0, 128], sizes = [8, 128], strides = [1, 1]} : vector<8x256xf32> to vector<8x128xf32>
    %113 = vector.extract_strided_slice %99 {offsets = [0, 256], sizes = [8, 128], strides = [1, 1]} : vector<8x384xf32> to vector<8x128xf32>
    %114 = vector.extract_strided_slice %102 {offsets = [0, 256], sizes = [8, 128], strides = [1, 1]} : vector<8x384xf32> to vector<8x128xf32>
    %115 = arith.addf %114, %18 : vector<8x128xf32>
    %116 = arith.mulf %111, %115 : vector<8x128xf32>
    %117 = arith.addf %113, %116 : vector<8x128xf32>
    %118 = math.tanh %117 : vector<8x128xf32>
    %cst_45 = arith.constant 1.000000e+00 : f32
    %119 = vector.broadcast %cst_45 : f32 to vector<8x128xf32>
    %120 = arith.subf %119, %112 : vector<8x128xf32>
    %121 = arith.mulf %120, %118 : vector<8x128xf32>
    %122 = arith.mulf %112, %98 : vector<8x128xf32>
    %123 = arith.addf %121, %122 : vector<8x128xf32>
    %c32 = arith.constant 32 : index
    %c0_46 = arith.constant 0 : index
    %124 = vector.load %arg14[%c32, %c0_46] : memref<64x384xf32, #tpu.memory_space<vmem>>, vector<8x384xf32>
    %125 = arith.truncf %123 : vector<8x128xf32> to vector<8x128xbf16>
    %c0_47 = arith.constant 0 : index
    %c0_48 = arith.constant 0 : index
    %126 = vector.load %arg3[%c0_47, %c0_48] : memref<128x384xbf16, #tpu.memory_space<vmem>>, vector<128x384xbf16>
    %cst_49 = arith.constant dense<0.000000e+00> : vector<8x384xf32>
    %127 = tpu.matmul %125, %126, %cst_49 {dimension_numbers = #tpu.dot_dimension_numbers<[1], [0], [0], [1], [0, 0, 1, 1], [], []>} : vector<8x128xbf16>, vector<128x384xbf16>, vector<8x384xf32> -> vector<8x384xf32>
    %128 = vector.extract_strided_slice %124 {offsets = [0, 0], sizes = [8, 256], strides = [1, 1]} : vector<8x384xf32> to vector<8x256xf32>
    %129 = vector.extract_strided_slice %127 {offsets = [0, 0], sizes = [8, 256], strides = [1, 1]} : vector<8x384xf32> to vector<8x256xf32>
    %130 = arith.addf %128, %129 : vector<8x256xf32>
    %131 = arith.negf %130 : vector<8x256xf32>
    %132 = math.exp %131 : vector<8x256xf32>
    %cst_50 = arith.constant 1.000000e+00 : f32
    %133 = vector.broadcast %cst_50 : f32 to vector<8x256xf32>
    %134 = arith.addf %133, %132 : vector<8x256xf32>
    %135 = arith.divf %133, %134 : vector<8x256xf32>
    %136 = vector.extract_strided_slice %135 {offsets = [0, 0], sizes = [8, 128], strides = [1, 1]} : vector<8x256xf32> to vector<8x128xf32>
    %137 = vector.extract_strided_slice %135 {offsets = [0, 128], sizes = [8, 128], strides = [1, 1]} : vector<8x256xf32> to vector<8x128xf32>
    %138 = vector.extract_strided_slice %124 {offsets = [0, 256], sizes = [8, 128], strides = [1, 1]} : vector<8x384xf32> to vector<8x128xf32>
    %139 = vector.extract_strided_slice %127 {offsets = [0, 256], sizes = [8, 128], strides = [1, 1]} : vector<8x384xf32> to vector<8x128xf32>
    %140 = arith.addf %139, %18 : vector<8x128xf32>
    %141 = arith.mulf %136, %140 : vector<8x128xf32>
    %142 = arith.addf %138, %141 : vector<8x128xf32>
    %143 = math.tanh %142 : vector<8x128xf32>
    %cst_51 = arith.constant 1.000000e+00 : f32
    %144 = vector.broadcast %cst_51 : f32 to vector<8x128xf32>
    %145 = arith.subf %144, %137 : vector<8x128xf32>
    %146 = arith.mulf %145, %143 : vector<8x128xf32>
    %147 = arith.mulf %137, %123 : vector<8x128xf32>
    %148 = arith.addf %146, %147 : vector<8x128xf32>
    %c40 = arith.constant 40 : index
    %c0_52 = arith.constant 0 : index
    %149 = vector.load %arg14[%c40, %c0_52] : memref<64x384xf32, #tpu.memory_space<vmem>>, vector<8x384xf32>
    %150 = arith.truncf %148 : vector<8x128xf32> to vector<8x128xbf16>
    %c0_53 = arith.constant 0 : index
    %c0_54 = arith.constant 0 : index
    %151 = vector.load %arg3[%c0_53, %c0_54] : memref<128x384xbf16, #tpu.memory_space<vmem>>, vector<128x384xbf16>
    %cst_55 = arith.constant dense<0.000000e+00> : vector<8x384xf32>
    %152 = tpu.matmul %150, %151, %cst_55 {dimension_numbers = #tpu.dot_dimension_numbers<[1], [0], [0], [1], [0, 0, 1, 1], [], []>} : vector<8x128xbf16>, vector<128x384xbf16>, vector<8x384xf32> -> vector<8x384xf32>
    %153 = vector.extract_strided_slice %149 {offsets = [0, 0], sizes = [8, 256], strides = [1, 1]} : vector<8x384xf32> to vector<8x256xf32>
    %154 = vector.extract_strided_slice %152 {offsets = [0, 0], sizes = [8, 256], strides = [1, 1]} : vector<8x384xf32> to vector<8x256xf32>
    %155 = arith.addf %153, %154 : vector<8x256xf32>
    %156 = arith.negf %155 : vector<8x256xf32>
    %157 = math.exp %156 : vector<8x256xf32>
    %cst_56 = arith.constant 1.000000e+00 : f32
    %158 = vector.broadcast %cst_56 : f32 to vector<8x256xf32>
    %159 = arith.addf %158, %157 : vector<8x256xf32>
    %160 = arith.divf %158, %159 : vector<8x256xf32>
    %161 = vector.extract_strided_slice %160 {offsets = [0, 0], sizes = [8, 128], strides = [1, 1]} : vector<8x256xf32> to vector<8x128xf32>
    %162 = vector.extract_strided_slice %160 {offsets = [0, 128], sizes = [8, 128], strides = [1, 1]} : vector<8x256xf32> to vector<8x128xf32>
    %163 = vector.extract_strided_slice %149 {offsets = [0, 256], sizes = [8, 128], strides = [1, 1]} : vector<8x384xf32> to vector<8x128xf32>
    %164 = vector.extract_strided_slice %152 {offsets = [0, 256], sizes = [8, 128], strides = [1, 1]} : vector<8x384xf32> to vector<8x128xf32>
    %165 = arith.addf %164, %18 : vector<8x128xf32>
    %166 = arith.mulf %161, %165 : vector<8x128xf32>
    %167 = arith.addf %163, %166 : vector<8x128xf32>
    %168 = math.tanh %167 : vector<8x128xf32>
    %cst_57 = arith.constant 1.000000e+00 : f32
    %169 = vector.broadcast %cst_57 : f32 to vector<8x128xf32>
    %170 = arith.subf %169, %162 : vector<8x128xf32>
    %171 = arith.mulf %170, %168 : vector<8x128xf32>
    %172 = arith.mulf %162, %148 : vector<8x128xf32>
    %173 = arith.addf %171, %172 : vector<8x128xf32>
    %c48 = arith.constant 48 : index
    %c0_58 = arith.constant 0 : index
    %174 = vector.load %arg14[%c48, %c0_58] : memref<64x384xf32, #tpu.memory_space<vmem>>, vector<8x384xf32>
    %175 = arith.truncf %173 : vector<8x128xf32> to vector<8x128xbf16>
    %c0_59 = arith.constant 0 : index
    %c0_60 = arith.constant 0 : index
    %176 = vector.load %arg3[%c0_59, %c0_60] : memref<128x384xbf16, #tpu.memory_space<vmem>>, vector<128x384xbf16>
    %cst_61 = arith.constant dense<0.000000e+00> : vector<8x384xf32>
    %177 = tpu.matmul %175, %176, %cst_61 {dimension_numbers = #tpu.dot_dimension_numbers<[1], [0], [0], [1], [0, 0, 1, 1], [], []>} : vector<8x128xbf16>, vector<128x384xbf16>, vector<8x384xf32> -> vector<8x384xf32>
    %178 = vector.extract_strided_slice %174 {offsets = [0, 0], sizes = [8, 256], strides = [1, 1]} : vector<8x384xf32> to vector<8x256xf32>
    %179 = vector.extract_strided_slice %177 {offsets = [0, 0], sizes = [8, 256], strides = [1, 1]} : vector<8x384xf32> to vector<8x256xf32>
    %180 = arith.addf %178, %179 : vector<8x256xf32>
    %181 = arith.negf %180 : vector<8x256xf32>
    %182 = math.exp %181 : vector<8x256xf32>
    %cst_62 = arith.constant 1.000000e+00 : f32
    %183 = vector.broadcast %cst_62 : f32 to vector<8x256xf32>
    %184 = arith.addf %183, %182 : vector<8x256xf32>
    %185 = arith.divf %183, %184 : vector<8x256xf32>
    %186 = vector.extract_strided_slice %185 {offsets = [0, 0], sizes = [8, 128], strides = [1, 1]} : vector<8x256xf32> to vector<8x128xf32>
    %187 = vector.extract_strided_slice %185 {offsets = [0, 128], sizes = [8, 128], strides = [1, 1]} : vector<8x256xf32> to vector<8x128xf32>
    %188 = vector.extract_strided_slice %174 {offsets = [0, 256], sizes = [8, 128], strides = [1, 1]} : vector<8x384xf32> to vector<8x128xf32>
    %189 = vector.extract_strided_slice %177 {offsets = [0, 256], sizes = [8, 128], strides = [1, 1]} : vector<8x384xf32> to vector<8x128xf32>
    %190 = arith.addf %189, %18 : vector<8x128xf32>
    %191 = arith.mulf %186, %190 : vector<8x128xf32>
    %192 = arith.addf %188, %191 : vector<8x128xf32>
    %193 = math.tanh %192 : vector<8x128xf32>
    %cst_63 = arith.constant 1.000000e+00 : f32
    %194 = vector.broadcast %cst_63 : f32 to vector<8x128xf32>
    %195 = arith.subf %194, %187 : vector<8x128xf32>
    %196 = arith.mulf %195, %193 : vector<8x128xf32>
    %197 = arith.mulf %187, %173 : vector<8x128xf32>
    %198 = arith.addf %196, %197 : vector<8x128xf32>
    %c56 = arith.constant 56 : index
    %c0_64 = arith.constant 0 : index
    %199 = vector.load %arg14[%c56, %c0_64] : memref<64x384xf32, #tpu.memory_space<vmem>>, vector<8x384xf32>
    %200 = arith.truncf %198 : vector<8x128xf32> to vector<8x128xbf16>
    %c0_65 = arith.constant 0 : index
    %c0_66 = arith.constant 0 : index
    %201 = vector.load %arg3[%c0_65, %c0_66] : memref<128x384xbf16, #tpu.memory_space<vmem>>, vector<128x384xbf16>
    %cst_67 = arith.constant dense<0.000000e+00> : vector<8x384xf32>
    %202 = tpu.matmul %200, %201, %cst_67 {dimension_numbers = #tpu.dot_dimension_numbers<[1], [0], [0], [1], [0, 0, 1, 1], [], []>} : vector<8x128xbf16>, vector<128x384xbf16>, vector<8x384xf32> -> vector<8x384xf32>
    %203 = vector.extract_strided_slice %199 {offsets = [0, 0], sizes = [8, 256], strides = [1, 1]} : vector<8x384xf32> to vector<8x256xf32>
    %204 = vector.extract_strided_slice %202 {offsets = [0, 0], sizes = [8, 256], strides = [1, 1]} : vector<8x384xf32> to vector<8x256xf32>
    %205 = arith.addf %203, %204 : vector<8x256xf32>
    %206 = arith.negf %205 : vector<8x256xf32>
    %207 = math.exp %206 : vector<8x256xf32>
    %cst_68 = arith.constant 1.000000e+00 : f32
    %208 = vector.broadcast %cst_68 : f32 to vector<8x256xf32>
    %209 = arith.addf %208, %207 : vector<8x256xf32>
    %210 = arith.divf %208, %209 : vector<8x256xf32>
    %211 = vector.extract_strided_slice %210 {offsets = [0, 0], sizes = [8, 128], strides = [1, 1]} : vector<8x256xf32> to vector<8x128xf32>
    %212 = vector.extract_strided_slice %210 {offsets = [0, 128], sizes = [8, 128], strides = [1, 1]} : vector<8x256xf32> to vector<8x128xf32>
    %213 = vector.extract_strided_slice %199 {offsets = [0, 256], sizes = [8, 128], strides = [1, 1]} : vector<8x384xf32> to vector<8x128xf32>
    %214 = vector.extract_strided_slice %202 {offsets = [0, 256], sizes = [8, 128], strides = [1, 1]} : vector<8x384xf32> to vector<8x128xf32>
    %215 = arith.addf %214, %18 : vector<8x128xf32>
    %216 = arith.mulf %211, %215 : vector<8x128xf32>
    %217 = arith.addf %213, %216 : vector<8x128xf32>
    %218 = math.tanh %217 : vector<8x128xf32>
    %cst_69 = arith.constant 1.000000e+00 : f32
    %219 = vector.broadcast %cst_69 : f32 to vector<8x128xf32>
    %220 = arith.subf %219, %212 : vector<8x128xf32>
    %221 = arith.mulf %220, %218 : vector<8x128xf32>
    %222 = arith.mulf %212, %198 : vector<8x128xf32>
    %223 = arith.addf %221, %222 : vector<8x128xf32>
    %c0_70 = arith.constant 0 : index
    %c0_71 = arith.constant 0 : index
    %224 = vector.load %arg15[%c0_70, %c0_71] : memref<64x384xf32, #tpu.memory_space<vmem>>, vector<8x384xf32>
    %225 = arith.truncf %223 : vector<8x128xf32> to vector<8x128xbf16>
    %c0_72 = arith.constant 0 : index
    %c0_73 = arith.constant 0 : index
    %226 = vector.load %arg7[%c0_72, %c0_73] : memref<128x384xbf16, #tpu.memory_space<vmem>>, vector<128x384xbf16>
    %cst_74 = arith.constant dense<0.000000e+00> : vector<8x384xf32>
    %227 = tpu.matmul %225, %226, %cst_74 {dimension_numbers = #tpu.dot_dimension_numbers<[1], [0], [0], [1], [0, 0, 1, 1], [], []>} : vector<8x128xbf16>, vector<128x384xbf16>, vector<8x384xf32> -> vector<8x384xf32>
    %228 = vector.extract_strided_slice %224 {offsets = [0, 0], sizes = [8, 256], strides = [1, 1]} : vector<8x384xf32> to vector<8x256xf32>
    %229 = vector.extract_strided_slice %227 {offsets = [0, 0], sizes = [8, 256], strides = [1, 1]} : vector<8x384xf32> to vector<8x256xf32>
    %230 = arith.addf %228, %229 : vector<8x256xf32>
    %231 = arith.negf %230 : vector<8x256xf32>
    %232 = math.exp %231 : vector<8x256xf32>
    %cst_75 = arith.constant 1.000000e+00 : f32
    %233 = vector.broadcast %cst_75 : f32 to vector<8x256xf32>
    %234 = arith.addf %233, %232 : vector<8x256xf32>
    %235 = arith.divf %233, %234 : vector<8x256xf32>
    %236 = vector.extract_strided_slice %235 {offsets = [0, 0], sizes = [8, 128], strides = [1, 1]} : vector<8x256xf32> to vector<8x128xf32>
    %237 = vector.extract_strided_slice %235 {offsets = [0, 128], sizes = [8, 128], strides = [1, 1]} : vector<8x256xf32> to vector<8x128xf32>
    %238 = vector.extract_strided_slice %224 {offsets = [0, 256], sizes = [8, 128], strides = [1, 1]} : vector<8x384xf32> to vector<8x128xf32>
    %239 = vector.extract_strided_slice %227 {offsets = [0, 256], sizes = [8, 128], strides = [1, 1]} : vector<8x384xf32> to vector<8x128xf32>
    %240 = arith.addf %239, %21 : vector<8x128xf32>
    %241 = arith.mulf %236, %240 : vector<8x128xf32>
    %242 = arith.addf %238, %241 : vector<8x128xf32>
    %243 = math.tanh %242 : vector<8x128xf32>
    %cst_76 = arith.constant 1.000000e+00 : f32
    %244 = vector.broadcast %cst_76 : f32 to vector<8x128xf32>
    %245 = arith.subf %244, %237 : vector<8x128xf32>
    %246 = arith.mulf %245, %243 : vector<8x128xf32>
    %247 = arith.mulf %237, %223 : vector<8x128xf32>
    %248 = arith.addf %246, %247 : vector<8x128xf32>
    %c0_77 = arith.constant 0 : index
    %c0_78 = arith.constant 0 : index
    %249 = vector.load %arg16[%c0_77, %c0_78] : memref<64x128xf32, #tpu.memory_space<vmem>>, vector<8x128xf32>
    tpu.vector_store %arg16[%c0_77, %c0_78], %248 {strides = array<i32>} : memref<64x128xf32, #tpu.memory_space<vmem>>, vector<8x128xf32>,
    %c8_79 = arith.constant 8 : index
    %c0_80 = arith.constant 0 : index
    %250 = vector.load %arg15[%c8_79, %c0_80] : memref<64x384xf32, #tpu.memory_space<vmem>>, vector<8x384xf32>
    %251 = arith.truncf %248 : vector<8x128xf32> to vector<8x128xbf16>
    %c0_81 = arith.constant 0 : index
    %c0_82 = arith.constant 0 : index
    %252 = vector.load %arg7[%c0_81, %c0_82] : memref<128x384xbf16, #tpu.memory_space<vmem>>, vector<128x384xbf16>
    %cst_83 = arith.constant dense<0.000000e+00> : vector<8x384xf32>
    %253 = tpu.matmul %251, %252, %cst_83 {dimension_numbers = #tpu.dot_dimension_numbers<[1], [0], [0], [1], [0, 0, 1, 1], [], []>} : vector<8x128xbf16>, vector<128x384xbf16>, vector<8x384xf32> -> vector<8x384xf32>
    %254 = vector.extract_strided_slice %250 {offsets = [0, 0], sizes = [8, 256], strides = [1, 1]} : vector<8x384xf32> to vector<8x256xf32>
    %255 = vector.extract_strided_slice %253 {offsets = [0, 0], sizes = [8, 256], strides = [1, 1]} : vector<8x384xf32> to vector<8x256xf32>
    %256 = arith.addf %254, %255 : vector<8x256xf32>
    %257 = arith.negf %256 : vector<8x256xf32>
    %258 = math.exp %257 : vector<8x256xf32>
    %cst_84 = arith.constant 1.000000e+00 : f32
    %259 = vector.broadcast %cst_84 : f32 to vector<8x256xf32>
    %260 = arith.addf %259, %258 : vector<8x256xf32>
    %261 = arith.divf %259, %260 : vector<8x256xf32>
    %262 = vector.extract_strided_slice %261 {offsets = [0, 0], sizes = [8, 128], strides = [1, 1]} : vector<8x256xf32> to vector<8x128xf32>
    %263 = vector.extract_strided_slice %261 {offsets = [0, 128], sizes = [8, 128], strides = [1, 1]} : vector<8x256xf32> to vector<8x128xf32>
    %264 = vector.extract_strided_slice %250 {offsets = [0, 256], sizes = [8, 128], strides = [1, 1]} : vector<8x384xf32> to vector<8x128xf32>
    %265 = vector.extract_strided_slice %253 {offsets = [0, 256], sizes = [8, 128], strides = [1, 1]} : vector<8x384xf32> to vector<8x128xf32>
    %266 = arith.addf %265, %21 : vector<8x128xf32>
    %267 = arith.mulf %262, %266 : vector<8x128xf32>
    %268 = arith.addf %264, %267 : vector<8x128xf32>
    %269 = math.tanh %268 : vector<8x128xf32>
    %cst_85 = arith.constant 1.000000e+00 : f32
    %270 = vector.broadcast %cst_85 : f32 to vector<8x128xf32>
    %271 = arith.subf %270, %263 : vector<8x128xf32>
    %272 = arith.mulf %271, %269 : vector<8x128xf32>
    %273 = arith.mulf %263, %248 : vector<8x128xf32>
    %274 = arith.addf %272, %273 : vector<8x128xf32>
    %c8_86 = arith.constant 8 : index
    %c0_87 = arith.constant 0 : index
    %275 = vector.load %arg16[%c8_86, %c0_87] : memref<64x128xf32, #tpu.memory_space<vmem>>, vector<8x128xf32>
    tpu.vector_store %arg16[%c8_86, %c0_87], %274 {strides = array<i32>} : memref<64x128xf32, #tpu.memory_space<vmem>>, vector<8x128xf32>,
    %c16_88 = arith.constant 16 : index
    %c0_89 = arith.constant 0 : index
    %276 = vector.load %arg15[%c16_88, %c0_89] : memref<64x384xf32, #tpu.memory_space<vmem>>, vector<8x384xf32>
    %277 = arith.truncf %274 : vector<8x128xf32> to vector<8x128xbf16>
    %c0_90 = arith.constant 0 : index
    %c0_91 = arith.constant 0 : index
    %278 = vector.load %arg7[%c0_90, %c0_91] : memref<128x384xbf16, #tpu.memory_space<vmem>>, vector<128x384xbf16>
    %cst_92 = arith.constant dense<0.000000e+00> : vector<8x384xf32>
    %279 = tpu.matmul %277, %278, %cst_92 {dimension_numbers = #tpu.dot_dimension_numbers<[1], [0], [0], [1], [0, 0, 1, 1], [], []>} : vector<8x128xbf16>, vector<128x384xbf16>, vector<8x384xf32> -> vector<8x384xf32>
    %280 = vector.extract_strided_slice %276 {offsets = [0, 0], sizes = [8, 256], strides = [1, 1]} : vector<8x384xf32> to vector<8x256xf32>
    %281 = vector.extract_strided_slice %279 {offsets = [0, 0], sizes = [8, 256], strides = [1, 1]} : vector<8x384xf32> to vector<8x256xf32>
    %282 = arith.addf %280, %281 : vector<8x256xf32>
    %283 = arith.negf %282 : vector<8x256xf32>
    %284 = math.exp %283 : vector<8x256xf32>
    %cst_93 = arith.constant 1.000000e+00 : f32
    %285 = vector.broadcast %cst_93 : f32 to vector<8x256xf32>
    %286 = arith.addf %285, %284 : vector<8x256xf32>
    %287 = arith.divf %285, %286 : vector<8x256xf32>
    %288 = vector.extract_strided_slice %287 {offsets = [0, 0], sizes = [8, 128], strides = [1, 1]} : vector<8x256xf32> to vector<8x128xf32>
    %289 = vector.extract_strided_slice %287 {offsets = [0, 128], sizes = [8, 128], strides = [1, 1]} : vector<8x256xf32> to vector<8x128xf32>
    %290 = vector.extract_strided_slice %276 {offsets = [0, 256], sizes = [8, 128], strides = [1, 1]} : vector<8x384xf32> to vector<8x128xf32>
    %291 = vector.extract_strided_slice %279 {offsets = [0, 256], sizes = [8, 128], strides = [1, 1]} : vector<8x384xf32> to vector<8x128xf32>
    %292 = arith.addf %291, %21 : vector<8x128xf32>
    %293 = arith.mulf %288, %292 : vector<8x128xf32>
    %294 = arith.addf %290, %293 : vector<8x128xf32>
    %295 = math.tanh %294 : vector<8x128xf32>
    %cst_94 = arith.constant 1.000000e+00 : f32
    %296 = vector.broadcast %cst_94 : f32 to vector<8x128xf32>
    %297 = arith.subf %296, %289 : vector<8x128xf32>
    %298 = arith.mulf %297, %295 : vector<8x128xf32>
    %299 = arith.mulf %289, %274 : vector<8x128xf32>
    %300 = arith.addf %298, %299 : vector<8x128xf32>
    %c16_95 = arith.constant 16 : index
    %c0_96 = arith.constant 0 : index
    %301 = vector.load %arg16[%c16_95, %c0_96] : memref<64x128xf32, #tpu.memory_space<vmem>>, vector<8x128xf32>
    tpu.vector_store %arg16[%c16_95, %c0_96], %300 {strides = array<i32>} : memref<64x128xf32, #tpu.memory_space<vmem>>, vector<8x128xf32>,
    %c24_97 = arith.constant 24 : index
    %c0_98 = arith.constant 0 : index
    %302 = vector.load %arg15[%c24_97, %c0_98] : memref<64x384xf32, #tpu.memory_space<vmem>>, vector<8x384xf32>
    %303 = arith.truncf %300 : vector<8x128xf32> to vector<8x128xbf16>
    %c0_99 = arith.constant 0 : index
    %c0_100 = arith.constant 0 : index
    %304 = vector.load %arg7[%c0_99, %c0_100] : memref<128x384xbf16, #tpu.memory_space<vmem>>, vector<128x384xbf16>
    %cst_101 = arith.constant dense<0.000000e+00> : vector<8x384xf32>
    %305 = tpu.matmul %303, %304, %cst_101 {dimension_numbers = #tpu.dot_dimension_numbers<[1], [0], [0], [1], [0, 0, 1, 1], [], []>} : vector<8x128xbf16>, vector<128x384xbf16>, vector<8x384xf32> -> vector<8x384xf32>
    %306 = vector.extract_strided_slice %302 {offsets = [0, 0], sizes = [8, 256], strides = [1, 1]} : vector<8x384xf32> to vector<8x256xf32>
    %307 = vector.extract_strided_slice %305 {offsets = [0, 0], sizes = [8, 256], strides = [1, 1]} : vector<8x384xf32> to vector<8x256xf32>
    %308 = arith.addf %306, %307 : vector<8x256xf32>
    %309 = arith.negf %308 : vector<8x256xf32>
    %310 = math.exp %309 : vector<8x256xf32>
    %cst_102 = arith.constant 1.000000e+00 : f32
    %311 = vector.broadcast %cst_102 : f32 to vector<8x256xf32>
    %312 = arith.addf %311, %310 : vector<8x256xf32>
    %313 = arith.divf %311, %312 : vector<8x256xf32>
    %314 = vector.extract_strided_slice %313 {offsets = [0, 0], sizes = [8, 128], strides = [1, 1]} : vector<8x256xf32> to vector<8x128xf32>
    %315 = vector.extract_strided_slice %313 {offsets = [0, 128], sizes = [8, 128], strides = [1, 1]} : vector<8x256xf32> to vector<8x128xf32>
    %316 = vector.extract_strided_slice %302 {offsets = [0, 256], sizes = [8, 128], strides = [1, 1]} : vector<8x384xf32> to vector<8x128xf32>
    %317 = vector.extract_strided_slice %305 {offsets = [0, 256], sizes = [8, 128], strides = [1, 1]} : vector<8x384xf32> to vector<8x128xf32>
    %318 = arith.addf %317, %21 : vector<8x128xf32>
    %319 = arith.mulf %314, %318 : vector<8x128xf32>
    %320 = arith.addf %316, %319 : vector<8x128xf32>
    %321 = math.tanh %320 : vector<8x128xf32>
    %cst_103 = arith.constant 1.000000e+00 : f32
    %322 = vector.broadcast %cst_103 : f32 to vector<8x128xf32>
    %323 = arith.subf %322, %315 : vector<8x128xf32>
    %324 = arith.mulf %323, %321 : vector<8x128xf32>
    %325 = arith.mulf %315, %300 : vector<8x128xf32>
    %326 = arith.addf %324, %325 : vector<8x128xf32>
    %c24_104 = arith.constant 24 : index
    %c0_105 = arith.constant 0 : index
    %327 = vector.load %arg16[%c24_104, %c0_105] : memref<64x128xf32, #tpu.memory_space<vmem>>, vector<8x128xf32>
    tpu.vector_store %arg16[%c24_104, %c0_105], %326 {strides = array<i32>} : memref<64x128xf32, #tpu.memory_space<vmem>>, vector<8x128xf32>,
    %c32_106 = arith.constant 32 : index
    %c0_107 = arith.constant 0 : index
    %328 = vector.load %arg15[%c32_106, %c0_107] : memref<64x384xf32, #tpu.memory_space<vmem>>, vector<8x384xf32>
    %329 = arith.truncf %326 : vector<8x128xf32> to vector<8x128xbf16>
    %c0_108 = arith.constant 0 : index
    %c0_109 = arith.constant 0 : index
    %330 = vector.load %arg7[%c0_108, %c0_109] : memref<128x384xbf16, #tpu.memory_space<vmem>>, vector<128x384xbf16>
    %cst_110 = arith.constant dense<0.000000e+00> : vector<8x384xf32>
    %331 = tpu.matmul %329, %330, %cst_110 {dimension_numbers = #tpu.dot_dimension_numbers<[1], [0], [0], [1], [0, 0, 1, 1], [], []>} : vector<8x128xbf16>, vector<128x384xbf16>, vector<8x384xf32> -> vector<8x384xf32>
    %332 = vector.extract_strided_slice %328 {offsets = [0, 0], sizes = [8, 256], strides = [1, 1]} : vector<8x384xf32> to vector<8x256xf32>
    %333 = vector.extract_strided_slice %331 {offsets = [0, 0], sizes = [8, 256], strides = [1, 1]} : vector<8x384xf32> to vector<8x256xf32>
    %334 = arith.addf %332, %333 : vector<8x256xf32>
    %335 = arith.negf %334 : vector<8x256xf32>
    %336 = math.exp %335 : vector<8x256xf32>
    %cst_111 = arith.constant 1.000000e+00 : f32
    %337 = vector.broadcast %cst_111 : f32 to vector<8x256xf32>
    %338 = arith.addf %337, %336 : vector<8x256xf32>
    %339 = arith.divf %337, %338 : vector<8x256xf32>
    %340 = vector.extract_strided_slice %339 {offsets = [0, 0], sizes = [8, 128], strides = [1, 1]} : vector<8x256xf32> to vector<8x128xf32>
    %341 = vector.extract_strided_slice %339 {offsets = [0, 128], sizes = [8, 128], strides = [1, 1]} : vector<8x256xf32> to vector<8x128xf32>
    %342 = vector.extract_strided_slice %328 {offsets = [0, 256], sizes = [8, 128], strides = [1, 1]} : vector<8x384xf32> to vector<8x128xf32>
    %343 = vector.extract_strided_slice %331 {offsets = [0, 256], sizes = [8, 128], strides = [1, 1]} : vector<8x384xf32> to vector<8x128xf32>
    %344 = arith.addf %343, %21 : vector<8x128xf32>
    %345 = arith.mulf %340, %344 : vector<8x128xf32>
    %346 = arith.addf %342, %345 : vector<8x128xf32>
    %347 = math.tanh %346 : vector<8x128xf32>
    %cst_112 = arith.constant 1.000000e+00 : f32
    %348 = vector.broadcast %cst_112 : f32 to vector<8x128xf32>
    %349 = arith.subf %348, %341 : vector<8x128xf32>
    %350 = arith.mulf %349, %347 : vector<8x128xf32>
    %351 = arith.mulf %341, %326 : vector<8x128xf32>
    %352 = arith.addf %350, %351 : vector<8x128xf32>
    %c32_113 = arith.constant 32 : index
    %c0_114 = arith.constant 0 : index
    %353 = vector.load %arg16[%c32_113, %c0_114] : memref<64x128xf32, #tpu.memory_space<vmem>>, vector<8x128xf32>
    tpu.vector_store %arg16[%c32_113, %c0_114], %352 {strides = array<i32>} : memref<64x128xf32, #tpu.memory_space<vmem>>, vector<8x128xf32>,
    %c40_115 = arith.constant 40 : index
    %c0_116 = arith.constant 0 : index
    %354 = vector.load %arg15[%c40_115, %c0_116] : memref<64x384xf32, #tpu.memory_space<vmem>>, vector<8x384xf32>
    %355 = arith.truncf %352 : vector<8x128xf32> to vector<8x128xbf16>
    %c0_117 = arith.constant 0 : index
    %c0_118 = arith.constant 0 : index
    %356 = vector.load %arg7[%c0_117, %c0_118] : memref<128x384xbf16, #tpu.memory_space<vmem>>, vector<128x384xbf16>
    %cst_119 = arith.constant dense<0.000000e+00> : vector<8x384xf32>
    %357 = tpu.matmul %355, %356, %cst_119 {dimension_numbers = #tpu.dot_dimension_numbers<[1], [0], [0], [1], [0, 0, 1, 1], [], []>} : vector<8x128xbf16>, vector<128x384xbf16>, vector<8x384xf32> -> vector<8x384xf32>
    %358 = vector.extract_strided_slice %354 {offsets = [0, 0], sizes = [8, 256], strides = [1, 1]} : vector<8x384xf32> to vector<8x256xf32>
    %359 = vector.extract_strided_slice %357 {offsets = [0, 0], sizes = [8, 256], strides = [1, 1]} : vector<8x384xf32> to vector<8x256xf32>
    %360 = arith.addf %358, %359 : vector<8x256xf32>
    %361 = arith.negf %360 : vector<8x256xf32>
    %362 = math.exp %361 : vector<8x256xf32>
    %cst_120 = arith.constant 1.000000e+00 : f32
    %363 = vector.broadcast %cst_120 : f32 to vector<8x256xf32>
    %364 = arith.addf %363, %362 : vector<8x256xf32>
    %365 = arith.divf %363, %364 : vector<8x256xf32>
    %366 = vector.extract_strided_slice %365 {offsets = [0, 0], sizes = [8, 128], strides = [1, 1]} : vector<8x256xf32> to vector<8x128xf32>
    %367 = vector.extract_strided_slice %365 {offsets = [0, 128], sizes = [8, 128], strides = [1, 1]} : vector<8x256xf32> to vector<8x128xf32>
    %368 = vector.extract_strided_slice %354 {offsets = [0, 256], sizes = [8, 128], strides = [1, 1]} : vector<8x384xf32> to vector<8x128xf32>
    %369 = vector.extract_strided_slice %357 {offsets = [0, 256], sizes = [8, 128], strides = [1, 1]} : vector<8x384xf32> to vector<8x128xf32>
    %370 = arith.addf %369, %21 : vector<8x128xf32>
    %371 = arith.mulf %366, %370 : vector<8x128xf32>
    %372 = arith.addf %368, %371 : vector<8x128xf32>
    %373 = math.tanh %372 : vector<8x128xf32>
    %cst_121 = arith.constant 1.000000e+00 : f32
    %374 = vector.broadcast %cst_121 : f32 to vector<8x128xf32>
    %375 = arith.subf %374, %367 : vector<8x128xf32>
    %376 = arith.mulf %375, %373 : vector<8x128xf32>
    %377 = arith.mulf %367, %352 : vector<8x128xf32>
    %378 = arith.addf %376, %377 : vector<8x128xf32>
    %c40_122 = arith.constant 40 : index
    %c0_123 = arith.constant 0 : index
    %379 = vector.load %arg16[%c40_122, %c0_123] : memref<64x128xf32, #tpu.memory_space<vmem>>, vector<8x128xf32>
    tpu.vector_store %arg16[%c40_122, %c0_123], %378 {strides = array<i32>} : memref<64x128xf32, #tpu.memory_space<vmem>>, vector<8x128xf32>,
    %c48_124 = arith.constant 48 : index
    %c0_125 = arith.constant 0 : index
    %380 = vector.load %arg15[%c48_124, %c0_125] : memref<64x384xf32, #tpu.memory_space<vmem>>, vector<8x384xf32>
    %381 = arith.truncf %378 : vector<8x128xf32> to vector<8x128xbf16>
    %c0_126 = arith.constant 0 : index
    %c0_127 = arith.constant 0 : index
    %382 = vector.load %arg7[%c0_126, %c0_127] : memref<128x384xbf16, #tpu.memory_space<vmem>>, vector<128x384xbf16>
    %cst_128 = arith.constant dense<0.000000e+00> : vector<8x384xf32>
    %383 = tpu.matmul %381, %382, %cst_128 {dimension_numbers = #tpu.dot_dimension_numbers<[1], [0], [0], [1], [0, 0, 1, 1], [], []>} : vector<8x128xbf16>, vector<128x384xbf16>, vector<8x384xf32> -> vector<8x384xf32>
    %384 = vector.extract_strided_slice %380 {offsets = [0, 0], sizes = [8, 256], strides = [1, 1]} : vector<8x384xf32> to vector<8x256xf32>
    %385 = vector.extract_strided_slice %383 {offsets = [0, 0], sizes = [8, 256], strides = [1, 1]} : vector<8x384xf32> to vector<8x256xf32>
    %386 = arith.addf %384, %385 : vector<8x256xf32>
    %387 = arith.negf %386 : vector<8x256xf32>
    %388 = math.exp %387 : vector<8x256xf32>
    %cst_129 = arith.constant 1.000000e+00 : f32
    %389 = vector.broadcast %cst_129 : f32 to vector<8x256xf32>
    %390 = arith.addf %389, %388 : vector<8x256xf32>
    %391 = arith.divf %389, %390 : vector<8x256xf32>
    %392 = vector.extract_strided_slice %391 {offsets = [0, 0], sizes = [8, 128], strides = [1, 1]} : vector<8x256xf32> to vector<8x128xf32>
    %393 = vector.extract_strided_slice %391 {offsets = [0, 128], sizes = [8, 128], strides = [1, 1]} : vector<8x256xf32> to vector<8x128xf32>
    %394 = vector.extract_strided_slice %380 {offsets = [0, 256], sizes = [8, 128], strides = [1, 1]} : vector<8x384xf32> to vector<8x128xf32>
    %395 = vector.extract_strided_slice %383 {offsets = [0, 256], sizes = [8, 128], strides = [1, 1]} : vector<8x384xf32> to vector<8x128xf32>
    %396 = arith.addf %395, %21 : vector<8x128xf32>
    %397 = arith.mulf %392, %396 : vector<8x128xf32>
    %398 = arith.addf %394, %397 : vector<8x128xf32>
    %399 = math.tanh %398 : vector<8x128xf32>
    %cst_130 = arith.constant 1.000000e+00 : f32
    %400 = vector.broadcast %cst_130 : f32 to vector<8x128xf32>
    %401 = arith.subf %400, %393 : vector<8x128xf32>
    %402 = arith.mulf %401, %399 : vector<8x128xf32>
    %403 = arith.mulf %393, %378 : vector<8x128xf32>
    %404 = arith.addf %402, %403 : vector<8x128xf32>
    %c48_131 = arith.constant 48 : index
    %c0_132 = arith.constant 0 : index
    %405 = vector.load %arg16[%c48_131, %c0_132] : memref<64x128xf32, #tpu.memory_space<vmem>>, vector<8x128xf32>
    tpu.vector_store %arg16[%c48_131, %c0_132], %404 {strides = array<i32>} : memref<64x128xf32, #tpu.memory_space<vmem>>, vector<8x128xf32>,
    %c56_133 = arith.constant 56 : index
    %c0_134 = arith.constant 0 : index
    %406 = vector.load %arg15[%c56_133, %c0_134] : memref<64x384xf32, #tpu.memory_space<vmem>>, vector<8x384xf32>
    %407 = arith.truncf %404 : vector<8x128xf32> to vector<8x128xbf16>
    %c0_135 = arith.constant 0 : index
    %c0_136 = arith.constant 0 : index
    %408 = vector.load %arg7[%c0_135, %c0_136] : memref<128x384xbf16, #tpu.memory_space<vmem>>, vector<128x384xbf16>
    %cst_137 = arith.constant dense<0.000000e+00> : vector<8x384xf32>
    %409 = tpu.matmul %407, %408, %cst_137 {dimension_numbers = #tpu.dot_dimension_numbers<[1], [0], [0], [1], [0, 0, 1, 1], [], []>} : vector<8x128xbf16>, vector<128x384xbf16>, vector<8x384xf32> -> vector<8x384xf32>
    %410 = vector.extract_strided_slice %406 {offsets = [0, 0], sizes = [8, 256], strides = [1, 1]} : vector<8x384xf32> to vector<8x256xf32>
    %411 = vector.extract_strided_slice %409 {offsets = [0, 0], sizes = [8, 256], strides = [1, 1]} : vector<8x384xf32> to vector<8x256xf32>
    %412 = arith.addf %410, %411 : vector<8x256xf32>
    %413 = arith.negf %412 : vector<8x256xf32>
    %414 = math.exp %413 : vector<8x256xf32>
    %cst_138 = arith.constant 1.000000e+00 : f32
    %415 = vector.broadcast %cst_138 : f32 to vector<8x256xf32>
    %416 = arith.addf %415, %414 : vector<8x256xf32>
    %417 = arith.divf %415, %416 : vector<8x256xf32>
    %418 = vector.extract_strided_slice %417 {offsets = [0, 0], sizes = [8, 128], strides = [1, 1]} : vector<8x256xf32> to vector<8x128xf32>
    %419 = vector.extract_strided_slice %417 {offsets = [0, 128], sizes = [8, 128], strides = [1, 1]} : vector<8x256xf32> to vector<8x128xf32>
    %420 = vector.extract_strided_slice %406 {offsets = [0, 256], sizes = [8, 128], strides = [1, 1]} : vector<8x384xf32> to vector<8x128xf32>
    %421 = vector.extract_strided_slice %409 {offsets = [0, 256], sizes = [8, 128], strides = [1, 1]} : vector<8x384xf32> to vector<8x128xf32>
    %422 = arith.addf %421, %21 : vector<8x128xf32>
    %423 = arith.mulf %418, %422 : vector<8x128xf32>
    %424 = arith.addf %420, %423 : vector<8x128xf32>
    %425 = math.tanh %424 : vector<8x128xf32>
    %cst_139 = arith.constant 1.000000e+00 : f32
    %426 = vector.broadcast %cst_139 : f32 to vector<8x128xf32>
    %427 = arith.subf %426, %419 : vector<8x128xf32>
    %428 = arith.mulf %427, %425 : vector<8x128xf32>
    %429 = arith.mulf %419, %404 : vector<8x128xf32>
    %430 = arith.addf %428, %429 : vector<8x128xf32>
    %c56_140 = arith.constant 56 : index
    %c0_141 = arith.constant 0 : index
    %431 = vector.load %arg16[%c56_140, %c0_141] : memref<64x128xf32, #tpu.memory_space<vmem>>, vector<8x128xf32>
    tpu.vector_store %arg16[%c56_140, %c0_141], %430 {strides = array<i32>} : memref<64x128xf32, #tpu.memory_space<vmem>>, vector<8x128xf32>,
    %c0_142 = arith.constant 0 : index
    %c0_143 = arith.constant 0 : index
    %432 = vector.load %arg16[%c0_142, %c0_143] : memref<64x128xf32, #tpu.memory_space<vmem>>, vector<64x128xf32>
    %433 = arith.truncf %432 : vector<64x128xf32> to vector<64x128xbf16>
    %c0_144 = arith.constant 0 : index
    %c0_145 = arith.constant 0 : index
    %434 = vector.load %arg10[%c0_144, %c0_145] : memref<128x256xbf16, #tpu.memory_space<vmem>>, vector<128x256xbf16>
    %cst_146 = arith.constant dense<0.000000e+00> : vector<64x256xf32>
    %435 = tpu.matmul %433, %434, %cst_146 {dimension_numbers = #tpu.dot_dimension_numbers<[1], [0], [0], [1], [0, 0, 1, 1], [], []>} : vector<64x128xbf16>, vector<128x256xbf16>, vector<64x256xf32> -> vector<64x256xf32>
    %c0_147 = arith.constant 0 : index
    %c0_148 = arith.constant 0 : index
    %436 = vector.load %arg11[%c0_147, %c0_148] : memref<1x256xf32, #tpu.memory_space<vmem>>, vector<1x256xf32>
    %437 = vector.shape_cast %436 : vector<1x256xf32> to vector<1x256xf32>
    %438 = vector.broadcast %437 : vector<1x256xf32> to vector<64x256xf32>
    %439 = arith.addf %435, %438 : vector<64x256xf32>
    %440 = vector.extract_strided_slice %439 {offsets = [0, 0], sizes = [8, 256], strides = [1, 1]} : vector<64x256xf32> to vector<8x256xf32>
    %c0_149 = arith.constant 0 : index
    %c0_150 = arith.constant 0 : index
    %441 = vector.load %arg12[%c0_149, %c0_150] : memref<8x2048xf32, #tpu.memory_space<vmem>>, vector<8x256xf32>
    tpu.vector_store %arg12[%c0_149, %c0_150], %440 {strides = array<i32>} : memref<8x2048xf32, #tpu.memory_space<vmem>>, vector<8x256xf32>,
    %cst_151 = arith.constant dense<0xFF800000> : vector<8xf32>
    %442 = vector.multi_reduction <maximumf>, %440, %cst_151 [1] : vector<8x256xf32> to vector<8xf32>
    %443 = vector.shape_cast %442 : vector<8xf32> to vector<8x1xf32>
    %444 = vector.broadcast %443 : vector<8x1xf32> to vector<8x256xf32>
    %445 = arith.cmpf oeq, %440, %444 : vector<8x256xf32>
    %c256_i32 = arith.constant 256 : i32
    %446 = vector.broadcast %c256_i32 : i32 to vector<8x256xi32>
    %447 = arith.select %445, %22, %446 : vector<8x256xi1>, vector<8x256xi32>
    %cst_152 = arith.constant dense<2147483647> : vector<8xi32>
    %448 = vector.multi_reduction <minsi>, %447, %cst_152 [1] : vector<8x256xi32> to vector<8xi32>
    %449 = vector.shape_cast %448 : vector<8xi32> to vector<8x1xi32>
    %450 = vector.extract_strided_slice %439 {offsets = [8, 0], sizes = [8, 256], strides = [1, 1]} : vector<64x256xf32> to vector<8x256xf32>
    %c0_153 = arith.constant 0 : index
    %c256 = arith.constant 256 : index
    %451 = vector.load %arg12[%c0_153, %c256] : memref<8x2048xf32, #tpu.memory_space<vmem>>, vector<8x256xf32>
    tpu.vector_store %arg12[%c0_153, %c256], %450 {strides = array<i32>} : memref<8x2048xf32, #tpu.memory_space<vmem>>, vector<8x256xf32>,
    %cst_154 = arith.constant dense<0xFF800000> : vector<8xf32>
    %452 = vector.multi_reduction <maximumf>, %450, %cst_154 [1] : vector<8x256xf32> to vector<8xf32>
    %453 = vector.shape_cast %452 : vector<8xf32> to vector<8x1xf32>
    %454 = vector.broadcast %453 : vector<8x1xf32> to vector<8x256xf32>
    %455 = arith.cmpf oeq, %450, %454 : vector<8x256xf32>
    %c256_i32_155 = arith.constant 256 : i32
    %456 = vector.broadcast %c256_i32_155 : i32 to vector<8x256xi32>
    %457 = arith.select %455, %22, %456 : vector<8x256xi1>, vector<8x256xi32>
    %cst_156 = arith.constant dense<2147483647> : vector<8xi32>
    %458 = vector.multi_reduction <minsi>, %457, %cst_156 [1] : vector<8x256xi32> to vector<8xi32>
    %459 = vector.shape_cast %458 : vector<8xi32> to vector<8x1xi32>
    %460 = vector.extract_strided_slice %439 {offsets = [16, 0], sizes = [8, 256], strides = [1, 1]} : vector<64x256xf32> to vector<8x256xf32>
    %c0_157 = arith.constant 0 : index
    %c512 = arith.constant 512 : index
    %461 = vector.load %arg12[%c0_157, %c512] : memref<8x2048xf32, #tpu.memory_space<vmem>>, vector<8x256xf32>
    tpu.vector_store %arg12[%c0_157, %c512], %460 {strides = array<i32>} : memref<8x2048xf32, #tpu.memory_space<vmem>>, vector<8x256xf32>,
    %cst_158 = arith.constant dense<0xFF800000> : vector<8xf32>
    %462 = vector.multi_reduction <maximumf>, %460, %cst_158 [1] : vector<8x256xf32> to vector<8xf32>
    %463 = vector.shape_cast %462 : vector<8xf32> to vector<8x1xf32>
    %464 = vector.broadcast %463 : vector<8x1xf32> to vector<8x256xf32>
    %465 = arith.cmpf oeq, %460, %464 : vector<8x256xf32>
    %c256_i32_159 = arith.constant 256 : i32
    %466 = vector.broadcast %c256_i32_159 : i32 to vector<8x256xi32>
    %467 = arith.select %465, %22, %466 : vector<8x256xi1>, vector<8x256xi32>
    %cst_160 = arith.constant dense<2147483647> : vector<8xi32>
    %468 = vector.multi_reduction <minsi>, %467, %cst_160 [1] : vector<8x256xi32> to vector<8xi32>
    %469 = vector.shape_cast %468 : vector<8xi32> to vector<8x1xi32>
    %470 = vector.extract_strided_slice %439 {offsets = [24, 0], sizes = [8, 256], strides = [1, 1]} : vector<64x256xf32> to vector<8x256xf32>
    %c0_161 = arith.constant 0 : index
    %c768 = arith.constant 768 : index
    %471 = vector.load %arg12[%c0_161, %c768] : memref<8x2048xf32, #tpu.memory_space<vmem>>, vector<8x256xf32>
    tpu.vector_store %arg12[%c0_161, %c768], %470 {strides = array<i32>} : memref<8x2048xf32, #tpu.memory_space<vmem>>, vector<8x256xf32>,
    %cst_162 = arith.constant dense<0xFF800000> : vector<8xf32>
    %472 = vector.multi_reduction <maximumf>, %470, %cst_162 [1] : vector<8x256xf32> to vector<8xf32>
    %473 = vector.shape_cast %472 : vector<8xf32> to vector<8x1xf32>
    %474 = vector.broadcast %473 : vector<8x1xf32> to vector<8x256xf32>
    %475 = arith.cmpf oeq, %470, %474 : vector<8x256xf32>
    %c256_i32_163 = arith.constant 256 : i32
    %476 = vector.broadcast %c256_i32_163 : i32 to vector<8x256xi32>
    %477 = arith.select %475, %22, %476 : vector<8x256xi1>, vector<8x256xi32>
    %cst_164 = arith.constant dense<2147483647> : vector<8xi32>
    %478 = vector.multi_reduction <minsi>, %477, %cst_164 [1] : vector<8x256xi32> to vector<8xi32>
    %479 = vector.shape_cast %478 : vector<8xi32> to vector<8x1xi32>
    %480 = vector.extract_strided_slice %439 {offsets = [32, 0], sizes = [8, 256], strides = [1, 1]} : vector<64x256xf32> to vector<8x256xf32>
    %c0_165 = arith.constant 0 : index
    %c1024 = arith.constant 1024 : index
    %481 = vector.load %arg12[%c0_165, %c1024] : memref<8x2048xf32, #tpu.memory_space<vmem>>, vector<8x256xf32>
    tpu.vector_store %arg12[%c0_165, %c1024], %480 {strides = array<i32>} : memref<8x2048xf32, #tpu.memory_space<vmem>>, vector<8x256xf32>,
    %cst_166 = arith.constant dense<0xFF800000> : vector<8xf32>
    %482 = vector.multi_reduction <maximumf>, %480, %cst_166 [1] : vector<8x256xf32> to vector<8xf32>
    %483 = vector.shape_cast %482 : vector<8xf32> to vector<8x1xf32>
    %484 = vector.broadcast %483 : vector<8x1xf32> to vector<8x256xf32>
    %485 = arith.cmpf oeq, %480, %484 : vector<8x256xf32>
    %c256_i32_167 = arith.constant 256 : i32
    %486 = vector.broadcast %c256_i32_167 : i32 to vector<8x256xi32>
    %487 = arith.select %485, %22, %486 : vector<8x256xi1>, vector<8x256xi32>
    %cst_168 = arith.constant dense<2147483647> : vector<8xi32>
    %488 = vector.multi_reduction <minsi>, %487, %cst_168 [1] : vector<8x256xi32> to vector<8xi32>
    %489 = vector.shape_cast %488 : vector<8xi32> to vector<8x1xi32>
    %490 = vector.extract_strided_slice %439 {offsets = [40, 0], sizes = [8, 256], strides = [1, 1]} : vector<64x256xf32> to vector<8x256xf32>
    %c0_169 = arith.constant 0 : index
    %c1280 = arith.constant 1280 : index
    %491 = vector.load %arg12[%c0_169, %c1280] : memref<8x2048xf32, #tpu.memory_space<vmem>>, vector<8x256xf32>
    tpu.vector_store %arg12[%c0_169, %c1280], %490 {strides = array<i32>} : memref<8x2048xf32, #tpu.memory_space<vmem>>, vector<8x256xf32>,
    %cst_170 = arith.constant dense<0xFF800000> : vector<8xf32>
    %492 = vector.multi_reduction <maximumf>, %490, %cst_170 [1] : vector<8x256xf32> to vector<8xf32>
    %493 = vector.shape_cast %492 : vector<8xf32> to vector<8x1xf32>
    %494 = vector.broadcast %493 : vector<8x1xf32> to vector<8x256xf32>
    %495 = arith.cmpf oeq, %490, %494 : vector<8x256xf32>
    %c256_i32_171 = arith.constant 256 : i32
    %496 = vector.broadcast %c256_i32_171 : i32 to vector<8x256xi32>
    %497 = arith.select %495, %22, %496 : vector<8x256xi1>, vector<8x256xi32>
    %cst_172 = arith.constant dense<2147483647> : vector<8xi32>
    %498 = vector.multi_reduction <minsi>, %497, %cst_172 [1] : vector<8x256xi32> to vector<8xi32>
    %499 = vector.shape_cast %498 : vector<8xi32> to vector<8x1xi32>
    %500 = vector.extract_strided_slice %439 {offsets = [48, 0], sizes = [8, 256], strides = [1, 1]} : vector<64x256xf32> to vector<8x256xf32>
    %c0_173 = arith.constant 0 : index
    %c1536 = arith.constant 1536 : index
    %501 = vector.load %arg12[%c0_173, %c1536] : memref<8x2048xf32, #tpu.memory_space<vmem>>, vector<8x256xf32>
    tpu.vector_store %arg12[%c0_173, %c1536], %500 {strides = array<i32>} : memref<8x2048xf32, #tpu.memory_space<vmem>>, vector<8x256xf32>,
    %cst_174 = arith.constant dense<0xFF800000> : vector<8xf32>
    %502 = vector.multi_reduction <maximumf>, %500, %cst_174 [1] : vector<8x256xf32> to vector<8xf32>
    %503 = vector.shape_cast %502 : vector<8xf32> to vector<8x1xf32>
    %504 = vector.broadcast %503 : vector<8x1xf32> to vector<8x256xf32>
    %505 = arith.cmpf oeq, %500, %504 : vector<8x256xf32>
    %c256_i32_175 = arith.constant 256 : i32
    %506 = vector.broadcast %c256_i32_175 : i32 to vector<8x256xi32>
    %507 = arith.select %505, %22, %506 : vector<8x256xi1>, vector<8x256xi32>
    %cst_176 = arith.constant dense<2147483647> : vector<8xi32>
    %508 = vector.multi_reduction <minsi>, %507, %cst_176 [1] : vector<8x256xi32> to vector<8xi32>
    %509 = vector.shape_cast %508 : vector<8xi32> to vector<8x1xi32>
    %510 = vector.extract_strided_slice %439 {offsets = [56, 0], sizes = [8, 256], strides = [1, 1]} : vector<64x256xf32> to vector<8x256xf32>
    %c0_177 = arith.constant 0 : index
    %c1792 = arith.constant 1792 : index
    %511 = vector.load %arg12[%c0_177, %c1792] : memref<8x2048xf32, #tpu.memory_space<vmem>>, vector<8x256xf32>
    tpu.vector_store %arg12[%c0_177, %c1792], %510 {strides = array<i32>} : memref<8x2048xf32, #tpu.memory_space<vmem>>, vector<8x256xf32>,
    %cst_178 = arith.constant dense<0xFF800000> : vector<8xf32>
    %512 = vector.multi_reduction <maximumf>, %510, %cst_178 [1] : vector<8x256xf32> to vector<8xf32>
    %513 = vector.shape_cast %512 : vector<8xf32> to vector<8x1xf32>
    %514 = vector.broadcast %513 : vector<8x1xf32> to vector<8x256xf32>
    %515 = arith.cmpf oeq, %510, %514 : vector<8x256xf32>
    %c256_i32_179 = arith.constant 256 : i32
    %516 = vector.broadcast %c256_i32_179 : i32 to vector<8x256xi32>
    %517 = arith.select %515, %22, %516 : vector<8x256xi1>, vector<8x256xi32>
    %cst_180 = arith.constant dense<2147483647> : vector<8xi32>
    %518 = vector.multi_reduction <minsi>, %517, %cst_180 [1] : vector<8x256xi32> to vector<8xi32>
    %519 = vector.shape_cast %518 : vector<8xi32> to vector<8x1xi32>
    %520 = tpu.concatenate %449, %459, %469, %479, %489, %499, %509, %519 in 1 : vector<8x1xi32>, vector<8x1xi32>, vector<8x1xi32>, vector<8x1xi32>, vector<8x1xi32>, vector<8x1xi32>, vector<8x1xi32>, vector<8x1xi32> -> vector<8x8xi32>
    %c0_181 = arith.constant 0 : index
    %c0_182 = arith.constant 0 : index
    %521 = vector.load %arg13[%c0_181, %c0_182] : memref<8x8xi32, #tpu.memory_space<vmem>>, vector<8x8xi32>
    tpu.vector_store %arg13[%c0_181, %c0_182], %520 {strides = array<i32>} : memref<8x8xi32, #tpu.memory_space<vmem>>, vector<8x8xi32>,
    return
  }
}

</mosaic_0001>

<bundles_post_ra>
// kernel: seq2seq_forward.1
= control target key start
LH: loop header
LB: loop body
LE: loop exit
PB: predicated region body
PF: predicated region fallthrough
CT: control target
= control target key end

     0   :  { %v7589_v2 = vmov 0   ;;  %vm5703_vm0 = vmmov 0   ;;  %s7574_s0 = inlined_call_operand.vmem [shape: bf16[64,128], index: 0, kind: input, shape index: {}]   ;;  %s7575_s1 = inlined_call_operand.vmem [shape: bf16[64,128], index: 1, kind: input, shape index: {}]   ;;  %s7576_s2 = inlined_call_operand.vmem [shape: bf16[128,384], index: 2, kind: input, shape index: {}]   ;;  %s7577_s3 = inlined_call_operand.vmem [shape: bf16[128,384], index: 3, kind: input, shape index: {}]   ;;  %s7578_s4 = inlined_call_operand.vmem [shape: f32[1,384], index: 4, kind: input, shape index: {}]   ;;  %s7579_s5 = inlined_call_operand.vmem [shape: f32[1,128], index: 5, kind: input, shape index: {}]   ;;  %s7580_s6 = inlined_call_operand.vmem [shape: bf16[128,384], index: 6, kind: input, shape index: {}]   ;;  %s7581_s7 = inlined_call_operand.vmem [shape: bf16[128,384], index: 7, kind: input, shape index: {}]   ;;  %s7582_s8 = inlined_call_operand.vmem [shape: f32[1,384], index: 8, kind: input, shape index: {}]   ;;  %s7583_s9 = inlined_call_operand.vmem [shape: f32[1,128], index: 9, kind: input, shape index: {}]   ;;  %s7584_s10 = inlined_call_operand.vmem [shape: bf16[128,256], index: 10, kind: input, shape index: {}]   ;;  %s7585_s11 = inlined_call_operand.vmem [shape: f32[1,256], index: 11, kind: input, shape index: {}]   ;;  %s7586_s12 = inlined_call_operand.vmem [shape: f32[8,2048], index: 12, kind: output, shape index: {0}]   ;;  %s7587_s13 = inlined_call_operand.hbm [shape: s32[8,8], index: 13, kind: output, shape index: {1}]  }
   0x1   :  { %v5252_v0 = vld [vmem:[%s7576_s2 + $0x4] ss:$12 sps:$4 sm:$0xff]   ;;  %286 = vmatprep.mubr.bf16.mxu1 %v7589_v2  ;;  %657 = vmatprep.mubr.bf16.mxu0 %v7589_v2  ;;  %v5256_v3 = vld [vmem:[%s7576_s2] ss:$12 sps:$4 sm:$0xff]   ;;  %v5258_v5 = vld [vmem:[%s7576_s2 + $0x1c] ss:$12 sps:$4 sm:$0xff]  }
   0x2   :  { %v5254_v1 = vld [vmem:[%s7580_s6 + $0x4] ss:$12 sps:$4 sm:$0xff]   ;;  %254 = vmatprep.subr.bf16.mxu1 %v5252_v0  ;;  %v5257_v4 = vld [vmem:[%s7580_s6] ss:$12 sps:$4 sm:$0xff]   ;;  %v5260_v6 = vld [vmem:[%s7580_s6 + $0x1c] ss:$12 sps:$4 sm:$0xff]  }
   0x3   :  { %625 = vmatprep.subr.bf16.mxu0 %v5254_v1  ;;  %255 = vmatpush1.bf16.msra.mxu1 %v5256_v3  ;;  %v5262_v7 = vld [vmem:[%s7576_s2 + $0x18] ss:$12 sps:$4 sm:$0xff]   ;;  %v5264_v9 = vld [vmem:[%s7576_s2 + $0x34] ss:$12 sps:$4 sm:$0xff]   ;;  %v5268_v11 = vld [vmem:[%s7576_s2 + $0x30] ss:$12 sps:$4 sm:$0xff]  }
   0x4   :  { %626 = vmatpush1.bf16.msra.mxu0 %v5257_v4  ;;  %256 = vmatprep.subr.bf16.mxu1 %v5258_v5  ;;  %v5263_v8 = vld [vmem:[%s7580_s6 + $0x18] ss:$12 sps:$4 sm:$0xff]   ;;  %v5266_v10 = vld [vmem:[%s7580_s6 + $0x34] ss:$12 sps:$4 sm:$0xff]   ;;  %v5269_v12 = vld [vmem:[%s7580_s6 + $0x30] ss:$12 sps:$4 sm:$0xff]  }
   0x5   :  { %627 = vmatprep.subr.bf16.mxu0 %v5260_v6  ;;  %v5270_v13 = vld [vmem:[%s7576_s2 + $0x4c] ss:$12 sps:$4 sm:$0xff]   ;;  %v5274_v15 = vld [vmem:[%s7576_s2 + $0x48] ss:$12 sps:$4 sm:$0xff]   ;;  %v5276_v17 = vld [vmem:[%s7576_s2 + $0x64] ss:$12 sps:$4 sm:$0xff]  }
   0x6   :  { %v5272_v14 = vld [vmem:[%s7580_s6 + $0x4c] ss:$12 sps:$4 sm:$0xff]   ;;  %v5275_v16 = vld [vmem:[%s7580_s6 + $0x48] ss:$12 sps:$4 sm:$0xff]   ;;  %v5278_v18 = vld [vmem:[%s7580_s6 + $0x64] ss:$12 sps:$4 sm:$0xff]  }
   0x7   :  { %257 = vmatpush1.bf16.msra.mxu1 %v5262_v7  ;;  %v5280_v19 = vld [vmem:[%s7576_s2 + $0x60] ss:$12 sps:$4 sm:$0xff]   ;;  %v5282_v21 = vld [vmem:[%s7576_s2 + $0x7c] ss:$12 sps:$4 sm:$0xff]   ;;  %v5286_v23 = vld [vmem:[%s7576_s2 + $0x78] ss:$12 sps:$4 sm:$0xff]  }
   0x8   :  { %628 = vmatpush1.bf16.msra.mxu0 %v5263_v8  ;;  %258 = vmatprep.subr.bf16.mxu1 %v5264_v9  ;;  %v5281_v20 = vld [vmem:[%s7580_s6 + $0x60] ss:$12 sps:$4 sm:$0xff]   ;;  %v5284_v22 = vld [vmem:[%s7580_s6 + $0x7c] ss:$12 sps:$4 sm:$0xff]   ;;  %v5287_v24 = vld [vmem:[%s7580_s6 + $0x78] ss:$12 sps:$4 sm:$0xff]  }
   0x9   :  { %629 = vmatprep.subr.bf16.mxu0 %v5266_v10  ;;  %v5288_v25 = vld [vmem:[%s7576_s2 + $0x94] ss:$12 sps:$4 sm:$0xff]   ;;  %v5292_v27 = vld [vmem:[%s7576_s2 + $0x90] ss:$12 sps:$4 sm:$0xff]   ;;  %v5294_v29 = vld [vmem:[%s7576_s2 + $0xac] ss:$12 sps:$4 sm:$0xff]  }
   0xa   :  { %v5290_v26 = vld [vmem:[%s7580_s6 + $0x94] ss:$12 sps:$4 sm:$0xff]   ;;  %v5293_v28 = vld [vmem:[%s7580_s6 + $0x90] ss:$12 sps:$4 sm:$0xff]   ;;  %v5296_v30 = vld [vmem:[%s7580_s6 + $0xac] ss:$12 sps:$4 sm:$0xff]  }
   0xb   :  { %259 = vmatpush1.bf16.msra.mxu1 %v5268_v11  ;;  %v5298_v31 = vld [vmem:[%s7576_s2 + $0xa8] ss:$12 sps:$4 sm:$0xff]   ;;  %v5879_v34 = vld [vmem:[%s7574_s0] sm:$0xff]   ;;  %v5937_v45 = vld [vmem:[%s7577_s3 + $0x30] ss:$12 sps:$4 sm:$0xff]   ;;  %v7591_v11 = vmov 0.0  }
   0xc   :  { %630 = vmatpush1.bf16.msra.mxu0 %v5269_v12  ;;  %260 = vmatprep.subr.bf16.mxu1 %v5270_v13  ;;  %v5299_v32 = vld [vmem:[%s7580_s6 + $0xa8] ss:$12 sps:$4 sm:$0xff]   ;;  %v5884_v35 = vld [vmem:[%s7577_s3 + $0x4] ss:$12 sps:$4 sm:$0xff]   ;;  %v5894_v37 = vld [vmem:[%s7577_s3] ss:$12 sps:$4 sm:$0xff]  }
   0xd   :  { %631 = vmatprep.subr.bf16.mxu0 %v5272_v14  ;;  %v5301_v33 = vld [vmem:[%s7576_s2 + $0x8] ss:$12 sps:$4 sm:$0xff]   ;;  %v5889_v36 = vld [vmem:[%s7575_s1] sm:$0xff]   ;;  %v5316_v46 = vld [vmem:[%s7576_s2 + $0x50] ss:$12 sps:$4 sm:$0xff]  }
   0xe   :  { %v5306_v38 = vld [vmem:[%s7576_s2 + $0x20] ss:$12 sps:$4 sm:$0xff]   ;;  %v5903_v39 = vld [vmem:[%s7577_s3 + $0x1c] ss:$12 sps:$4 sm:$0xff]   ;;  %v5910_v40 = vld [vmem:[%s7577_s3 + $0x18] ss:$12 sps:$4 sm:$0xff]  }
   0xf   :  { %261 = vmatpush1.bf16.msra.mxu1 %v5274_v15  ;;  %v5311_v41 = vld [vmem:[%s7576_s2 + $0x38] ss:$12 sps:$4 sm:$0xff]   ;;  %v5920_v42 = vld [vmem:[%s7577_s3 + $0x34] ss:$12 sps:$4 sm:$0xff]   ;;  %v5927_v43 = vld [vmem:[%s7574_s0 + $0x8] sm:$0xff]  }
  0x10   :  { %632 = vmatpush1.bf16.msra.mxu0 %v5275_v16  ;;  %262 = vmatprep.subr.bf16.mxu1 %v5276_v17  ;;  %v5932_v44 = vld [vmem:[%s7575_s1 + $0x8] sm:$0xff]   ;;  %v5964_v50 = vld [vmem:[%s7577_s3 + $0x64] ss:$12 sps:$4 sm:$0xff]   ;;  %v5330_v58 = vld [vmem:[%s7574_s0 + $0x18] sm:$0xff]  }
  0x11   :  { %633 = vmatprep.subr.bf16.mxu0 %v5278_v18  ;;  %v5947_v47 = vld [vmem:[%s7577_s3 + $0x4c] ss:$12 sps:$4 sm:$0xff]   ;;  %v5955_v48 = vld [vmem:[%s7577_s3 + $0x48] ss:$12 sps:$4 sm:$0xff]   ;;  %v6020_v61 = vld [vmem:[%s7577_s3 + $0x90] ss:$12 sps:$4 sm:$0xff]  }
  0x12   :  { %v5321_v49 = vld [vmem:[%s7576_s2 + $0x68] ss:$12 sps:$4 sm:$0xff]   ;;  %v5979_v53 = vld [vmem:[%s7577_s3 + $0x60] ss:$12 sps:$4 sm:$0xff]   ;;  %v5995_v56 = vld [vmem:[%s7577_s3 + $0x78] ss:$12 sps:$4 sm:$0xff]  }
  0x13   :  { %263 = vmatpush1.bf16.msra.mxu1 %v5280_v19  ;;  %v5320_v51 = vld [vmem:[%s7574_s0 + $0x10] sm:$0xff]   ;;  %v5326_v54 = vld [vmem:[%s7576_s2 + $0x80] ss:$12 sps:$4 sm:$0xff]   ;;  %v5989_v55 = vld [vmem:[%s7577_s3 + $0x7c] ss:$12 sps:$4 sm:$0xff]  }
  0x14   :  { %634 = vmatpush1.bf16.msra.mxu0 %v5281_v20  ;;  %264 = vmatprep.subr.bf16.mxu1 %v5282_v21  ;;  %v5974_v52 = vld [vmem:[%s7575_s1 + $0x10] sm:$0xff]   ;;  %v5331_v57 = vld [vmem:[%s7576_s2 + $0x98] ss:$12 sps:$4 sm:$0xff]   ;;  %v5341_v3 = vld [vmem:[%s7580_s6 + $0x20] ss:$12 sps:$4 sm:$0xff]  }
  0x15   :  { %635 = vmatprep.subr.bf16.mxu0 %v5284_v22  ;;  %v6008_v59 = vld [vmem:[%s7577_s3 + $0x94] ss:$12 sps:$4 sm:$0xff]   ;;  %v6015_v60 = vld [vmem:[%s7575_s1 + $0x18] sm:$0xff]  }
  0x16   :  { %v5336_v62 = vld [vmem:[%s7576_s2 + $0xb0] ss:$12 sps:$4 sm:$0xff]   ;;  %v6030_v63 = vld [vmem:[%s7577_s3 + $0xac] ss:$12 sps:$4 sm:$0xff]   ;;  %v6037_v0 = vld [vmem:[%s7577_s3 + $0xa8] ss:$12 sps:$4 sm:$0xff]  }
  0x17   :  { %265 = vmatpush1.bf16.msra.mxu1 %v5286_v23  ;;  %v5340_v1 = vld [vmem:[%s7580_s6 + $0x8] ss:$12 sps:$4 sm:$0xff]   ;;  %v5342_v4 = vld [vmem:[%s7580_s6 + $0x38] ss:$12 sps:$4 sm:$0xff]   ;;  %v5343_v5 = vld [vmem:[%s7580_s6 + $0x50] ss:$12 sps:$4 sm:$0xff]  }
  0x18   :  { %636 = vmatpush1.bf16.msra.mxu0 %v5287_v24  ;;  %266 = vmatprep.subr.bf16.mxu1 %v5288_v25  ;;  %v5344_v6 = vld [vmem:[%s7580_s6 + $0x68] ss:$12 sps:$4 sm:$0xff]   ;;  %v5345_v7 = vld [vmem:[%s7580_s6 + $0x80] ss:$12 sps:$4 sm:$0xff]   ;;  %v5346_v8 = vld [vmem:[%s7580_s6 + $0x98] ss:$12 sps:$4 sm:$0xff]  }
  0x19   :  { %637 = vmatprep.subr.bf16.mxu0 %v5290_v26  ;;  %v5347_v9 = vld [vmem:[%s7580_s6 + $0xb0] ss:$12 sps:$4 sm:$0xff]   ;;  %v6088_v10 = vld [vmem:[%s7577_s3 + $0x8] ss:$12 sps:$4 sm:$0xff]   ;;  %v6096_v12 = vld [vmem:[%s7577_s3 + $0x20] ss:$12 sps:$4 sm:$0xff]  }
  0x1a   :  { %v6106_v13 = vld [vmem:[%s7577_s3 + $0x38] ss:$12 sps:$4 sm:$0xff]   ;;  %v6113_v14 = vld [vmem:[%s7577_s3 + $0x50] ss:$12 sps:$4 sm:$0xff]   ;;  %v6123_v15 = vld [vmem:[%s7577_s3 + $0x68] ss:$12 sps:$4 sm:$0xff]  }
  0x1b   :  { %267 = vmatpush1.bf16.msra.mxu1 %v5292_v27  ;;  %v6130_v16 = vld [vmem:[%s7577_s3 + $0x80] ss:$12 sps:$4 sm:$0xff]   ;;  %v6137_v17 = vld [vmem:[%s7577_s3 + $0x98] ss:$12 sps:$4 sm:$0xff]  }
  0x1c   :  { %638 = vmatpush1.bf16.msra.mxu0 %v5293_v28  ;;  %268 = vmatprep.subr.bf16.mxu1 %v5294_v29 }
  0x1d   :  { %639 = vmatprep.subr.bf16.mxu0 %v5296_v30 }
  0x1f   :  { %269 = vmatpush1.bf16.msra.mxu1 %v5298_v31 }
  0x20   :  { %640 = vmatpush1.bf16.msra.mxu0 %v5299_v32  ;;  %4880 = vmatprep.subr.bf16.mxu1 %v5301_v33 }
  0x21   :  { %967 = vmatprep.subr.bf16.mxu0 %v5884_v35 }
  0x22   :  { %287 = vmatmul.mubr.bf16.vlgmr.msra.gmra.mrb[0].mxu1 %v5879_v34 }
  0x23   :  { %658 = vmatmul.mubr.bf16.vlgmr.msra.gmra.mrb[0].mxu0 %v5889_v36  ;;  %4881 = vmatpush3.bf16.msra.mxu1 %v5301_v33 }
  0x24   :  { %968 = vmatpush1.bf16.msra.mxu0 %v5894_v37  ;;  %4882 = vmatprep.subr.bf16.mxu1 %v5306_v38 }
  0x25   :  { %969 = vmatprep.subr.bf16.mxu0 %v5903_v39  ;;  %296 = vmatprep.mubr.bf16.mxu1 %v7589_v2 }
  0x26   :  { %667 = vmatprep.mubr.bf16.mxu0 %v7589_v2 }
  0x27   :  { %4883 = vmatpush3.bf16.msra.mxu1 %v5306_v38 }
  0x28   :  { %970 = vmatpush1.bf16.msra.mxu0 %v5910_v40  ;;  %4884 = vmatprep.subr.bf16.mxu1 %v5311_v41 }
  0x29   :  { %971 = vmatprep.subr.bf16.mxu0 %v5920_v42 }
  0x2a   :  { %297 = vmatmul.mubr.bf16.gmra.mrb[4].mxu1 %v5927_v43 }
  0x2b   :  { %668 = vmatmul.mubr.bf16.gmra.mrb[4].mxu0 %v5932_v44  ;;  %4885 = vmatpush3.bf16.msra.mxu1 %v5311_v41 }
  0x2c   :  { %972 = vmatpush1.bf16.msra.mxu0 %v5937_v45  ;;  %4886 = vmatprep.subr.bf16.mxu1 %v5316_v46 }
  0x2d   :  { %973 = vmatprep.subr.bf16.mxu0 %v5947_v47  ;;  %306 = vmatprep.mubr.bf16.mxu1 %v7589_v2 }
  0x2e   :  { %677 = vmatprep.mubr.bf16.mxu0 %v7589_v2 }
  0x2f   :  { %4887 = vmatpush3.bf16.msra.mxu1 %v5316_v46 }
  0x30   :  { %974 = vmatpush1.bf16.msra.mxu0 %v5955_v48  ;;  %4888 = vmatprep.subr.bf16.mxu1 %v5321_v49 }
  0x31   :  { %975 = vmatprep.subr.bf16.mxu0 %v5964_v50 }
  0x32   :  { %307 = vmatmul.mubr.bf16.gmra.mrb[8].mxu1 %v5320_v51 }
  0x33   :  { %678 = vmatmul.mubr.bf16.gmra.mrb[8].mxu0 %v5974_v52  ;;  %4889 = vmatpush3.bf16.msra.mxu1 %v5321_v49 }
  0x34   :  { %976 = vmatpush1.bf16.msra.mxu0 %v5979_v53  ;;  %4890 = vmatprep.subr.bf16.mxu1 %v5326_v54 }
  0x35   :  { %977 = vmatprep.subr.bf16.mxu0 %v5989_v55  ;;  %316 = vmatprep.mubr.bf16.mxu1 %v7589_v2 }
  0x36   :  { %687 = vmatprep.mubr.bf16.mxu0 %v7589_v2 }
  0x37   :  { %4891 = vmatpush3.bf16.msra.mxu1 %v5326_v54 }
  0x38   :  { %978 = vmatpush1.bf16.msra.mxu0 %v5995_v56  ;;  %4892 = vmatprep.subr.bf16.mxu1 %v5331_v57 }
  0x39   :  { %979 = vmatprep.subr.bf16.mxu0 %v6008_v59 }
  0x3a   :  { %317 = vmatmul.mubr.bf16.gmra.mrb[12].mxu1 %v5330_v58 }
  0x3b   :  { %688 = vmatmul.mubr.bf16.gmra.mrb[12].mxu0 %v6015_v60  ;;  %4893 = vmatpush3.bf16.msra.mxu1 %v5331_v57 }
  0x3c   :  { %980 = vmatpush1.bf16.msra.mxu0 %v6020_v61  ;;  %4894 = vmatprep.subr.bf16.mxu1 %v5336_v62 }
  0x3d   :  { %981 = vmatprep.subr.bf16.mxu0 %v6030_v63  ;;  %4896 = vmatprep.mubr.bf16.mxu1 %v5879_v34 }
  0x3e   :  { %999 = vmatprep.mubr.bf16.mxu0 %v7589_v2 }
  0x3f   :  { %4895 = vmatpush3.bf16.msra.mxu1 %v5336_v62 }
  0x40   :  { %982 = vmatpush1.bf16.msra.mxu0 %v6037_v0  ;;  %4904 = vmatprep.subr.bf16.mxu1 %v5340_v1 }
  0x41   :  { %1074 = vmatprep.subr.bf16.mxu0 %v5884_v35 }
  0x42   :  { %4897 = vmatmul.mubr.bf16.vlgmr.msra.gmra.mrb[16].mxu1 %v5927_v43 }
  0x43   :  { %1000 = vmatmul.mubr.bf16.vlgmr.msra.gmra.mrb[16].mxu0 %v7589_v2  ;;  %4905 = vmatpush3.bf16.msra.mxu1 %v5340_v1 }
  0x44   :  { %4900 = vmatprep.mubr.bf16.mxu1 %v5320_v51  ;;  %4906 = vmatprep.subr.bf16.mxu1 %v5341_v3 }
  0x45   :  { %1075 = vmatpush1.bf16.msra.mxu0 %v5894_v37  ;;  %1106 = vmatprep.mubr.bf16.mxu0 %v7589_v2 }
  0x46   :  { %1076 = vmatprep.subr.bf16.mxu0 %v5903_v39 }
  0x47   :  { %4907 = vmatpush3.bf16.msra.mxu1 %v5341_v3 }
  0x48   :  { %4908 = vmatprep.subr.bf16.mxu1 %v5342_v4 }
  0x49   :  { %1077 = vmatpush1.bf16.msra.mxu0 %v5910_v40 }
  0x4a   :  { %1078 = vmatprep.subr.bf16.mxu0 %v5920_v42  ;;  %4901 = vmatmul.mubr.bf16.gmra.mrb[20].mxu1 %v5330_v58 }
  0x4b   :  { %4909 = vmatpush3.bf16.msra.mxu1 %v5342_v4  ;;  %4920 = vmatprep.mubr.bf16.mxu1 %v5889_v36 }
  0x4c   :  { %4910 = vmatprep.subr.bf16.mxu1 %v5343_v5 }
  0x4d   :  { %1079 = vmatpush1.bf16.msra.mxu0 %v5937_v45 }
  0x4e   :  { %1080 = vmatprep.subr.bf16.mxu0 %v5947_v47 }
  0x4f   :  { %4911 = vmatpush3.bf16.msra.mxu1 %v5343_v5 }
  0x50   :  { %4912 = vmatprep.subr.bf16.mxu1 %v5344_v6 }
  0x51   :  { %1081 = vmatpush1.bf16.msra.mxu0 %v5955_v48 }
  0x52   :  { %1082 = vmatprep.subr.bf16.mxu0 %v5964_v50 }
  0x53   :  { %4913 = vmatpush3.bf16.msra.mxu1 %v5344_v6 }
  0x54   :  { %4914 = vmatprep.subr.bf16.mxu1 %v5345_v7 }
  0x55   :  { %1083 = vmatpush1.bf16.msra.mxu0 %v5979_v53 }
  0x56   :  { %1084 = vmatprep.subr.bf16.mxu0 %v5989_v55 }
  0x57   :  { %4915 = vmatpush3.bf16.msra.mxu1 %v5345_v7 }
  0x58   :  { %4916 = vmatprep.subr.bf16.mxu1 %v5346_v8 }
  0x59   :  { %1085 = vmatpush1.bf16.msra.mxu0 %v5995_v56 }
  0x5a   :  { %1086 = vmatprep.subr.bf16.mxu0 %v6008_v59 }
  0x5b   :  { %4917 = vmatpush3.bf16.msra.mxu1 %v5346_v8 }
  0x5c   :  { %4918 = vmatprep.subr.bf16.mxu1 %v5347_v9 }
  0x5d   :  { %1087 = vmatpush1.bf16.msra.mxu0 %v6020_v61 }
  0x5e   :  { %1088 = vmatprep.subr.bf16.mxu0 %v6030_v63 }
  0x5f   :  { %4919 = vmatpush3.bf16.msra.mxu1 %v5347_v9 }
  0x60   :  { %4928 = vmatprep.subr.bf16.mxu1 %v7591_v11 }
  0x61   :  { %1089 = vmatpush1.bf16.msra.mxu0 %v6037_v0 }
  0x62   :  { %1181 = vmatprep.subr.bf16.mxu0 %v5884_v35  ;;  %4921 = vmatmul.mubr.bf16.vlgmr.msra.gmra.mrb[24].mxu1 %v5932_v44 }
  0x63   :  { %4929 = vmatpush3.bf16.msra.mxu1 %v6088_v10  ;;  %4924 = vmatprep.mubr.bf16.mxu1 %v5974_v52 }
  0x64   :  { %4930 = vmatprep.subr.bf16.mxu1 %v7591_v11 }
  0x67   :  { %4931 = vmatpush3.bf16.msra.mxu1 %v6096_v12 }
  0x68   :  { %4932 = vmatprep.subr.bf16.mxu1 %v7591_v11 }
  0x6a   :  { %4925 = vmatmul.mubr.bf16.gmra.mrb[28].mxu1 %v6015_v60 }
  0x6b   :  { %4933 = vmatpush3.bf16.msra.mxu1 %v6106_v13  ;;  %4944 = vmatprep.mubr.msk.bf16.mxu1 %vm5703_vm0, %v7591_v11 }
  0x6c   :  { %4934 = vmatprep.subr.bf16.mxu1 %v7591_v11 }
  0x6f   :  { %4935 = vmatpush3.bf16.msra.mxu1 %v6113_v14 }
  0x70   :  { %4936 = vmatprep.subr.bf16.mxu1 %v7591_v11 }
  0x73   :  { %4937 = vmatpush3.bf16.msra.mxu1 %v6123_v15 }
  0x74   :  { %4938 = vmatprep.subr.bf16.mxu1 %v7591_v11 }
  0x77   :  { %4939 = vmatpush3.bf16.msra.mxu1 %v6130_v16 }
  0x78   :  { %4940 = vmatprep.subr.bf16.mxu1 %v7591_v11 }
  0x79   :  { %19 = vsyncpa [#allocation6], 0  ;;  %v6145_v18 = vld [vmem:[%s7577_s3 + $0xb0] ss:$12 sps:$4 sm:$0xff]   ;;  %v7588_v19 = vlaneseq  ;;  %v6178_v22 = vld [vmem:[%s7578_s4] sm:$0x7] }
  0x7a   :  { %v6183_v23 = vld [vmem:[%s7582_s8] sm:$0x7] }
  0x7b   :  { %4941 = vmatpush3.bf16.msra.mxu1 %v6137_v17  ;;  %v6170_v20 = vshrl.u32 %v7588_v19, 7 }
  0x7c   :  { %4942 = vmatprep.subr.bf16.mxu1 %v7591_v11 }
  0x7d   :  { %v6173_v21 = vsub.s32 0, %v6170_v20  ;;  %v6186_v24 = vsub.s32 1, %v6170_v20 }
  0x7f   :  { %4943 = vmatpush3.bf16.msra.mxu1 %v6145_v18  ;;  %7596 = vst [vmem:[#allocation8_spill] sm:$0xff] %v6173_v21  ;;  %7597 = vst [vmem:[#allocation9_spill] sm:$0xff] %v6186_v24  ;;  %v6190_v25 = vrot.slane %v6178_v22, %v6173_v21  ;;  %v6194_v26 = vrot.slane %v6183_v23, %v6173_v21  ;;  %v6202_v29 = vrot.slane %v6183_v23, %v6186_v24 }
  0x80   :  { %4948 = vmatprep.subr.bf16.mxu1 %v7591_v11  ;;  %v94_v32 = vrot.slane %v6178_v22, %v6186_v24 }
  0x81   :  { %7599 = vst [vmem:[#allocation11_spill] sm:$0xff] %v6202_v29 }
  0x82   :  { %4945 = vmatmul.mubr.bf16.vlgmr.msra.gmra.mrb[32].mxu1 %v7589_v2 }
  0x83   :  { %4949 = vmatpush3.bf16.msra.mxu1 %v6088_v10  ;;  %4964 = vmatprep.mubr.msk.bf16.mxu1 %vm5703_vm0, %v7591_v11 }
  0x84   :  { %4950 = vmatprep.subr.bf16.mxu1 %v7591_v11 }
  0x87   :  { %4951 = vmatpush3.bf16.msra.mxu1 %v6096_v12 }
  0x88   :  { %4952 = vmatprep.subr.bf16.mxu1 %v7591_v11 }
  0x8b   :  { %4953 = vmatpush3.bf16.msra.mxu1 %v6106_v13 }
  0x8c   :  { %4954 = vmatprep.subr.bf16.mxu1 %v7591_v11 }
  0x8f   :  { %4955 = vmatpush3.bf16.msra.mxu1 %v6113_v14 }
  0x90   :  { %4956 = vmatprep.subr.bf16.mxu1 %v7591_v11 }
  0x93   :  { %4957 = vmatpush3.bf16.msra.mxu1 %v6123_v15 }
  0x94   :  { %4958 = vmatprep.subr.bf16.mxu1 %v7591_v11 }
  0x97   :  { %4959 = vmatpush3.bf16.msra.mxu1 %v6130_v16 }
  0x98   :  { %4960 = vmatprep.subr.bf16.mxu1 %v7591_v11 }
  0x9b   :  { %4961 = vmatpush3.bf16.msra.mxu1 %v6137_v17 }
  0x9c   :  { %4962 = vmatprep.subr.bf16.mxu1 %v7591_v11 }
  0x9f   :  { %4963 = vmatpush3.bf16.msra.mxu1 %v6145_v18 }
  0xa0   :  { %4968 = vmatprep.subr.bf16.mxu1 %v7591_v11 }
  0xf5   :  { %v6196_v27 = vpop.f32.mrb[0].mxu1 }
  0xf6   :  { %v6198_v28 = vpop.f32.mrb[0].mxu0  ;;  %v290_v30 = vpop.f32.mrb[1].mxu1 }
  0xf7   :  { %7598 = vst [vmem:[#allocation10_spill] sm:$0xff] %v6198_v28  ;;  %v6204_v31 = vpop.f32.mrb[1].mxu0  ;;  %v292_v33 = vpop.f32.mrb[2].mxu1 }
  0xf8   :  { %7600 = vst [vmem:[#allocation12_spill] sm:$0xff] %v6204_v31  ;;  %v663_v34 = vpop.f32.mrb[2].mxu0  ;;  %v6209_v35 = vadd.f32 %v292_v33, %v6190_v25  ;;  %v294_v36 = vpop.f32.mrb[3].mxu1 }
  0xf9   :  { %v6212_v37 = vadd.f32 %v663_v34, %v6194_v26  ;;  %v665_v38 = vpop.f32.mrb[3].mxu0  ;;  %v6214_v39 = vadd.f32 %v294_v36, %v94_v32 }
  0xfa   :  { %v6217_v40 = vadd.f32 %v665_v38, %v6202_v29 }
  0xfb   :  { %7601 = vst [vmem:[#allocation13_spill] sm:$0xff] %v6212_v37 }
  0xfc   :  { %7602 = vst [vmem:[#allocation14_spill] sm:$0xff] %v6217_v40 }
  0xfd   :  { %v298_v41 = vpop.f32.mrb[4].mxu1 }
  0xfe   :  { %v669_v42 = vpop.f32.mrb[4].mxu0  ;;  %v6220_v43 = vadd.f32 %v298_v41, %v6190_v25  ;;  %v300_v44 = vpop.f32.mrb[5].mxu1 }
  0xff   :  { %v6223_v45 = vadd.f32 %v669_v42, %v6194_v26  ;;  %v671_v46 = vpop.f32.mrb[5].mxu0  ;;  %v6225_v47 = vadd.f32 %v300_v44, %v94_v32  ;;  %v302_v48 = vpop.f32.mrb[6].mxu1 }
 0x100   :  { %v6228_v49 = vadd.f32 %v671_v46, %v6202_v29  ;;  %v673_v51 = vpop.f32.mrb[6].mxu0  ;;  %v6231_v52 = vadd.f32 %v302_v48, %v6190_v25  ;;  %v304_v54 = vpop.f32.mrb[7].mxu1 }
 0x101   :  { %7603 = vst [vmem:[#allocation15_spill] sm:$0xff] %v6223_v45  ;;  %v6234_v57 = vadd.f32 %v673_v51, %v6194_v26  ;;  %v675_v58 = vpop.f32.mrb[7].mxu0  ;;  %v6236_v60 = vadd.f32 %v304_v54, %v94_v32 }
 0x102   :  { %7604 = vst [vmem:[#allocation16_spill] sm:$0xff] %v6228_v49  ;;  %v6239_v62 = vadd.f32 %v675_v58, %v6202_v29 }
 0x103   :  { %7605 = vst [vmem:[#allocation17_spill] sm:$0xff] %v6234_v57 }
 0x104   :  { %7606 = vst [vmem:[#allocation18_spill] sm:$0xff] %v6239_v62 }
 0x105   :  { %v308_v1 = vpop.f32.mrb[8].mxu1 }
 0x106   :  { %v679_v3 = vpop.f32.mrb[8].mxu0  ;;  %v6242_v4 = vadd.f32 %v308_v1, %v6190_v25  ;;  %v310_v5 = vpop.f32.mrb[9].mxu1 }
 0x107   :  { %v6245_v6 = vadd.f32 %v679_v3, %v6194_v26  ;;  %v681_v7 = vpop.f32.mrb[9].mxu0  ;;  %v6247_v8 = vadd.f32 %v310_v5, %v94_v32  ;;  %v312_v9 = vpop.f32.mrb[10].mxu1  ;;  %v97_v5 = vsub.s32 2, %v6170_v20 }
 0x108   :  { %v6250_v33 = vadd.f32 %v681_v7, %v6202_v29  ;;  %v683_v34 = vpop.f32.mrb[10].mxu0  ;;  %v6253_v36 = vadd.f32 %v312_v9, %v6190_v25  ;;  %v314_v38 = vpop.f32.mrb[11].mxu1 }
 0x109   :  { %7607 = vst [vmem:[#allocation19_spill] sm:$0xff] %v6245_v6  ;;  %v6256_v41 = vadd.f32 %v683_v34, %v6194_v26  ;;  %v685_v42 = vpop.f32.mrb[11].mxu0  ;;  %v6258_v44 = vadd.f32 %v314_v38, %v94_v32  ;;  %v98_v20 = vrot.slane %v6178_v22, %v97_v5 }
 0x10a   :  { %7608 = vst [vmem:[#allocation20_spill] sm:$0xff] %v6250_v33  ;;  %v6261_v46 = vadd.f32 %v685_v42, %v6202_v29 }
 0x10b   :  { %7609 = vst [vmem:[#allocation21_spill] sm:$0xff] %v6256_v41 }
 0x10c   :  { %7610 = vst [vmem:[#allocation22_spill] sm:$0xff] %v6261_v46 }
 0x10d   :  { %v318_v48 = vpop.f32.mrb[12].mxu1 }
 0x10e   :  { %v689_v51 = vpop.f32.mrb[12].mxu0  ;;  %v6264_v54 = vadd.f32 %v318_v48, %v6190_v25  ;;  %v320_v58 = vpop.f32.mrb[13].mxu1 }
 0x10f   :  { %v6267_v1 = vadd.f32 %v689_v51, %v6194_v26  ;;  %v691_v3 = vpop.f32.mrb[13].mxu0  ;;  %v6270_v7 = vadd.f32 %v320_v58, %v94_v32  ;;  %v322_v9 = vpop.f32.mrb[14].mxu1  ;;  %v289_v58 = vadd.f32 %v6196_v27, %v6190_v25 }
 0x110   :  { %v6273_v34 = vadd.f32 %v691_v3, %v6202_v29  ;;  %v693_v38 = vpop.f32.mrb[14].mxu0  ;;  %v6276_v42 = vadd.f32 %v322_v9, %v6190_v25  ;;  %v324_v19 = vpop.f32.mrb[15].mxu1  ;;  %v291_v3 = vadd.f32 %v290_v30, %v94_v32 }
 0x111   :  { %7611 = vst [vmem:[#allocation23_spill] sm:$0xff] %v6267_v1  ;;  %v6279_v48 = vadd.f32 %v693_v38, %v6194_v26  ;;  %v695_v2 = vpop.f32.mrb[15].mxu0  ;;  %v6281_v51 = vadd.f32 %v324_v19, %v94_v32 }
 0x112   :  { %7612 = vst [vmem:[#allocation24_spill] sm:$0xff] %v6273_v34  ;;  %v6284_v11 = vadd.f32 %v695_v2, %v6202_v29 }
 0x113   :  { %7613 = vst [vmem:[#allocation25_spill] sm:$0xff] %v6279_v48 }
 0x114   :  { %7614 = vst [vmem:[#allocation26_spill] sm:$0xff] %v6284_v11 }
 0x115   :  { %v4898_v24 = vpop.f32.mrb[16].mxu1 }
 0x116   :  { %v1001_v21 = vpop.f32.mrb[16].mxu0  ;;  %v6289_v9 = vadd.f32 %v4898_v24, %v98_v20  ;;  %v361_v1 = vpop.f32.mrb[17].mxu1 }
 0x117   :  { %v1048_v34 = vadd.f32 %v1001_v21, %v289_v58  ;;  %v1003_v38 = vpop.f32.mrb[17].mxu0  ;;  %v4899_v46 = vpop.f32.mrb[18].mxu1  ;;  %v469_v58 = vrot.slane %v6183_v23, %v97_v5 }
 0x118   :  { %v1049_v48 = vadd.f32 %v1003_v38, %v291_v3  ;;  %v1005_v19 = vpop.f32.mrb[18].mxu0  ;;  %v6291_v41 = vadd.f32 %v4899_v46, %v98_v20  ;;  %v364_v2 = vpop.f32.mrb[19].mxu1 }
 0x119   :  { %v1006_v11 = vpop.f32.mrb[19].mxu0  ;;  %v6293_v33 = vadd.f32 %v364_v2, %v98_v20  ;;  %v4472_v2 = vmul.f32 -1.442695, %v1048_v34 }
 0x11b   :  { %5492 = vpow2.f32 %v4472_v2  ;;  %v6323_v2 = vld [vmem:[%s7579_s5] ss:$0 sm:$0xff] }
 0x11d   :  { %v4902_v22 = vpop.f32.mrb[20].mxu1 }
 0x11e   :  { %v6295_v6 = vadd.f32 %v4902_v22, %v98_v20  ;;  %v377_v25 = vpop.f32.mrb[21].mxu1 }
 0x11f   :  { %v6297_v27 = vadd.f32 %v377_v25, %v98_v20  ;;  %v4903_v24 = vpop.f32.mrb[22].mxu1 }
 0x120   :  { %v6299_v30 = vadd.f32 %v4903_v24, %v98_v20  ;;  %v380_v21 = vpop.f32.mrb[23].mxu1 }
 0x121   :  { %v6301_v32 = vadd.f32 %v380_v21, %v98_v20 }
 0x125   :  { %v5493_v34 = vpop.eup %5492 }
 0x135   :  { %v4922_v46 = vpop.f32.mrb[24].mxu1 }
 0x136   :  { %v6304_v3 = vadd.f32 %v4922_v46, %v469_v58  ;;  %v732_v11 = vpop.f32.mrb[25].mxu1 }
 0x137   :  { %v6306_v38 = vadd.f32 %v732_v11, %v469_v58  ;;  %v4923_v19 = vpop.f32.mrb[26].mxu1 }
 0x138   :  { %7615 = vst [vmem:[#allocation27_spill] sm:$0xff] %v6304_v3  ;;  %v6308_v22 = vadd.f32 %v4923_v19, %v469_v58  ;;  %v735_v25 = vpop.f32.mrb[27].mxu1  ;;  %v4473_v3 = vmul.f32 -1.442695, %v1049_v48  ;;  %v1056_v19 = vadd.f32 1.0, %v5493_v34 }
 0x139   :  { %7616 = vst [vmem:[#allocation28_spill] sm:$0xff] %v6306_v38  ;;  %v6310_v62 = vadd.f32 %v735_v25, %v469_v58 }
 0x13a   :  { %7617 = vst [vmem:[#allocation29_spill] sm:$0xff] %v6308_v22  ;;  %5494 = vpow2.f32 %v4473_v3 }
 0x13b   :  { %7618 = vst [vmem:[#allocation30_spill] sm:$0xff] %v6310_v62  ;;  %5496 = vrcp.f32 %v1056_v19 }
 0x13d   :  { %v4926_v24 = vpop.f32.mrb[28].mxu1 }
 0x13e   :  { %v6312_v57 = vadd.f32 %v4926_v24, %v469_v58  ;;  %v748_v21 = vpop.f32.mrb[29].mxu1 }
 0x13f   :  { %v6314_v49 = vadd.f32 %v748_v21, %v469_v58  ;;  %v4927_v23 = vpop.f32.mrb[30].mxu1 }
 0x140   :  { %7619 = vst [vmem:[#allocation31_spill] sm:$0xff] %v6312_v57  ;;  %v6316_v5 = vadd.f32 %v4927_v23, %v469_v58  ;;  %v751_v46 = vpop.f32.mrb[31].mxu1 }
 0x141   :  { %7620 = vst [vmem:[#allocation32_spill] sm:$0xff] %v6314_v49  ;;  %v6318_v11 = vadd.f32 %v751_v46, %v469_v58  ;;  %v362_v58 = vadd.f32 %v361_v1, %v98_v20  ;;  %v7624_v1 = vmov 0   ;;  %v6350_v20 = vld [vmem:[%s7577_s3 + $0x18] ss:$12 sps:$4 sm:$0xff]  }
 0x142   :  { %7621 = vst [vmem:[#allocation33_spill] sm:$0xff] %v6316_v5 }
 0x143   :  { %7622 = vst [vmem:[#allocation34_spill] sm:$0xff] %v6318_v11 }
 0x144   :  { %v5495_v25 = vpop.eup %5494 }
 0x145   :  { %v1057_v24 = vadd.f32 1.0, %v5495_v25  ;;  %v5497_v5 = vpop.eup %5496 }
 0x147   :  { %5498 = vrcp.f32 %v1057_v24  ;;  %v6378_v24 = vld [vmem:[%s7577_s3 + $0x48] ss:$12 sps:$4 sm:$0xff]  }
 0x151   :  { %v5499_v34 = vpop.eup %5498 }
 0x152   :  { %v1066_v19 = vsub.f32 1.0, %v5499_v34  ;;  %v1068_v45 = vmul.f32 0.0, %v5499_v34 }
 0x155   :  { %v1042_v21 = vpop.f32.mrb[32].mxu1 }
 0x156   :  { %v1062_v57 = vadd.f32 %v6323_v2, %v1042_v21  ;;  %v4946_v23 = vpop.f32.mrb[33].mxu1 }
 0x157   :  { %v1045_v49 = vpop.f32.mrb[34].mxu1 }
 0x158   :  { %v1063_v48 = vmul.f32 %v5497_v5, %v1062_v57  ;;  %v4947_v46 = vpop.f32.mrb[35].mxu1  ;;  %v6333_v49 = vld [vmem:[%s7577_s3] ss:$12 sps:$4 sm:$0xff]   ;;  %v6340_v57 = vld [vmem:[%s7577_s3 + $0x1c] ss:$12 sps:$4 sm:$0xff]  }
 0x159   :  { %v6364_v5 = vld [vmem:[%s7577_s3 + $0x30] ss:$12 sps:$4 sm:$0xff]  }
 0x15a   :  { %v1064_v3 = vadd.f32 %v1063_v48, %v362_v58 }
 0x15c   :  { %5500 = vtanh.f32 %v1064_v3 }
 0x166   :  { %v5501_v11 = vpop.eup %5500 }
 0x167   :  { %v1067_v22 = vmul.f32 %v5501_v11, %v1066_v19  ;;  %v6371_v11 = vld [vmem:[%s7577_s3 + $0x4c] ss:$12 sps:$4 sm:$0xff]  }
 0x169   :  { %v6326_v62 = vadd.f32 %v1068_v45, %v1067_v22  ;;  %v7623_v45 = vmov 0.0   ;;  %v6357_v22 = vld [vmem:[%s7577_s3 + $0x34] ss:$12 sps:$4 sm:$0xff]  }
 0x16b   :  { %v1073_v25 = vpack.c.bf16 %v6326_v62, %v6326_v62 }
 0x16d   :  { %1107 = vmatmul.mubr.bf16.vlgmr.msra.gmra.mrb[20].mxu0 %v1073_v25  ;;  %4965 = vmatmul.mubr.bf16.vlgmr.msra.gmra.mrb[36].mxu1 %v1073_v25 }
 0x16e   :  { %1182 = vmatpush1.bf16.msra.mxu0 %v6333_v49  ;;  %4969 = vmatpush3.bf16.msra.mxu1 %v6088_v10 }
 0x16f   :  { %1183 = vmatprep.subr.bf16.mxu0 %v6340_v57  ;;  %4970 = vmatprep.subr.bf16.mxu1 %v7623_v45 }
 0x170   :  { %1213 = vmatprep.mubr.bf16.mxu0 %v7624_v1  ;;  %4984 = vmatprep.mubr.msk.bf16.mxu1 %vm5703_vm0, %v7623_v45 }
 0x172   :  { %1184 = vmatpush1.bf16.msra.mxu0 %v6350_v20  ;;  %4971 = vmatpush3.bf16.msra.mxu1 %v6096_v12 }
 0x173   :  { %1185 = vmatprep.subr.bf16.mxu0 %v6357_v22  ;;  %4972 = vmatprep.subr.bf16.mxu1 %v7623_v45 }
 0x176   :  { %1186 = vmatpush1.bf16.msra.mxu0 %v6364_v5  ;;  %4973 = vmatpush3.bf16.msra.mxu1 %v6106_v13 }
 0x177   :  { %1187 = vmatprep.subr.bf16.mxu0 %v6371_v11  ;;  %4974 = vmatprep.subr.bf16.mxu1 %v7623_v45 }
 0x17a   :  { %1188 = vmatpush1.bf16.msra.mxu0 %v6378_v24  ;;  %4975 = vmatpush3.bf16.msra.mxu1 %v6113_v14 }
 0x17b   :  { %1189 = vmatprep.subr.bf16.mxu0 %v5964_v50  ;;  %4976 = vmatprep.subr.bf16.mxu1 %v7623_v45  ;;  %v6401_v50 = vld [vmem:[%s7577_s3 + $0x4] ss:$12 sps:$4 sm:$0xff]  }
 0x17e   :  { %1190 = vmatpush1.bf16.msra.mxu0 %v5979_v53  ;;  %4977 = vmatpush3.bf16.msra.mxu1 %v6123_v15 }
 0x17f   :  { %1191 = vmatprep.subr.bf16.mxu0 %v5989_v55  ;;  %4978 = vmatprep.subr.bf16.mxu1 %v7623_v45 }
 0x182   :  { %1192 = vmatpush1.bf16.msra.mxu0 %v5995_v56  ;;  %4979 = vmatpush3.bf16.msra.mxu1 %v6130_v16 }
 0x183   :  { %1193 = vmatprep.subr.bf16.mxu0 %v6008_v59  ;;  %4980 = vmatprep.subr.bf16.mxu1 %v7623_v45 }
 0x186   :  { %1194 = vmatpush1.bf16.msra.mxu0 %v6020_v61  ;;  %4981 = vmatpush3.bf16.msra.mxu1 %v6137_v17 }
 0x187   :  { %1195 = vmatprep.subr.bf16.mxu0 %v6030_v63  ;;  %4982 = vmatprep.subr.bf16.mxu1 %v7623_v45 }
 0x18a   :  { %1196 = vmatpush1.bf16.msra.mxu0 %v6037_v0  ;;  %4983 = vmatpush3.bf16.msra.mxu1 %v6145_v18 }
 0x18b   :  { %1288 = vmatprep.subr.bf16.mxu0 %v6401_v50  ;;  %4988 = vmatprep.subr.bf16.mxu1 %v7623_v45 }
 0x240   :  { %v1108_v53 = vpop.f32.mrb[20].mxu0  ;;  %v1149_v55 = vpop.f32.mrb[36].mxu1 }
 0x241   :  { %v1155_v56 = vadd.f32 %v1108_v53, %v6209_v35  ;;  %v1110_v59 = vpop.f32.mrb[21].mxu0  ;;  %v4966_v61 = vpop.f32.mrb[37].mxu1  ;;  %v1169_v40 = vadd.f32 %v6323_v2, %v1149_v55  ;;  %v6455_v55 = vld [vmem:[%s7577_s3 + $0x78] ss:$12 sps:$4 sm:$0xff]  }
 0x242   :  { %v1156_v63 = vadd.f32 %v1110_v59, %v6214_v39  ;;  %v1112_v0 = vpop.f32.mrb[22].mxu0  ;;  %v1152_v21 = vpop.f32.mrb[38].mxu1 }
 0x243   :  { %v4474_v23 = vmul.f32 -1.442695, %v1155_v56  ;;  %v1113_v58 = vpop.f32.mrb[23].mxu0  ;;  %v4967_v48 = vpop.f32.mrb[39].mxu1 }
 0x244   :  { %v4475_v46 = vmul.f32 -1.442695, %v1156_v63  ;;  %v6462_v58 = vld [vmem:[%s7577_s3 + $0x94] ss:$12 sps:$4 sm:$0xff]   ;;  %v6469_v48 = vld [vmem:[%s7577_s3 + $0x90] ss:$12 sps:$4 sm:$0xff]  }
 0x245   :  { %5502 = vpow2.f32 %v4474_v23 }
 0x246   :  { %5504 = vpow2.f32 %v4475_v46  ;;  %v6476_v46 = vld [vmem:[%s7577_s3 + $0xac] ss:$12 sps:$4 sm:$0xff]  }
 0x24f   :  { %v5503_v3 = vpop.eup %5502 }
 0x250   :  { %v1163_v34 = vadd.f32 1.0, %v5503_v3  ;;  %v5505_v19 = vpop.eup %5504  ;;  %v6483_v3 = vld [vmem:[%s7577_s3 + $0xa8] ss:$12 sps:$4 sm:$0xff]  }
 0x251   :  { %v1164_v25 = vadd.f32 1.0, %v5505_v19 }
 0x252   :  { %5506 = vrcp.f32 %v1163_v34 }
 0x253   :  { %5508 = vrcp.f32 %v1164_v25 }
 0x25c   :  { %v5507_v35 = vpop.eup %5506 }
 0x25d   :  { %v1170_v53 = vmul.f32 %v5507_v35, %v1169_v40  ;;  %v5509_v59 = vpop.eup %5508  ;;  %v6434_v40 = vld [vmem:[%s7577_s3 + $0x64] ss:$12 sps:$4 sm:$0xff]  }
 0x25e   :  { %v1173_v56 = vsub.f32 1.0, %v5509_v59  ;;  %v1175_v63 = vmul.f32 %v5509_v59, %v6326_v62  ;;  %v6441_v62 = vld [vmem:[%s7577_s3 + $0x60] ss:$12 sps:$4 sm:$0xff]  }
 0x25f   :  { %v1171_v39 = vadd.f32 %v1170_v53, %v6293_v33  ;;  %v6448_v33 = vld [vmem:[%s7577_s3 + $0x7c] ss:$12 sps:$4 sm:$0xff]  }
 0x261   :  { %5510 = vtanh.f32 %v1171_v39 }
 0x26b   :  { %v5511_v61 = vpop.eup %5510 }
 0x26c   :  { %v1174_v0 = vmul.f32 %v5511_v61, %v1173_v56 }
 0x26e   :  { %v6410_v21 = vadd.f32 %v1175_v63, %v1174_v0 }
 0x270   :  { %v1180_v23 = vpack.c.bf16 %v6410_v21, %v6410_v21 }
 0x272   :  { %1214 = vmatmul.mubr.bf16.vlgmr.msra.gmra.mrb[24].mxu0 %v1180_v23  ;;  %4985 = vmatmul.mubr.bf16.vlgmr.msra.gmra.mrb[40].mxu1 %v1180_v23 }
 0x273   :  { %1289 = vmatpush1.bf16.msra.mxu0 %v6333_v49  ;;  %4989 = vmatpush3.bf16.msra.mxu1 %v6088_v10 }
 0x274   :  { %1290 = vmatprep.subr.bf16.mxu0 %v6340_v57  ;;  %4990 = vmatprep.subr.bf16.mxu1 %v7623_v45 }
 0x275   :  { %1320 = vmatprep.mubr.bf16.mxu0 %v7624_v1  ;;  %5004 = vmatprep.mubr.msk.bf16.mxu1 %vm5703_vm0, %v7623_v45 }
 0x277   :  { %1291 = vmatpush1.bf16.msra.mxu0 %v6350_v20  ;;  %4991 = vmatpush3.bf16.msra.mxu1 %v6096_v12 }
 0x278   :  { %1292 = vmatprep.subr.bf16.mxu0 %v6357_v22  ;;  %4992 = vmatprep.subr.bf16.mxu1 %v7623_v45 }
 0x27b   :  { %1293 = vmatpush1.bf16.msra.mxu0 %v6364_v5  ;;  %4993 = vmatpush3.bf16.msra.mxu1 %v6106_v13 }
 0x27c   :  { %1294 = vmatprep.subr.bf16.mxu0 %v6371_v11  ;;  %4994 = vmatprep.subr.bf16.mxu1 %v7623_v45 }
 0x27f   :  { %1295 = vmatpush1.bf16.msra.mxu0 %v6378_v24  ;;  %4995 = vmatpush3.bf16.msra.mxu1 %v6113_v14 }
 0x280   :  { %1296 = vmatprep.subr.bf16.mxu0 %v6434_v40  ;;  %4996 = vmatprep.subr.bf16.mxu1 %v7623_v45 }
 0x283   :  { %1297 = vmatpush1.bf16.msra.mxu0 %v6441_v62  ;;  %4997 = vmatpush3.bf16.msra.mxu1 %v6123_v15 }
 0x284   :  { %1298 = vmatprep.subr.bf16.mxu0 %v6448_v33  ;;  %4998 = vmatprep.subr.bf16.mxu1 %v7623_v45 }
 0x287   :  { %1299 = vmatpush1.bf16.msra.mxu0 %v6455_v55  ;;  %4999 = vmatpush3.bf16.msra.mxu1 %v6130_v16 }
 0x288   :  { %1300 = vmatprep.subr.bf16.mxu0 %v6462_v58  ;;  %5000 = vmatprep.subr.bf16.mxu1 %v7623_v45 }
 0x28b   :  { %1301 = vmatpush1.bf16.msra.mxu0 %v6469_v48  ;;  %5001 = vmatpush3.bf16.msra.mxu1 %v6137_v17 }
 0x28c   :  { %1302 = vmatprep.subr.bf16.mxu0 %v6476_v46  ;;  %5002 = vmatprep.subr.bf16.mxu1 %v7623_v45 }
 0x28f   :  { %1303 = vmatpush1.bf16.msra.mxu0 %v6483_v3  ;;  %5003 = vmatpush3.bf16.msra.mxu1 %v6145_v18 }
 0x290   :  { %1395 = vmatprep.subr.bf16.mxu0 %v6401_v50  ;;  %5008 = vmatprep.subr.bf16.mxu1 %v7623_v45 }
 0x345   :  { %v1215_v34 = vpop.f32.mrb[24].mxu0  ;;  %v1256_v19 = vpop.f32.mrb[40].mxu1 }
 0x346   :  { %v1262_v25 = vadd.f32 %v1215_v34, %v6220_v43  ;;  %v1217_v35 = vpop.f32.mrb[25].mxu0  ;;  %v4986_v53 = vpop.f32.mrb[41].mxu1  ;;  %v1276_v28 = vadd.f32 %v6323_v2, %v1256_v19 }
 0x347   :  { %v1263_v39 = vadd.f32 %v1217_v35, %v6225_v47  ;;  %v1219_v59 = vpop.f32.mrb[26].mxu0  ;;  %v1259_v56 = vpop.f32.mrb[42].mxu1 }
 0x348   :  { %v4476_v61 = vmul.f32 -1.442695, %v1262_v25  ;;  %v1220_v0 = vpop.f32.mrb[27].mxu0  ;;  %v4987_v63 = vpop.f32.mrb[43].mxu1 }
 0x349   :  { %v4477_v23 = vmul.f32 -1.442695, %v1263_v39 }
 0x34a   :  { %5512 = vpow2.f32 %v4476_v61 }
 0x34b   :  { %5514 = vpow2.f32 %v4477_v23 }
 0x354   :  { %v5513_v37 = vpop.eup %5512 }
 0x355   :  { %v1270_v38 = vadd.f32 1.0, %v5513_v37  ;;  %v5515_v31 = vpop.eup %5514 }
 0x356   :  { %v1271_v29 = vadd.f32 1.0, %v5515_v31 }
 0x357   :  { %5516 = vrcp.f32 %v1270_v38 }
 0x358   :  { %5518 = vrcp.f32 %v1271_v29 }
 0x361   :  { %v5517_v43 = vpop.eup %5516 }
 0x362   :  { %v1277_v34 = vmul.f32 %v5517_v43, %v1276_v28  ;;  %v5519_v35 = vpop.eup %5518 }
 0x363   :  { %v1280_v25 = vsub.f32 1.0, %v5519_v35  ;;  %v1282_v39 = vmul.f32 %v5519_v35, %v6410_v21 }
 0x364   :  { %v1278_v47 = vadd.f32 %v1277_v34, %v6289_v9 }
 0x366   :  { %5520 = vtanh.f32 %v1278_v47 }
 0x370   :  { %v5521_v53 = vpop.eup %5520 }
 0x371   :  { %v1281_v59 = vmul.f32 %v5521_v53, %v1280_v25 }
 0x373   :  { %v6494_v56 = vadd.f32 %v1282_v39, %v1281_v59 }
 0x375   :  { %v1287_v37 = vpack.c.bf16 %v6494_v56, %v6494_v56 }
 0x377   :  { %1321 = vmatmul.mubr.bf16.vlgmr.msra.gmra.mrb[28].mxu0 %v1287_v37  ;;  %5005 = vmatmul.mubr.bf16.vlgmr.msra.gmra.mrb[44].mxu1 %v1287_v37 }
 0x378   :  { %1396 = vmatpush1.bf16.msra.mxu0 %v6333_v49  ;;  %5009 = vmatpush3.bf16.msra.mxu1 %v6088_v10 }
 0x379   :  { %1397 = vmatprep.subr.bf16.mxu0 %v6340_v57  ;;  %5010 = vmatprep.subr.bf16.mxu1 %v7623_v45 }
 0x37a   :  { %1427 = vmatprep.mubr.bf16.mxu0 %v7624_v1  ;;  %5024 = vmatprep.mubr.msk.bf16.mxu1 %vm5703_vm0, %v7623_v45 }
 0x37c   :  { %1398 = vmatpush1.bf16.msra.mxu0 %v6350_v20  ;;  %5011 = vmatpush3.bf16.msra.mxu1 %v6096_v12 }
 0x37d   :  { %1399 = vmatprep.subr.bf16.mxu0 %v6357_v22  ;;  %5012 = vmatprep.subr.bf16.mxu1 %v7623_v45 }
 0x380   :  { %1400 = vmatpush1.bf16.msra.mxu0 %v6364_v5  ;;  %5013 = vmatpush3.bf16.msra.mxu1 %v6106_v13 }
 0x381   :  { %1401 = vmatprep.subr.bf16.mxu0 %v6371_v11  ;;  %5014 = vmatprep.subr.bf16.mxu1 %v7623_v45 }
 0x384   :  { %1402 = vmatpush1.bf16.msra.mxu0 %v6378_v24  ;;  %5015 = vmatpush3.bf16.msra.mxu1 %v6113_v14 }
 0x385   :  { %1403 = vmatprep.subr.bf16.mxu0 %v6434_v40  ;;  %5016 = vmatprep.subr.bf16.mxu1 %v7623_v45 }
 0x388   :  { %1404 = vmatpush1.bf16.msra.mxu0 %v6441_v62  ;;  %5017 = vmatpush3.bf16.msra.mxu1 %v6123_v15 }
 0x389   :  { %1405 = vmatprep.subr.bf16.mxu0 %v6448_v33  ;;  %5018 = vmatprep.subr.bf16.mxu1 %v7623_v45 }
 0x38c   :  { %1406 = vmatpush1.bf16.msra.mxu0 %v6455_v55  ;;  %5019 = vmatpush3.bf16.msra.mxu1 %v6130_v16 }
 0x38d   :  { %1407 = vmatprep.subr.bf16.mxu0 %v6462_v58  ;;  %5020 = vmatprep.subr.bf16.mxu1 %v7623_v45 }
 0x390   :  { %1408 = vmatpush1.bf16.msra.mxu0 %v6469_v48  ;;  %5021 = vmatpush3.bf16.msra.mxu1 %v6137_v17 }
 0x391   :  { %1409 = vmatprep.subr.bf16.mxu0 %v6476_v46  ;;  %5022 = vmatprep.subr.bf16.mxu1 %v7623_v45 }
 0x394   :  { %1410 = vmatpush1.bf16.msra.mxu0 %v6483_v3  ;;  %5023 = vmatpush3.bf16.msra.mxu1 %v6145_v18 }
 0x395   :  { %1502 = vmatprep.subr.bf16.mxu0 %v6401_v50  ;;  %5028 = vmatprep.subr.bf16.mxu1 %v7623_v45 }
 0x44a   :  { %v1322_v28 = vpop.f32.mrb[28].mxu0  ;;  %v1363_v29 = vpop.f32.mrb[44].mxu1 }
 0x44b   :  { %v1369_v31 = vadd.f32 %v1322_v28, %v6231_v52  ;;  %v1324_v9 = vpop.f32.mrb[29].mxu0  ;;  %v5006_v38 = vpop.f32.mrb[45].mxu1  ;;  %v1383_v53 = vadd.f32 %v6323_v2, %v1363_v29 }
 0x44c   :  { %v1370_v21 = vadd.f32 %v1324_v9, %v6236_v60  ;;  %v1326_v19 = vpop.f32.mrb[30].mxu0  ;;  %v1366_v61 = vpop.f32.mrb[46].mxu1 }
 0x44d   :  { %v4478_v0 = vmul.f32 -1.442695, %v1369_v31  ;;  %v1327_v63 = vpop.f32.mrb[31].mxu0  ;;  %v5007_v23 = vpop.f32.mrb[47].mxu1 }
 0x44e   :  { %v4479_v43 = vmul.f32 -1.442695, %v1370_v21 }
 0x44f   :  { %5522 = vpow2.f32 %v4478_v0 }
 0x450   :  { %5524 = vpow2.f32 %v4479_v43 }
 0x459   :  { %v5523_v34 = vpop.eup %5522 }
 0x45a   :  { %v1377_v47 = vadd.f32 1.0, %v5523_v34  ;;  %v5525_v35 = vpop.eup %5524 }
 0x45b   :  { %v1378_v25 = vadd.f32 1.0, %v5525_v35 }
 0x45c   :  { %5526 = vrcp.f32 %v1377_v47 }
 0x45d   :  { %5528 = vrcp.f32 %v1378_v25 }
 0x466   :  { %v5527_v52 = vpop.eup %5526 }
 0x467   :  { %v1384_v59 = vmul.f32 %v5527_v52, %v1383_v53  ;;  %v5529_v39 = vpop.eup %5528 }
 0x468   :  { %v1387_v37 = vsub.f32 1.0, %v5529_v39  ;;  %v1389_v9 = vmul.f32 %v5529_v39, %v6494_v56 }
 0x469   :  { %v1385_v60 = vadd.f32 %v1384_v59, %v6291_v41 }
 0x46b   :  { %5530 = vtanh.f32 %v1385_v60 }
 0x475   :  { %v5531_v28 = vpop.eup %5530 }
 0x476   :  { %v1388_v31 = vmul.f32 %v5531_v28, %v1387_v37 }
 0x478   :  { %v6538_v38 = vadd.f32 %v1389_v9, %v1388_v31  ;;  %v6602_v9 = vld [vmem:[%s7577_s3 + $0x20] ss:$12 sps:$4 sm:$0xff]  }
 0x47a   :  { %v1394_v21 = vpack.c.bf16 %v6538_v38, %v6538_v38 }
 0x47c   :  { %1428 = vmatmul.mubr.bf16.vlgmr.msra.gmra.mrb[32].mxu0 %v1394_v21  ;;  %5025 = vmatmul.mubr.bf16.vlgmr.msra.gmra.mrb[48].mxu1 %v1394_v21  ;;  %v6620_v21 = vld [vmem:[%s7577_s3 + $0x50] ss:$12 sps:$4 sm:$0xff]  }
 0x47d   :  { %1503 = vmatpush1.bf16.msra.mxu0 %v6333_v49  ;;  %5029 = vmatpush3.bf16.msra.mxu1 %v6088_v10 }
 0x47e   :  { %1504 = vmatprep.subr.bf16.mxu0 %v6340_v57  ;;  %5030 = vmatprep.subr.bf16.mxu1 %v7623_v45 }
 0x47f   :  { %1534 = vmatprep.mubr.bf16.mxu0 %v7624_v1  ;;  %5044 = vmatprep.mubr.msk.bf16.mxu1 %vm5703_vm0, %v7623_v45 }
 0x481   :  { %1505 = vmatpush1.bf16.msra.mxu0 %v6350_v20  ;;  %5031 = vmatpush3.bf16.msra.mxu1 %v6096_v12 }
 0x482   :  { %1506 = vmatprep.subr.bf16.mxu0 %v6357_v22  ;;  %5032 = vmatprep.subr.bf16.mxu1 %v7623_v45 }
 0x485   :  { %1507 = vmatpush1.bf16.msra.mxu0 %v6364_v5  ;;  %5033 = vmatpush3.bf16.msra.mxu1 %v6106_v13 }
 0x486   :  { %1508 = vmatprep.subr.bf16.mxu0 %v6371_v11  ;;  %5034 = vmatprep.subr.bf16.mxu1 %v7623_v45 }
 0x489   :  { %1509 = vmatpush1.bf16.msra.mxu0 %v6378_v24  ;;  %5035 = vmatpush3.bf16.msra.mxu1 %v6113_v14 }
 0x48a   :  { %1510 = vmatprep.subr.bf16.mxu0 %v6434_v40  ;;  %5036 = vmatprep.subr.bf16.mxu1 %v7623_v45 }
 0x48d   :  { %1511 = vmatpush1.bf16.msra.mxu0 %v6441_v62  ;;  %5037 = vmatpush3.bf16.msra.mxu1 %v6123_v15 }
 0x48e   :  { %1512 = vmatprep.subr.bf16.mxu0 %v6448_v33  ;;  %5038 = vmatprep.subr.bf16.mxu1 %v7623_v45 }
 0x491   :  { %1513 = vmatpush1.bf16.msra.mxu0 %v6455_v55  ;;  %5039 = vmatpush3.bf16.msra.mxu1 %v6130_v16 }
 0x492   :  { %1514 = vmatprep.subr.bf16.mxu0 %v6462_v58  ;;  %5040 = vmatprep.subr.bf16.mxu1 %v7623_v45 }
 0x495   :  { %1515 = vmatpush1.bf16.msra.mxu0 %v6469_v48  ;;  %5041 = vmatpush3.bf16.msra.mxu1 %v6137_v17 }
 0x496   :  { %1516 = vmatprep.subr.bf16.mxu0 %v6476_v46  ;;  %5042 = vmatprep.subr.bf16.mxu1 %v7623_v45 }
 0x499   :  { %1517 = vmatpush1.bf16.msra.mxu0 %v6483_v3  ;;  %5043 = vmatpush3.bf16.msra.mxu1 %v6145_v18 }
 0x49a   :  { %1609 = vmatprep.subr.bf16.mxu0 %v6401_v50  ;;  %5048 = vmatprep.subr.bf16.mxu1 %v7623_v45 }
 0x54f   :  { %v1429_v10 = vpop.f32.mrb[32].mxu0  ;;  %v1470_v12 = vpop.f32.mrb[48].mxu1 }
 0x550   :  { %v1476_v13 = vadd.f32 %v1429_v10, %v6242_v4  ;;  %v1431_v14 = vpop.f32.mrb[33].mxu0  ;;  %v5026_v41 = vpop.f32.mrb[49].mxu1  ;;  %v1490_v25 = vadd.f32 %v6323_v2, %v1470_v12 }
 0x551   :  { %v1477_v56 = vadd.f32 %v1431_v14, %v6247_v8  ;;  %v1433_v29 = vpop.f32.mrb[34].mxu0  ;;  %v1473_v19 = vpop.f32.mrb[50].mxu1 }
 0x552   :  { %v4480_v61 = vmul.f32 -1.442695, %v1476_v13  ;;  %v1434_v0 = vpop.f32.mrb[35].mxu0  ;;  %v5027_v63 = vpop.f32.mrb[51].mxu1 }
 0x553   :  { %v4481_v23 = vmul.f32 -1.442695, %v1477_v56 }
 0x554   :  { %5532 = vpow2.f32 %v4480_v61 }
 0x555   :  { %5534 = vpow2.f32 %v4481_v23 }
 0x55e   :  { %v5533_v43 = vpop.eup %5532 }
 0x55f   :  { %v1484_v34 = vadd.f32 1.0, %v5533_v43  ;;  %v5535_v47 = vpop.eup %5534 }
 0x560   :  { %v1485_v35 = vadd.f32 1.0, %v5535_v47 }
 0x561   :  { %5536 = vrcp.f32 %v1484_v34 }
 0x562   :  { %5538 = vrcp.f32 %v1485_v35 }
 0x56b   :  { %v5537_v4 = vpop.eup %5536 }
 0x56c   :  { %v1491_v53 = vmul.f32 %v5537_v4, %v1490_v25  ;;  %v5539_v52 = vpop.eup %5538 }
 0x56d   :  { %v1494_v59 = vsub.f32 1.0, %v5539_v52  ;;  %v1496_v37 = vmul.f32 %v5539_v52, %v6538_v38  ;;  %v6611_v38 = vld [vmem:[%s7577_s3 + $0x38] ss:$12 sps:$4 sm:$0xff]  }
 0x56e   :  { %v1492_v8 = vadd.f32 %v1491_v53, %v6297_v27  ;;  %v6590_v27 = vld [vmem:[%s7577_s3 + $0x8] ss:$12 sps:$4 sm:$0xff]  }
 0x570   :  { %5540 = vtanh.f32 %v1492_v8 }
 0x57a   :  { %v5541_v60 = vpop.eup %5540 }
 0x57b   :  { %v1495_v39 = vmul.f32 %v5541_v60, %v1494_v59 }
 0x57d   :  { %v6582_v28 = vadd.f32 %v1496_v37, %v1495_v39 }
 0x57f   :  { %v1501_v31 = vpack.c.bf16 %v6582_v28, %v6582_v28 }
 0x581   :  { %1535 = vmatmul.mubr.bf16.vlgmr.msra.gmra.mrb[36].mxu0 %v1501_v31  ;;  %5045 = vmatmul.mubr.bf16.vlgmr.msra.gmra.mrb[52].mxu1 %v1501_v31 }
 0x582   :  { %1610 = vmatpush1.bf16.msra.mxu0 %v6333_v49  ;;  %5049 = vmatpush3.bf16.msra.mxu1 %v6590_v27 }
 0x583   :  { %1611 = vmatprep.subr.bf16.mxu0 %v6340_v57  ;;  %5050 = vmatprep.subr.bf16.mxu1 %v7623_v45 }
 0x584   :  { %1641 = vmatprep.mubr.bf16.mxu0 %v7624_v1  ;;  %5064 = vmatprep.mubr.msk.bf16.mxu1 %vm5703_vm0, %v7623_v45 }
 0x586   :  { %1612 = vmatpush1.bf16.msra.mxu0 %v6350_v20  ;;  %5051 = vmatpush3.bf16.msra.mxu1 %v6602_v9 }
 0x587   :  { %1613 = vmatprep.subr.bf16.mxu0 %v6357_v22  ;;  %5052 = vmatprep.subr.bf16.mxu1 %v7623_v45 }
 0x58a   :  { %1614 = vmatpush1.bf16.msra.mxu0 %v6364_v5  ;;  %5053 = vmatpush3.bf16.msra.mxu1 %v6611_v38 }
 0x58b   :  { %1615 = vmatprep.subr.bf16.mxu0 %v6371_v11  ;;  %5054 = vmatprep.subr.bf16.mxu1 %v7623_v45 }
 0x58e   :  { %1616 = vmatpush1.bf16.msra.mxu0 %v6378_v24  ;;  %5055 = vmatpush3.bf16.msra.mxu1 %v6620_v21 }
 0x58f   :  { %1617 = vmatprep.subr.bf16.mxu0 %v6434_v40  ;;  %5056 = vmatprep.subr.bf16.mxu1 %v7623_v45 }
 0x592   :  { %1618 = vmatpush1.bf16.msra.mxu0 %v6441_v62  ;;  %5057 = vmatpush3.bf16.msra.mxu1 %v6123_v15 }
 0x593   :  { %1619 = vmatprep.subr.bf16.mxu0 %v6448_v33  ;;  %5058 = vmatprep.subr.bf16.mxu1 %v7623_v45 }
 0x596   :  { %1620 = vmatpush1.bf16.msra.mxu0 %v6455_v55  ;;  %5059 = vmatpush3.bf16.msra.mxu1 %v6130_v16 }
 0x597   :  { %1621 = vmatprep.subr.bf16.mxu0 %v6462_v58  ;;  %5060 = vmatprep.subr.bf16.mxu1 %v7623_v45 }
 0x59a   :  { %1622 = vmatpush1.bf16.msra.mxu0 %v6469_v48  ;;  %5061 = vmatpush3.bf16.msra.mxu1 %v6137_v17 }
 0x59b   :  { %1623 = vmatprep.subr.bf16.mxu0 %v6476_v46  ;;  %5062 = vmatprep.subr.bf16.mxu1 %v7623_v45 }
 0x59e   :  { %1624 = vmatpush1.bf16.msra.mxu0 %v6483_v3  ;;  %5063 = vmatpush3.bf16.msra.mxu1 %v6145_v18 }
 0x59f   :  { %1716 = vmatprep.subr.bf16.mxu0 %v6401_v50  ;;  %5068 = vmatprep.subr.bf16.mxu1 %v7623_v45 }
 0x654   :  { %v1536_v15 = vpop.f32.mrb[36].mxu0  ;;  %v1577_v16 = vpop.f32.mrb[52].mxu1 }
 0x655   :  { %v1583_v10 = vadd.f32 %v1536_v15, %v6253_v36  ;;  %v1538_v12 = vpop.f32.mrb[37].mxu0  ;;  %v5046_v13 = vpop.f32.mrb[53].mxu1  ;;  %v1597_v23 = vadd.f32 %v6323_v2, %v1577_v16 }
 0x656   :  { %v1584_v17 = vadd.f32 %v1538_v12, %v6258_v44  ;;  %v1540_v14 = vpop.f32.mrb[38].mxu0  ;;  %v1580_v41 = vpop.f32.mrb[54].mxu1  ;;  %v5359_v12 = vld [vmem:[%s7581_s7 + $0x8] ss:$12 sps:$4 sm:$0xff]  }
 0x657   :  { %v4482_v56 = vmul.f32 -1.442695, %v1583_v10  ;;  %v1541_v29 = vpop.f32.mrb[39].mxu0  ;;  %v5047_v19 = vpop.f32.mrb[55].mxu1  ;;  %v6712_v10 = vld [vmem:[%s7581_s7] ss:$12 sps:$4 sm:$0xff]  }
 0x658   :  { %v4483_v61 = vmul.f32 -1.442695, %v1584_v17  ;;  %v6722_v13 = vld [vmem:[%s7581_s7 + $0x1c] ss:$12 sps:$4 sm:$0xff]   ;;  %v6728_v17 = vld [vmem:[%s7581_s7 + $0x18] ss:$12 sps:$4 sm:$0xff]  }
 0x659   :  { %5542 = vpow2.f32 %v4482_v56  ;;  %v5363_v14 = vld [vmem:[%s7581_s7 + $0x20] ss:$12 sps:$4 sm:$0xff]   ;;  %v6744_v56 = vld [vmem:[%s7581_s7 + $0x30] ss:$12 sps:$4 sm:$0xff]   ;;  %v5367_v29 = vld [vmem:[%s7581_s7 + $0x38] ss:$12 sps:$4 sm:$0xff]  }
 0x65a   :  { %5544 = vpow2.f32 %v4483_v61  ;;  %v6738_v41 = vld [vmem:[%s7581_s7 + $0x34] ss:$12 sps:$4 sm:$0xff]   ;;  %v6754_v19 = vld [vmem:[%s7581_s7 + $0x4c] ss:$12 sps:$4 sm:$0xff]  }
 0x65b   :  { %v6760_v61 = vld [vmem:[%s7581_s7 + $0x48] ss:$12 sps:$4 sm:$0xff]  }
 0x663   :  { %v5543_v18 = vpop.eup %5542 }
 0x664   :  { %v1591_v50 = vadd.f32 1.0, %v5543_v18  ;;  %v5545_v0 = vpop.eup %5544  ;;  %v5371_v18 = vld [vmem:[%s7581_s7 + $0x50] ss:$12 sps:$4 sm:$0xff]  }
 0x665   :  { %v1592_v63 = vadd.f32 1.0, %v5545_v0  ;;  %v6776_v0 = vld [vmem:[%s7581_s7 + $0x60] ss:$12 sps:$4 sm:$0xff]  }
 0x666   :  { %5546 = vrcp.f32 %v1591_v50  ;;  %v6770_v50 = vld [vmem:[%s7581_s7 + $0x64] ss:$12 sps:$4 sm:$0xff]  }
 0x667   :  { %5548 = vrcp.f32 %v1592_v63  ;;  %v5375_v63 = vld [vmem:[%s7581_s7 + $0x68] ss:$12 sps:$4 sm:$0xff]  }
 0x670   :  { %v5547_v36 = vpop.eup %5546 }
 0x671   :  { %v1598_v43 = vmul.f32 %v5547_v36, %v1597_v23  ;;  %v5549_v34 = vpop.eup %5548  ;;  %v6785_v23 = vld [vmem:[%s7581_s7 + $0x7c] ss:$12 sps:$4 sm:$0xff]   ;;  %v6791_v36 = vld [vmem:[%s7581_s7 + $0x78] ss:$12 sps:$4 sm:$0xff]  }
 0x672   :  { %v1601_v47 = vsub.f32 1.0, %v5549_v34  ;;  %v1603_v4 = vmul.f32 %v5549_v34, %v6582_v28  ;;  %v6807_v34 = vld [vmem:[%s7581_s7 + $0x90] ss:$12 sps:$4 sm:$0xff]  }
 0x673   :  { %v1599_v44 = vadd.f32 %v1598_v43, %v6301_v32  ;;  %v5672_v32 = vld [vmem:[%s7577_s3 + $0x68] ss:$12 sps:$4 sm:$0xff]   ;;  %v5379_v43 = vld [vmem:[%s7581_s7 + $0x80] ss:$12 sps:$4 sm:$0xff]  }
 0x675   :  { %5550 = vtanh.f32 %v1599_v44  ;;  %v6801_v44 = vld [vmem:[%s7581_s7 + $0x94] ss:$12 sps:$4 sm:$0xff]  }
 0x67f   :  { %v5551_v35 = vpop.eup %5550 }
 0x680   :  { %v1602_v25 = vmul.f32 %v5551_v35, %v1601_v47  ;;  %v5383_v47 = vld [vmem:[%s7581_s7 + $0x98] ss:$12 sps:$4 sm:$0xff]  }
 0x681   :  { %v6817_v35 = vld [vmem:[%s7581_s7 + $0xac] ss:$12 sps:$4 sm:$0xff]  }
 0x682   :  { %v6646_v53 = vadd.f32 %v1603_v4, %v1602_v25  ;;  %v6823_v25 = vld [vmem:[%s7581_s7 + $0xa8] ss:$12 sps:$4 sm:$0xff]   ;;  %v5387_v4 = vld [vmem:[%s7581_s7 + $0xb0] ss:$12 sps:$4 sm:$0xff]  }
 0x684   :  { %v1608_v8 = vpack.c.bf16 %v6646_v53, %v6646_v53 }
 0x686   :  { %1642 = vmatmul.mubr.bf16.vlgmr.msra.gmra.mrb[40].mxu0 %v1608_v8  ;;  %5065 = vmatmul.mubr.bf16.vlgmr.msra.gmra.mrb[56].mxu1 %v1608_v8 }
 0x687   :  { %1717 = vmatpush1.bf16.msra.mxu0 %v6333_v49  ;;  %5069 = vmatpush3.bf16.msra.mxu1 %v6590_v27  ;;  %v5673_v49 = vld [vmem:[%s7577_s3 + $0x80] ss:$12 sps:$4 sm:$0xff]  }
 0x688   :  { %1718 = vmatprep.subr.bf16.mxu0 %v6340_v57  ;;  %5070 = vmatprep.subr.bf16.mxu1 %v7623_v45  ;;  %v5674_v57 = vld [vmem:[%s7577_s3 + $0x98] ss:$12 sps:$4 sm:$0xff]  }
 0x689   :  { %1748 = vmatprep.mubr.bf16.mxu0 %v7624_v1  ;;  %5084 = vmatprep.mubr.msk.bf16.mxu1 %vm5703_vm0, %v7623_v45 }
 0x68b   :  { %1719 = vmatpush1.bf16.msra.mxu0 %v6350_v20  ;;  %5071 = vmatpush3.bf16.msra.mxu1 %v6602_v9  ;;  %v5675_v20 = vld [vmem:[%s7577_s3 + $0xb0] ss:$12 sps:$4 sm:$0xff]  }
 0x68c   :  { %1720 = vmatprep.subr.bf16.mxu0 %v6357_v22  ;;  %5072 = vmatprep.subr.bf16.mxu1 %v7623_v45 }
 0x68f   :  { %1721 = vmatpush1.bf16.msra.mxu0 %v6364_v5  ;;  %5073 = vmatpush3.bf16.msra.mxu1 %v6611_v38 }
 0x690   :  { %1722 = vmatprep.subr.bf16.mxu0 %v6371_v11  ;;  %5074 = vmatprep.subr.bf16.mxu1 %v7623_v45 }
 0x693   :  { %1723 = vmatpush1.bf16.msra.mxu0 %v6378_v24  ;;  %5075 = vmatpush3.bf16.msra.mxu1 %v6620_v21 }
 0x694   :  { %1724 = vmatprep.subr.bf16.mxu0 %v6434_v40  ;;  %5076 = vmatprep.subr.bf16.mxu1 %v7623_v45 }
 0x697   :  { %1725 = vmatpush1.bf16.msra.mxu0 %v6441_v62  ;;  %5077 = vmatpush3.bf16.msra.mxu1 %v5672_v32 }
 0x698   :  { %1726 = vmatprep.subr.bf16.mxu0 %v6448_v33  ;;  %5078 = vmatprep.subr.bf16.mxu1 %v7623_v45 }
 0x69b   :  { %1727 = vmatpush1.bf16.msra.mxu0 %v6455_v55  ;;  %5079 = vmatpush3.bf16.msra.mxu1 %v5673_v49 }
 0x69c   :  { %1728 = vmatprep.subr.bf16.mxu0 %v6462_v58  ;;  %5080 = vmatprep.subr.bf16.mxu1 %v7623_v45 }
 0x69f   :  { %1729 = vmatpush1.bf16.msra.mxu0 %v6469_v48  ;;  %5081 = vmatpush3.bf16.msra.mxu1 %v5674_v57 }
 0x6a0   :  { %1730 = vmatprep.subr.bf16.mxu0 %v6476_v46  ;;  %5082 = vmatprep.subr.bf16.mxu1 %v7623_v45 }
 0x6a3   :  { %1731 = vmatpush1.bf16.msra.mxu0 %v6483_v3  ;;  %5083 = vmatpush3.bf16.msra.mxu1 %v5675_v20 }
 0x6a4   :  { %5088 = vmatprep.subr.bf16.mxu1 %v7623_v45 }
 0x759   :  { %v1643_v22 = vpop.f32.mrb[40].mxu0  ;;  %v1684_v5 = vpop.f32.mrb[56].mxu1 }
 0x75a   :  { %v1690_v11 = vadd.f32 %v1643_v22, %v6264_v54  ;;  %v1645_v24 = vpop.f32.mrb[41].mxu0  ;;  %v5066_v40 = vpop.f32.mrb[57].mxu1  ;;  %v1704_v37 = vadd.f32 %v6323_v2, %v1684_v5 }
 0x75b   :  { %v1691_v62 = vadd.f32 %v1645_v24, %v6270_v7  ;;  %v1647_v33 = vpop.f32.mrb[42].mxu0  ;;  %v1687_v55 = vpop.f32.mrb[58].mxu1 }
 0x75c   :  { %v4484_v58 = vmul.f32 -1.442695, %v1690_v11  ;;  %v1648_v48 = vpop.f32.mrb[43].mxu0  ;;  %v5067_v46 = vpop.f32.mrb[59].mxu1 }
 0x75d   :  { %v4485_v3 = vmul.f32 -1.442695, %v1691_v62 }
 0x75e   :  { %5552 = vpow2.f32 %v4484_v58 }
 0x75f   :  { %5554 = vpow2.f32 %v4485_v3 }
 0x768   :  { %v5553_v52 = vpop.eup %5552 }
 0x769   :  { %v1698_v59 = vadd.f32 1.0, %v5553_v52  ;;  %v5555_v60 = vpop.eup %5554 }
 0x76a   :  { %v1699_v39 = vadd.f32 1.0, %v5555_v60 }
 0x76b   :  { %5556 = vrcp.f32 %v1698_v59 }
 0x76c   :  { %5558 = vrcp.f32 %v1699_v39 }
 0x775   :  { %v5557_v54 = vpop.eup %5556 }
 0x776   :  { %v1705_v28 = vmul.f32 %v5557_v54, %v1704_v37  ;;  %v5559_v31 = vpop.eup %5558 }
 0x777   :  { %v1708_v27 = vsub.f32 1.0, %v5559_v31  ;;  %v1710_v21 = vmul.f32 %v5559_v31, %v6646_v53  ;;  %v5391_v31 = vld [vmem:[%s7581_s7 + $0x50] ss:$12 sps:$4 sm:$0xff]  }
 0x778   :  { %v1706_v7 = vadd.f32 %v1705_v28, %v6295_v6  ;;  %v6707_v6 = vld [vmem:[%s7581_s7 + $0x4] ss:$12 sps:$4 sm:$0xff]  }
 0x779   :  { %1983 = vmatprep.subr.bf16.mxu0 %v6707_v6 }
 0x77a   :  { %5560 = vtanh.f32 %v1706_v7  ;;  %v5390_v7 = vld [vmem:[%s7581_s7 + $0x38] ss:$12 sps:$4 sm:$0xff]  }
 0x784   :  { %v5561_v9 = vpop.eup %5560 }
 0x785   :  { %v1709_v38 = vmul.f32 %v5561_v9, %v1708_v27  ;;  %v5392_v27 = vld [vmem:[%s7581_s7 + $0x68] ss:$12 sps:$4 sm:$0xff]   ;;  %v5393_v9 = vld [vmem:[%s7581_s7 + $0x80] ss:$12 sps:$4 sm:$0xff]  }
 0x787   :  { %v6697_v15 = vadd.f32 %v1710_v21, %v1709_v38  ;;  %v5394_v38 = vld [vmem:[%s7581_s7 + $0x98] ss:$12 sps:$4 sm:$0xff]   ;;  %v5395_v21 = vld [vmem:[%s7581_s7 + $0xb0] ss:$12 sps:$4 sm:$0xff]  }
 0x789   :  { %v1715_v16 = vpack.c.bf16 %v6697_v15, %v6697_v15 }
 0x78b   :  { %1749 = vmatmul.mubr.bf16.vlgmr.msra.gmra.mrb[44].mxu0 %v1715_v16  ;;  %5085 = vmatmul.mubr.bf16.vlgmr.msra.gmra.mrb[60].mxu1 %v1715_v16 }
 0x78c   :  { %2015 = vmatprep.mubr.bf16.mxu0 %v7624_v1  ;;  %5104 = vmatprep.mubr.msk.bf16.mxu1 %vm5703_vm0, %v7623_v45 }
 0x78d   :  { %1984 = vmatpush1.bf16.msra.mxu0 %v6712_v10  ;;  %5089 = vmatpush3.bf16.msra.mxu1 %v5359_v12  ;;  %v7626_v12 = vld [vmem:[#allocation11_spill] sm:$0xff] }
 0x78e   :  { %5090 = vmatprep.subr.bf16.mxu1 %v7623_v45  ;;  %1985 = vmatprep.subr.bf16.mxu0 %v6722_v13 }
 0x791   :  { %1986 = vmatpush1.bf16.msra.mxu0 %v6728_v17  ;;  %5091 = vmatpush3.bf16.msra.mxu1 %v5363_v14  ;;  %v7627_v14 = vld [vmem:[#allocation12_spill] sm:$0xff] }
 0x792   :  { %5092 = vmatprep.subr.bf16.mxu1 %v7623_v45  ;;  %1987 = vmatprep.subr.bf16.mxu0 %v6738_v41 }
 0x795   :  { %1988 = vmatpush1.bf16.msra.mxu0 %v6744_v56  ;;  %5093 = vmatpush3.bf16.msra.mxu1 %v5367_v29  ;;  %v662_v29 = vadd.f32 %v7627_v14, %v7626_v12  ;;  %v7630_v12 = vld [vmem:[#allocation14_spill] sm:$0xff] }
 0x796   :  { %5094 = vmatprep.subr.bf16.mxu1 %v7623_v45  ;;  %1989 = vmatprep.subr.bf16.mxu0 %v6754_v19 }
 0x799   :  { %1990 = vmatpush1.bf16.msra.mxu0 %v6760_v61  ;;  %5095 = vmatpush3.bf16.msra.mxu1 %v5371_v18 }
 0x79a   :  { %5096 = vmatprep.subr.bf16.mxu1 %v7623_v45  ;;  %1991 = vmatprep.subr.bf16.mxu0 %v6770_v50 }
 0x79d   :  { %1992 = vmatpush1.bf16.msra.mxu0 %v6776_v0  ;;  %5097 = vmatpush3.bf16.msra.mxu1 %v5375_v63 }
 0x79e   :  { %1993 = vmatprep.subr.bf16.mxu0 %v6785_v23  ;;  %5098 = vmatprep.subr.bf16.mxu1 %v7623_v45 }
 0x7a1   :  { %1994 = vmatpush1.bf16.msra.mxu0 %v6791_v36  ;;  %5099 = vmatpush3.bf16.msra.mxu1 %v5379_v43 }
 0x7a2   :  { %1995 = vmatprep.subr.bf16.mxu0 %v6801_v44  ;;  %5100 = vmatprep.subr.bf16.mxu1 %v7623_v45 }
 0x7a5   :  { %1996 = vmatpush1.bf16.msra.mxu0 %v6807_v34  ;;  %5101 = vmatpush3.bf16.msra.mxu1 %v5383_v47 }
 0x7a6   :  { %1997 = vmatprep.subr.bf16.mxu0 %v6817_v35  ;;  %5102 = vmatprep.subr.bf16.mxu1 %v7623_v45 }
 0x7a9   :  { %1998 = vmatpush1.bf16.msra.mxu0 %v6823_v25  ;;  %5103 = vmatpush3.bf16.msra.mxu1 %v5387_v4 }
 0x7aa   :  { %2251 = vmatprep.subr.bf16.mxu0 %v6707_v6  ;;  %5108 = vmatprep.subr.bf16.mxu1 %v7623_v45 }
 0x85e   :  { %v1750_v53 = vpop.f32.mrb[44].mxu0  ;;  %v1791_v8 = vpop.f32.mrb[60].mxu1 }
 0x85f   :  { %v1797_v32 = vadd.f32 %v1750_v53, %v6276_v42  ;;  %v1752_v49 = vpop.f32.mrb[45].mxu0  ;;  %v5086_v57 = vpop.f32.mrb[61].mxu1  ;;  %v1811_v46 = vadd.f32 %v6323_v2, %v1791_v8  ;;  %v5389_v2 = vld [vmem:[%s7581_s7 + $0x20] ss:$12 sps:$4 sm:$0xff]  }
 0x860   :  { %v1798_v20 = vadd.f32 %v1752_v49, %v6281_v51  ;;  %v1754_v22 = vpop.f32.mrb[46].mxu0  ;;  %v1794_v5 = vpop.f32.mrb[62].mxu1 }
 0x861   :  { %v4486_v11 = vmul.f32 -1.442695, %v1797_v32  ;;  %v1755_v24 = vpop.f32.mrb[47].mxu0  ;;  %v5087_v40 = vpop.f32.mrb[63].mxu1 }
 0x862   :  { %v4487_v62 = vmul.f32 -1.442695, %v1798_v20  ;;  %v6900_v24 = vld [vmem:[%s7583_s9] ss:$0 sm:$0xff] }
 0x863   :  { %5562 = vpow2.f32 %v4486_v11 }
 0x864   :  { %5564 = vpow2.f32 %v4487_v62 }
 0x86d   :  { %v5563_v33 = vpop.eup %5562 }
 0x86e   :  { %v1805_v55 = vadd.f32 1.0, %v5563_v33  ;;  %v5565_v58 = vpop.eup %5564 }
 0x86f   :  { %v1806_v48 = vadd.f32 1.0, %v5565_v58  ;;  %v7628_v58 = vld [vmem:[#allocation28_spill] sm:$0xff] }
 0x870   :  { %5566 = vrcp.f32 %v1805_v55 }
 0x871   :  { %5568 = vrcp.f32 %v1806_v48 }
 0x87a   :  { %v5567_v42 = vpop.eup %5566 }
 0x87b   :  { %v1812_v3 = vmul.f32 %v5567_v42, %v1811_v46  ;;  %v5569_v52 = vpop.eup %5568 }
 0x87c   :  { %v1815_v59 = vsub.f32 1.0, %v5569_v52  ;;  %v1817_v37 = vmul.f32 %v5569_v52, %v6697_v15  ;;  %v7625_v15 = vld [vmem:[#allocation10_spill] sm:$0xff] }
 0x87d   :  { %v1813_v51 = vadd.f32 %v1812_v3, %v6299_v30  ;;  %v5388_v30 = vld [vmem:[%s7581_s7 + $0x8] ss:$12 sps:$4 sm:$0xff]   ;;  %v660_v16 = vadd.f32 %v7625_v15, %v6194_v26 }
 0x87f   :  { %5570 = vtanh.f32 %v1813_v51 }
 0x889   :  { %v5571_v60 = vpop.eup %5570 }
 0x88a   :  { %v1816_v39 = vmul.f32 %v5571_v60, %v1815_v59 }
 0x88c   :  { %v6838_v54 = vadd.f32 %v1817_v37, %v1816_v39  ;;  %v5396_v39 = vld [vmem:[%s7581_s7 + $0x8] ss:$12 sps:$4 sm:$0xff]   ;;  %v5397_v37 = vld [vmem:[%s7581_s7 + $0x20] ss:$12 sps:$4 sm:$0xff]  }
 0x88e   :  { %v1822_v28 = vpack.c.bf16 %v6838_v54, %v6838_v54 }
 0x890   :  { %2016 = vmatmul.mubr.bf16.vlgmr.msra.gmra.mrb[48].mxu0 %v1822_v28  ;;  %5105 = vmatmul.mubr.bf16.vlgmr.msra.gmra.mrb[64].mxu1 %v1822_v28  ;;  %v5399_v28 = vld [vmem:[%s7581_s7 + $0x50] ss:$12 sps:$4 sm:$0xff]  }
 0x891   :  { %2252 = vmatpush1.bf16.msra.mxu0 %v6712_v10  ;;  %2283 = vmatprep.mubr.bf16.mxu0 %v7624_v1 }
 0x892   :  { %2253 = vmatprep.subr.bf16.mxu0 %v6722_v13  ;;  %5124 = vmatprep.mubr.msk.bf16.mxu1 %vm5703_vm0, %v7623_v45 }
 0x893   :  { %5109 = vmatpush3.bf16.msra.mxu1 %v5388_v30  ;;  %v5400_v30 = vld [vmem:[%s7581_s7 + $0x68] ss:$12 sps:$4 sm:$0xff]  }
 0x894   :  { %5110 = vmatprep.subr.bf16.mxu1 %v7623_v45 }
 0x895   :  { %2254 = vmatpush1.bf16.msra.mxu0 %v6728_v17 }
 0x896   :  { %2255 = vmatprep.subr.bf16.mxu0 %v6738_v41 }
 0x897   :  { %5111 = vmatpush3.bf16.msra.mxu1 %v5389_v2  ;;  %v5401_v2 = vld [vmem:[%s7581_s7 + $0x80] ss:$12 sps:$4 sm:$0xff]  }
 0x898   :  { %5112 = vmatprep.subr.bf16.mxu1 %v7623_v45 }
 0x899   :  { %2256 = vmatpush1.bf16.msra.mxu0 %v6744_v56 }
 0x89a   :  { %2257 = vmatprep.subr.bf16.mxu0 %v6754_v19 }
 0x89b   :  { %5113 = vmatpush3.bf16.msra.mxu1 %v5390_v7  ;;  %v5402_v7 = vld [vmem:[%s7581_s7 + $0x98] ss:$12 sps:$4 sm:$0xff]  }
 0x89c   :  { %5114 = vmatprep.subr.bf16.mxu1 %v7623_v45 }
 0x89d   :  { %2258 = vmatpush1.bf16.msra.mxu0 %v6760_v61 }
 0x89e   :  { %2259 = vmatprep.subr.bf16.mxu0 %v6770_v50 }
 0x89f   :  { %5115 = vmatpush3.bf16.msra.mxu1 %v5391_v31  ;;  %v5403_v31 = vld [vmem:[%s7581_s7 + $0xb0] ss:$12 sps:$4 sm:$0xff]  }
 0x8a0   :  { %5116 = vmatprep.subr.bf16.mxu1 %v7623_v45 }
 0x8a1   :  { %2260 = vmatpush1.bf16.msra.mxu0 %v6776_v0 }
 0x8a2   :  { %2261 = vmatprep.subr.bf16.mxu0 %v6785_v23 }
 0x8a3   :  { %5117 = vmatpush3.bf16.msra.mxu1 %v5392_v27 }
 0x8a4   :  { %5118 = vmatprep.subr.bf16.mxu1 %v7623_v45 }
 0x8a5   :  { %2262 = vmatpush1.bf16.msra.mxu0 %v6791_v36 }
 0x8a6   :  { %2263 = vmatprep.subr.bf16.mxu0 %v6801_v44 }
 0x8a7   :  { %5119 = vmatpush3.bf16.msra.mxu1 %v5393_v9 }
 0x8a8   :  { %5120 = vmatprep.subr.bf16.mxu1 %v7623_v45 }
 0x8a9   :  { %2264 = vmatpush1.bf16.msra.mxu0 %v6807_v34 }
 0x8aa   :  { %2265 = vmatprep.subr.bf16.mxu0 %v6817_v35 }
 0x8ab   :  { %5121 = vmatpush3.bf16.msra.mxu1 %v5394_v38  ;;  %v7629_v38 = vld [vmem:[#allocation13_spill] sm:$0xff] }
 0x8ac   :  { %5122 = vmatprep.subr.bf16.mxu1 %v7623_v45 }
 0x8ad   :  { %2266 = vmatpush1.bf16.msra.mxu0 %v6823_v25 }
 0x8ae   :  { %2519 = vmatprep.subr.bf16.mxu0 %v6707_v6 }
 0x8af   :  { %5123 = vmatpush3.bf16.msra.mxu1 %v5395_v21 }
 0x8b0   :  { %5128 = vmatprep.subr.bf16.mxu1 %v7623_v45 }
 0x963   :  { %v2017_v18 = vpop.f32.mrb[48].mxu0  ;;  %v2058_v63 = vpop.f32.mrb[64].mxu1 }
 0x964   :  { %v2064_v43 = vadd.f32 %v2017_v18, %v660_v16  ;;  %v2019_v47 = vpop.f32.mrb[49].mxu0  ;;  %v5106_v4 = vpop.f32.mrb[65].mxu1  ;;  %v2078_v62 = vadd.f32 %v6900_v24, %v2058_v63 }
 0x965   :  { %v2065_v53 = vadd.f32 %v2019_v47, %v662_v29  ;;  %v2021_v8 = vpop.f32.mrb[50].mxu0  ;;  %v2061_v32 = vpop.f32.mrb[66].mxu1 }
 0x966   :  { %v4512_v49 = vmul.f32 -1.442695, %v2064_v43  ;;  %v2022_v57 = vpop.f32.mrb[51].mxu0  ;;  %v5107_v20 = vpop.f32.mrb[67].mxu1 }
 0x967   :  { %v4513_v22 = vmul.f32 -1.442695, %v2065_v53 }
 0x968   :  { %5572 = vpow2.f32 %v4512_v49 }
 0x969   :  { %5574 = vpow2.f32 %v4513_v22 }
 0x972   :  { %v5573_v5 = vpop.eup %5572 }
 0x973   :  { %v2072_v11 = vadd.f32 1.0, %v5573_v5  ;;  %v5575_v26 = vpop.eup %5574  ;;  %v7631_v5 = vld [vmem:[#allocation30_spill] sm:$0xff] }
 0x974   :  { %v2073_v40 = vadd.f32 1.0, %v5575_v26 }
 0x975   :  { %5576 = vrcp.f32 %v2072_v11 }
 0x976   :  { %5578 = vrcp.f32 %v2073_v40 }
 0x97f   :  { %v5577_v33 = vpop.eup %5576 }
 0x980   :  { %v2079_v55 = vmul.f32 %v5577_v33, %v2078_v62  ;;  %v5579_v46 = vpop.eup %5578 }
 0x981   :  { %v2082_v42 = vsub.f32 1.0, %v5579_v46  ;;  %v2084_v52 = vmul.f32 %v5579_v46, %v6838_v54  ;;  %v5398_v54 = vld [vmem:[%s7581_s7 + $0x38] ss:$12 sps:$4 sm:$0xff]   ;;  %v5404_v46 = vld [vmem:[%s7581_s7 + $0x8] ss:$12 sps:$4 sm:$0xff]  }
 0x982   :  { %v2080_v48 = vadd.f32 %v2079_v55, %v7628_v58 }
 0x984   :  { %5580 = vtanh.f32 %v2080_v48 }
 0x98e   :  { %v5581_v3 = vpop.eup %5580 }
 0x98f   :  { %v2083_v51 = vmul.f32 %v5581_v3, %v2082_v42  ;;  %v5405_v42 = vld [vmem:[%s7581_s7 + $0x20] ss:$12 sps:$4 sm:$0xff]   ;;  %v5406_v3 = vld [vmem:[%s7581_s7 + $0x38] ss:$12 sps:$4 sm:$0xff]  }
 0x991   :  { %v6905_v59 = vadd.f32 %v2084_v52, %v2083_v51  ;;  %v5408_v51 = vld [vmem:[%s7581_s7 + $0x68] ss:$12 sps:$4 sm:$0xff]   ;;  %v5409_v52 = vld [vmem:[%s7581_s7 + $0x80] ss:$12 sps:$4 sm:$0xff]  }
 0x993   :  { %v2090_v60 = vpack.c.bf16 %v6905_v59, %v6905_v59 }
 0x995   :  { %2284 = vmatmul.mubr.bf16.vlgmr.msra.gmra.mrb[52].mxu0 %v2090_v60  ;;  %5125 = vmatmul.mubr.bf16.vlgmr.msra.gmra.mrb[68].mxu1 %v2090_v60  ;;  %v5410_v60 = vld [vmem:[%s7581_s7 + $0x98] ss:$12 sps:$4 sm:$0xff]  }
 0x996   :  { %2520 = vmatpush1.bf16.msra.mxu0 %v6712_v10  ;;  %2551 = vmatprep.mubr.bf16.mxu0 %v7624_v1 }
 0x997   :  { %2521 = vmatprep.subr.bf16.mxu0 %v6722_v13  ;;  %5144 = vmatprep.mubr.msk.bf16.mxu1 %vm5703_vm0, %v7623_v45 }
 0x998   :  { %5129 = vmatpush3.bf16.msra.mxu1 %v5396_v39  ;;  %v5411_v39 = vld [vmem:[%s7581_s7 + $0xb0] ss:$12 sps:$4 sm:$0xff]  }
 0x999   :  { %5130 = vmatprep.subr.bf16.mxu1 %v7623_v45 }
 0x99a   :  { %2522 = vmatpush1.bf16.msra.mxu0 %v6728_v17 }
 0x99b   :  { %2523 = vmatprep.subr.bf16.mxu0 %v6738_v41 }
 0x99c   :  { %5131 = vmatpush3.bf16.msra.mxu1 %v5397_v37 }
 0x99d   :  { %5132 = vmatprep.subr.bf16.mxu1 %v7623_v45 }
 0x99e   :  { %2524 = vmatpush1.bf16.msra.mxu0 %v6744_v56 }
 0x99f   :  { %2525 = vmatprep.subr.bf16.mxu0 %v6754_v19 }
 0x9a0   :  { %5133 = vmatpush3.bf16.msra.mxu1 %v5398_v54 }
 0x9a1   :  { %5134 = vmatprep.subr.bf16.mxu1 %v7623_v45 }
 0x9a2   :  { %2526 = vmatpush1.bf16.msra.mxu0 %v6760_v61 }
 0x9a3   :  { %2527 = vmatprep.subr.bf16.mxu0 %v6770_v50 }
 0x9a4   :  { %5135 = vmatpush3.bf16.msra.mxu1 %v5399_v28  ;;  %v7632_v28 = vld [vmem:[#allocation15_spill] sm:$0xff] }
 0x9a5   :  { %5136 = vmatprep.subr.bf16.mxu1 %v7623_v45 }
 0x9a6   :  { %2528 = vmatpush1.bf16.msra.mxu0 %v6776_v0 }
 0x9a7   :  { %2529 = vmatprep.subr.bf16.mxu0 %v6785_v23 }
 0x9a8   :  { %5137 = vmatpush3.bf16.msra.mxu1 %v5400_v30 }
 0x9a9   :  { %5138 = vmatprep.subr.bf16.mxu1 %v7623_v45 }
 0x9aa   :  { %2530 = vmatpush1.bf16.msra.mxu0 %v6791_v36 }
 0x9ab   :  { %2531 = vmatprep.subr.bf16.mxu0 %v6801_v44 }
 0x9ac   :  { %5139 = vmatpush3.bf16.msra.mxu1 %v5401_v2 }
 0x9ad   :  { %5140 = vmatprep.subr.bf16.mxu1 %v7623_v45 }
 0x9ae   :  { %2532 = vmatpush1.bf16.msra.mxu0 %v6807_v34 }
 0x9af   :  { %2533 = vmatprep.subr.bf16.mxu0 %v6817_v35 }
 0x9b0   :  { %5141 = vmatpush3.bf16.msra.mxu1 %v5402_v7 }
 0x9b1   :  { %5142 = vmatprep.subr.bf16.mxu1 %v7623_v45 }
 0x9b2   :  { %2534 = vmatpush1.bf16.msra.mxu0 %v6823_v25 }
 0x9b3   :  { %2787 = vmatprep.subr.bf16.mxu0 %v6707_v6 }
 0x9b4   :  { %5143 = vmatpush3.bf16.msra.mxu1 %v5403_v31  ;;  %v7633_v31 = vld [vmem:[#allocation16_spill] sm:$0xff] }
 0x9b5   :  { %5148 = vmatprep.subr.bf16.mxu1 %v7623_v45 }
 0xa68   :  { %v2285_v27 = vpop.f32.mrb[52].mxu0  ;;  %v2326_v9 = vpop.f32.mrb[68].mxu1 }
 0xa69   :  { %v2332_v21 = vadd.f32 %v2285_v27, %v7629_v38  ;;  %v2287_v15 = vpop.f32.mrb[53].mxu0  ;;  %v5126_v16 = vpop.f32.mrb[69].mxu1  ;;  %v2346_v57 = vadd.f32 %v6900_v24, %v2326_v9 }
 0xa6a   :  { %v2333_v14 = vadd.f32 %v2287_v15, %v7630_v12  ;;  %v2289_v29 = vpop.f32.mrb[54].mxu0  ;;  %v2329_v18 = vpop.f32.mrb[70].mxu1 }
 0xa6b   :  { %v4538_v63 = vmul.f32 -1.442695, %v2332_v21  ;;  %v2290_v43 = vpop.f32.mrb[55].mxu0  ;;  %v5127_v47 = vpop.f32.mrb[71].mxu1 }
 0xa6c   :  { %v4539_v4 = vmul.f32 -1.442695, %v2333_v14 }
 0xa6d   :  { %5582 = vpow2.f32 %v4538_v63 }
 0xa6e   :  { %5584 = vpow2.f32 %v4539_v4 }
 0xa77   :  { %v5583_v53 = vpop.eup %5582 }
 0xa78   :  { %v2340_v8 = vadd.f32 1.0, %v5583_v53  ;;  %v5585_v32 = vpop.eup %5584  ;;  %v7634_v53 = vld [vmem:[#allocation27_spill] sm:$0xff] }
 0xa79   :  { %v2341_v49 = vadd.f32 1.0, %v5585_v32 }
 0xa7a   :  { %5586 = vrcp.f32 %v2340_v8 }
 0xa7b   :  { %5588 = vrcp.f32 %v2341_v49 }
 0xa84   :  { %v5587_v20 = vpop.eup %5586 }
 0xa85   :  { %v2347_v22 = vmul.f32 %v5587_v20, %v2346_v57  ;;  %v5589_v26 = vpop.eup %5588 }
 0xa86   :  { %v2350_v40 = vsub.f32 1.0, %v5589_v26  ;;  %v2352_v55 = vmul.f32 %v5589_v26, %v6905_v59 }
 0xa87   :  { %v2348_v11 = vadd.f32 %v2347_v22, %v7631_v5 }
 0xa89   :  { %5590 = vtanh.f32 %v2348_v11 }
 0xa93   :  { %v5591_v62 = vpop.eup %5590 }
 0xa94   :  { %v2351_v33 = vmul.f32 %v5591_v62, %v2350_v40 }
 0xa96   :  { %v6965_v58 = vadd.f32 %v2352_v55, %v2351_v33 }
 0xa98   :  { %v2358_v48 = vpack.c.bf16 %v6965_v58, %v6965_v58 }
 0xa9a   :  { %2552 = vmatmul.mubr.bf16.vlgmr.msra.gmra.mrb[56].mxu0 %v2358_v48  ;;  %5145 = vmatmul.mubr.bf16.vlgmr.msra.gmra.mrb[72].mxu1 %v2358_v48 }
 0xa9b   :  { %2788 = vmatpush1.bf16.msra.mxu0 %v6712_v10  ;;  %2819 = vmatprep.mubr.bf16.mxu0 %v7624_v1 }
 0xa9c   :  { %2789 = vmatprep.subr.bf16.mxu0 %v6722_v13  ;;  %5164 = vmatprep.mubr.msk.bf16.mxu1 %vm5703_vm0, %v7623_v45 }
 0xa9d   :  { %5149 = vmatpush3.bf16.msra.mxu1 %v5404_v46 }
 0xa9e   :  { %5150 = vmatprep.subr.bf16.mxu1 %v7623_v45 }
 0xa9f   :  { %2790 = vmatpush1.bf16.msra.mxu0 %v6728_v17 }
 0xaa0   :  { %2791 = vmatprep.subr.bf16.mxu0 %v6738_v41 }
 0xaa1   :  { %5151 = vmatpush3.bf16.msra.mxu1 %v5405_v42 }
 0xaa2   :  { %5152 = vmatprep.subr.bf16.mxu1 %v7623_v45 }
 0xaa3   :  { %2792 = vmatpush1.bf16.msra.mxu0 %v6744_v56 }
 0xaa4   :  { %2793 = vmatprep.subr.bf16.mxu0 %v6754_v19 }
 0xaa5   :  { %5153 = vmatpush3.bf16.msra.mxu1 %v5406_v3 }
 0xaa6   :  { %5154 = vmatprep.subr.bf16.mxu1 %v7623_v45 }
 0xaa7   :  { %2794 = vmatpush1.bf16.msra.mxu0 %v6760_v61 }
 0xaa8   :  { %2795 = vmatprep.subr.bf16.mxu0 %v6770_v50 }
 0xaab   :  { %2796 = vmatpush1.bf16.msra.mxu0 %v6776_v0 }
 0xaac   :  { %2797 = vmatprep.subr.bf16.mxu0 %v6785_v23 }
 0xaaf   :  { %2798 = vmatpush1.bf16.msra.mxu0 %v6791_v36 }
 0xab0   :  { %2799 = vmatprep.subr.bf16.mxu0 %v6801_v44 }
 0xab3   :  { %2800 = vmatpush1.bf16.msra.mxu0 %v6807_v34 }
 0xab4   :  { %2801 = vmatprep.subr.bf16.mxu0 %v6817_v35 }
 0xab7   :  { %2802 = vmatpush1.bf16.msra.mxu0 %v6823_v25 }
 0xab8   :  { %3055 = vmatprep.subr.bf16.mxu0 %v6707_v6  ;;  %v5407_v6 = vld [vmem:[%s7581_s7 + $0x50] ss:$12 sps:$4 sm:$0xff]  }
 0xab9   :  { %5155 = vmatpush3.bf16.msra.mxu1 %v5407_v6 }
 0xaba   :  { %5156 = vmatprep.subr.bf16.mxu1 %v7623_v45 }
 0xabd   :  { %5157 = vmatpush3.bf16.msra.mxu1 %v5408_v51 }
 0xabe   :  { %5158 = vmatprep.subr.bf16.mxu1 %v7623_v45 }
 0xac1   :  { %5159 = vmatpush3.bf16.msra.mxu1 %v5409_v52 }
 0xac2   :  { %5160 = vmatprep.subr.bf16.mxu1 %v7623_v45 }
 0xac5   :  { %5161 = vmatpush3.bf16.msra.mxu1 %v5410_v60 }
 0xac6   :  { %5162 = vmatprep.subr.bf16.mxu1 %v7623_v45 }
 0xac9   :  { %5163 = vmatpush3.bf16.msra.mxu1 %v5411_v39 }
 0xaca   :  { %5168 = vmatprep.subr.bf16.mxu1 %v7623_v45 }
 0xb6d   :  { %v2553_v37 = vpop.f32.mrb[56].mxu0  ;;  %v2594_v54 = vpop.f32.mrb[72].mxu1 }
 0xb6e   :  { %v2600_v30 = vadd.f32 %v2553_v37, %v7632_v28  ;;  %v2555_v2 = vpop.f32.mrb[57].mxu0  ;;  %v5146_v7 = vpop.f32.mrb[73].mxu1  ;;  %v2614_v43 = vadd.f32 %v6900_v24, %v2594_v54  ;;  %v7637_v37 = vld [vmem:[#allocation29_spill] sm:$0xff] }
 0xb6f   :  { %v2601_v27 = vadd.f32 %v2555_v2, %v7633_v31  ;;  %v2557_v9 = vpop.f32.mrb[58].mxu0  ;;  %v2597_v38 = vpop.f32.mrb[74].mxu1 }
 0xb70   :  { %v4564_v21 = vmul.f32 -1.442695, %v2600_v30  ;;  %v2558_v15 = vpop.f32.mrb[59].mxu0  ;;  %v5147_v16 = vpop.f32.mrb[75].mxu1  ;;  %v7094_v38 = vld [vmem:[%s7581_s7 + $0x4] ss:$12 sps:$4 sm:$0xff]  }
 0xb71   :  { %v4565_v12 = vmul.f32 -1.442695, %v2601_v27  ;;  %v5423_v15 = vld [vmem:[%s7581_s7 + $0x8] ss:$12 sps:$4 sm:$0xff]  }
 0xb72   :  { %5592 = vpow2.f32 %v4564_v21  ;;  %v7099_v21 = vld [vmem:[%s7581_s7] ss:$12 sps:$4 sm:$0xff]   ;;  %v7109_v16 = vld [vmem:[%s7581_s7 + $0x1c] ss:$12 sps:$4 sm:$0xff]  }
 0xb73   :  { %5594 = vpow2.f32 %v4565_v12  ;;  %v7115_v12 = vld [vmem:[%s7581_s7 + $0x18] ss:$12 sps:$4 sm:$0xff]  }
 0xb7c   :  { %v5593_v14 = vpop.eup %5592 }
 0xb7d   :  { %v2608_v29 = vadd.f32 1.0, %v5593_v14  ;;  %v5595_v18 = vpop.eup %5594  ;;  %v5427_v14 = vld [vmem:[%s7581_s7 + $0x20] ss:$12 sps:$4 sm:$0xff]  }
 0xb7e   :  { %v2609_v63 = vadd.f32 1.0, %v5595_v18  ;;  %v7131_v18 = vld [vmem:[%s7581_s7 + $0x30] ss:$12 sps:$4 sm:$0xff]  }
 0xb7f   :  { %5596 = vrcp.f32 %v2608_v29  ;;  %v7125_v29 = vld [vmem:[%s7581_s7 + $0x34] ss:$12 sps:$4 sm:$0xff]  }
 0xb80   :  { %5598 = vrcp.f32 %v2609_v63  ;;  %v5431_v63 = vld [vmem:[%s7581_s7 + $0x38] ss:$12 sps:$4 sm:$0xff]  }
 0xb89   :  { %v5597_v47 = vpop.eup %5596 }
 0xb8a   :  { %v2615_v4 = vmul.f32 %v5597_v47, %v2614_v43  ;;  %v5599_v32 = vpop.eup %5598  ;;  %v7141_v43 = vld [vmem:[%s7581_s7 + $0x4c] ss:$12 sps:$4 sm:$0xff]   ;;  %v7147_v47 = vld [vmem:[%s7581_s7 + $0x48] ss:$12 sps:$4 sm:$0xff]  }
 0xb8b   :  { %v2618_v49 = vsub.f32 1.0, %v5599_v32  ;;  %v2620_v22 = vmul.f32 %v5599_v32, %v6965_v58  ;;  %v5439_v32 = vld [vmem:[%s7581_s7 + $0x68] ss:$12 sps:$4 sm:$0xff]  }
 0xb8c   :  { %v2616_v8 = vadd.f32 %v2615_v4, %v7634_v53  ;;  %v5435_v4 = vld [vmem:[%s7581_s7 + $0x50] ss:$12 sps:$4 sm:$0xff]  }
 0xb8d   :  { %v7157_v53 = vld [vmem:[%s7581_s7 + $0x64] ss:$12 sps:$4 sm:$0xff]  }
 0xb8e   :  { %5600 = vtanh.f32 %v2616_v8  ;;  %v7163_v8 = vld [vmem:[%s7581_s7 + $0x60] ss:$12 sps:$4 sm:$0xff]  }
 0xb98   :  { %v5601_v57 = vpop.eup %5600 }
 0xb99   :  { %v2619_v20 = vmul.f32 %v5601_v57, %v2618_v49  ;;  %v7172_v49 = vld [vmem:[%s7581_s7 + $0x7c] ss:$12 sps:$4 sm:$0xff]   ;;  %v7178_v57 = vld [vmem:[%s7581_s7 + $0x78] ss:$12 sps:$4 sm:$0xff]  }
 0xb9b   :  { %v7025_v5 = vadd.f32 %v2620_v22, %v2619_v20  ;;  %v5443_v20 = vld [vmem:[%s7581_s7 + $0x80] ss:$12 sps:$4 sm:$0xff]  }
 0xb9c   :  { %v7188_v22 = vld [vmem:[%s7581_s7 + $0x94] ss:$12 sps:$4 sm:$0xff]  }
 0xb9d   :  { %v2626_v11 = vpack.c.bf16 %v7025_v5, %v7025_v5 }
 0xb9f   :  { %2820 = vmatmul.mubr.bf16.vlgmr.msra.gmra.mrb[60].mxu0 %v2626_v11  ;;  %5165 = vmatmul.mubr.bf16.vlgmr.msra.gmra.mrb[76].mxu1 %v2626_v11  ;;  %v7194_v11 = vld [vmem:[%s7581_s7 + $0x90] ss:$12 sps:$4 sm:$0xff]  }
 0xba0   :  { %3056 = vmatpush1.bf16.msra.mxu0 %v6712_v10  ;;  %3087 = vmatprep.mubr.bf16.mxu0 %v7624_v1  ;;  %v5412_v10 = vld [vmem:[%s7581_s7 + $0x8] ss:$12 sps:$4 sm:$0xff]  }
 0xba1   :  { %3057 = vmatprep.subr.bf16.mxu0 %v6722_v13  ;;  %5184 = vmatprep.mubr.msk.bf16.mxu1 %vm5703_vm0, %v7623_v45  ;;  %v5413_v13 = vld [vmem:[%s7581_s7 + $0x20] ss:$12 sps:$4 sm:$0xff]  }
 0xba2   :  { %5169 = vmatpush3.bf16.msra.mxu1 %v5412_v10  ;;  %v5447_v10 = vld [vmem:[%s7581_s7 + $0x98] ss:$12 sps:$4 sm:$0xff]  }
 0xba3   :  { %5170 = vmatprep.subr.bf16.mxu1 %v7623_v45 }
 0xba4   :  { %3058 = vmatpush1.bf16.msra.mxu0 %v6728_v17  ;;  %v5414_v17 = vld [vmem:[%s7581_s7 + $0x38] ss:$12 sps:$4 sm:$0xff]  }
 0xba5   :  { %3059 = vmatprep.subr.bf16.mxu0 %v6738_v41  ;;  %v5415_v41 = vld [vmem:[%s7581_s7 + $0x50] ss:$12 sps:$4 sm:$0xff]  }
 0xba6   :  { %5171 = vmatpush3.bf16.msra.mxu1 %v5413_v13  ;;  %v7204_v13 = vld [vmem:[%s7581_s7 + $0xac] ss:$12 sps:$4 sm:$0xff]  }
 0xba7   :  { %5172 = vmatprep.subr.bf16.mxu1 %v7623_v45 }
 0xba8   :  { %3060 = vmatpush1.bf16.msra.mxu0 %v6744_v56  ;;  %v5416_v56 = vld [vmem:[%s7581_s7 + $0x68] ss:$12 sps:$4 sm:$0xff]  }
 0xba9   :  { %3061 = vmatprep.subr.bf16.mxu0 %v6754_v19  ;;  %v5417_v19 = vld [vmem:[%s7581_s7 + $0x80] ss:$12 sps:$4 sm:$0xff]  }
 0xbaa   :  { %5173 = vmatpush3.bf16.msra.mxu1 %v5414_v17  ;;  %v7210_v17 = vld [vmem:[%s7581_s7 + $0xa8] ss:$12 sps:$4 sm:$0xff]  }
 0xbab   :  { %5174 = vmatprep.subr.bf16.mxu1 %v7623_v45 }
 0xbac   :  { %3062 = vmatpush1.bf16.msra.mxu0 %v6760_v61  ;;  %v5418_v61 = vld [vmem:[%s7581_s7 + $0x98] ss:$12 sps:$4 sm:$0xff]  }
 0xbad   :  { %3063 = vmatprep.subr.bf16.mxu0 %v6770_v50  ;;  %v5419_v50 = vld [vmem:[%s7581_s7 + $0xb0] ss:$12 sps:$4 sm:$0xff]  }
 0xbae   :  { %5175 = vmatpush3.bf16.msra.mxu1 %v5415_v41  ;;  %v5451_v41 = vld [vmem:[%s7581_s7 + $0xb0] ss:$12 sps:$4 sm:$0xff]  }
 0xbaf   :  { %5176 = vmatprep.subr.bf16.mxu1 %v7623_v45 }
 0xbb0   :  { %3064 = vmatpush1.bf16.msra.mxu0 %v6776_v0 }
 0xbb1   :  { %3065 = vmatprep.subr.bf16.mxu0 %v6785_v23 }
 0xbb2   :  { %5177 = vmatpush3.bf16.msra.mxu1 %v5416_v56 }
 0xbb3   :  { %5178 = vmatprep.subr.bf16.mxu1 %v7623_v45 }
 0xbb4   :  { %3066 = vmatpush1.bf16.msra.mxu0 %v6791_v36  ;;  %v7635_v36 = vld [vmem:[#allocation17_spill] sm:$0xff] }
 0xbb5   :  { %3067 = vmatprep.subr.bf16.mxu0 %v6801_v44 }
 0xbb6   :  { %5179 = vmatpush3.bf16.msra.mxu1 %v5417_v19 }
 0xbb7   :  { %5180 = vmatprep.subr.bf16.mxu1 %v7623_v45 }
 0xbb8   :  { %3068 = vmatpush1.bf16.msra.mxu0 %v6807_v34 }
 0xbb9   :  { %3069 = vmatprep.subr.bf16.mxu0 %v6817_v35 }
 0xbba   :  { %5181 = vmatpush3.bf16.msra.mxu1 %v5418_v61  ;;  %v7638_v61 = vld [vmem:[#allocation19_spill] sm:$0xff] }
 0xbbb   :  { %5182 = vmatprep.subr.bf16.mxu1 %v7623_v45 }
 0xbbc   :  { %3070 = vmatpush1.bf16.msra.mxu0 %v6823_v25  ;;  %v7636_v25 = vld [vmem:[#allocation18_spill] sm:$0xff] }
 0xbbd   :  { %3323 = vmatprep.subr.bf16.mxu0 %v7094_v38 }
 0xbbe   :  { %5183 = vmatpush3.bf16.msra.mxu1 %v5419_v50 }
 0xbbf   :  { %5188 = vmatprep.subr.bf16.mxu1 %v7623_v45 }
 0xc72   :  { %v2821_v0 = vpop.f32.mrb[60].mxu0  ;;  %v2862_v23 = vpop.f32.mrb[76].mxu1 }
 0xc73   :  { %v2868_v44 = vadd.f32 %v2821_v0, %v7635_v36  ;;  %v2823_v34 = vpop.f32.mrb[61].mxu0  ;;  %v5166_v35 = vpop.f32.mrb[77].mxu1  ;;  %v2882_v52 = vadd.f32 %v6900_v24, %v2862_v23  ;;  %v7639_v36 = vld [vmem:[#allocation20_spill] sm:$0xff] }
 0xc74   :  { %v2869_v26 = vadd.f32 %v2823_v34, %v7636_v25  ;;  %v2825_v40 = vpop.f32.mrb[62].mxu0  ;;  %v2865_v62 = vpop.f32.mrb[78].mxu1 }
 0xc75   :  { %v4590_v33 = vmul.f32 -1.442695, %v2868_v44  ;;  %v2826_v55 = vpop.f32.mrb[63].mxu0  ;;  %v5167_v48 = vpop.f32.mrb[79].mxu1 }
 0xc76   :  { %v4591_v46 = vmul.f32 -1.442695, %v2869_v26 }
 0xc77   :  { %5602 = vpow2.f32 %v4590_v33 }
 0xc78   :  { %5604 = vpow2.f32 %v4591_v46 }
 0xc81   :  { %v5603_v42 = vpop.eup %5602 }
 0xc82   :  { %v2876_v3 = vadd.f32 1.0, %v5603_v42  ;;  %v5605_v6 = vpop.eup %5604 }
 0xc83   :  { %v2877_v51 = vadd.f32 1.0, %v5605_v6 }
 0xc84   :  { %5606 = vrcp.f32 %v2876_v3 }
 0xc85   :  { %5608 = vrcp.f32 %v2877_v51  ;;  %v7640_v51 = vld [vmem:[#allocation32_spill] sm:$0xff] }
 0xc8e   :  { %v5607_v60 = vpop.eup %5606 }
 0xc8f   :  { %v2883_v39 = vmul.f32 %v5607_v60, %v2882_v52  ;;  %v5609_v28 = vpop.eup %5608 }
 0xc90   :  { %v2886_v30 = vsub.f32 1.0, %v5609_v28  ;;  %v2888_v31 = vmul.f32 %v5609_v28, %v7025_v5 }
 0xc91   :  { %v2884_v54 = vadd.f32 %v2883_v39, %v7637_v37 }
 0xc93   :  { %5610 = vtanh.f32 %v2884_v54 }
 0xc9d   :  { %v5611_v2 = vpop.eup %5610 }
 0xc9e   :  { %v2887_v7 = vmul.f32 %v5611_v2, %v2886_v30 }
 0xca0   :  { %v7084_v27 = vadd.f32 %v2888_v31, %v2887_v7  ;;  %v5452_v7 = vld [vmem:[%s7581_s7 + $0x8] ss:$12 sps:$4 sm:$0xff]   ;;  %v5453_v31 = vld [vmem:[%s7581_s7 + $0x20] ss:$12 sps:$4 sm:$0xff]  }
 0xca2   :  { %v2894_v9 = vpack.c.bf16 %v7084_v27, %v7084_v27 }
 0xca4   :  { %3088 = vmatmul.mubr.bf16.vlgmr.msra.gmra.mrb[64].mxu0 %v2894_v9  ;;  %5185 = vmatmul.mubr.bf16.vlgmr.msra.gmra.mrb[80].mxu1 %v2894_v9  ;;  %v5454_v9 = vld [vmem:[%s7581_s7 + $0x38] ss:$12 sps:$4 sm:$0xff]  }
 0xca5   :  { %3355 = vmatprep.mubr.bf16.mxu0 %v7624_v1  ;;  %5204 = vmatprep.mubr.msk.bf16.mxu1 %vm5703_vm0, %v7623_v45 }
 0xca6   :  { %3324 = vmatpush1.bf16.msra.mxu0 %v7099_v21  ;;  %5189 = vmatpush3.bf16.msra.mxu1 %v5423_v15  ;;  %v5456_v15 = vld [vmem:[%s7581_s7 + $0x68] ss:$12 sps:$4 sm:$0xff]  }
 0xca7   :  { %5190 = vmatprep.subr.bf16.mxu1 %v7623_v45  ;;  %3325 = vmatprep.subr.bf16.mxu0 %v7109_v16 }
 0xcaa   :  { %3326 = vmatpush1.bf16.msra.mxu0 %v7115_v12  ;;  %5191 = vmatpush3.bf16.msra.mxu1 %v5427_v14  ;;  %v5457_v14 = vld [vmem:[%s7581_s7 + $0x80] ss:$12 sps:$4 sm:$0xff]  }
 0xcab   :  { %5192 = vmatprep.subr.bf16.mxu1 %v7623_v45  ;;  %3327 = vmatprep.subr.bf16.mxu0 %v7125_v29 }
 0xcae   :  { %3328 = vmatpush1.bf16.msra.mxu0 %v7131_v18  ;;  %5193 = vmatpush3.bf16.msra.mxu1 %v5431_v63  ;;  %v5458_v63 = vld [vmem:[%s7581_s7 + $0x98] ss:$12 sps:$4 sm:$0xff]  }
 0xcaf   :  { %5194 = vmatprep.subr.bf16.mxu1 %v7623_v45  ;;  %3329 = vmatprep.subr.bf16.mxu0 %v7141_v43 }
 0xcb2   :  { %3330 = vmatpush1.bf16.msra.mxu0 %v7147_v47  ;;  %5195 = vmatpush3.bf16.msra.mxu1 %v5435_v4  ;;  %v5459_v4 = vld [vmem:[%s7581_s7 + $0xb0] ss:$12 sps:$4 sm:$0xff]  }
 0xcb3   :  { %5196 = vmatprep.subr.bf16.mxu1 %v7623_v45  ;;  %3331 = vmatprep.subr.bf16.mxu0 %v7157_v53 }
 0xcb6   :  { %3332 = vmatpush1.bf16.msra.mxu0 %v7163_v8  ;;  %5197 = vmatpush3.bf16.msra.mxu1 %v5439_v32 }
 0xcb7   :  { %3333 = vmatprep.subr.bf16.mxu0 %v7172_v49  ;;  %5198 = vmatprep.subr.bf16.mxu1 %v7623_v45 }
 0xcba   :  { %3334 = vmatpush1.bf16.msra.mxu0 %v7178_v57  ;;  %5199 = vmatpush3.bf16.msra.mxu1 %v5443_v20 }
 0xcbb   :  { %3335 = vmatprep.subr.bf16.mxu0 %v7188_v22  ;;  %5200 = vmatprep.subr.bf16.mxu1 %v7623_v45 }
 0xcbe   :  { %3336 = vmatpush1.bf16.msra.mxu0 %v7194_v11  ;;  %5201 = vmatpush3.bf16.msra.mxu1 %v5447_v10  ;;  %v7641_v10 = vld [vmem:[#allocation21_spill] sm:$0xff] }
 0xcbf   :  { %3337 = vmatprep.subr.bf16.mxu0 %v7204_v13  ;;  %5202 = vmatprep.subr.bf16.mxu1 %v7623_v45 }
 0xcc2   :  { %3338 = vmatpush1.bf16.msra.mxu0 %v7210_v17  ;;  %5203 = vmatpush3.bf16.msra.mxu1 %v5451_v41 }
 0xcc3   :  { %3591 = vmatprep.subr.bf16.mxu0 %v7094_v38  ;;  %5208 = vmatprep.subr.bf16.mxu1 %v7623_v45 }
 0xd77   :  { %v3089_v56 = vpop.f32.mrb[64].mxu0  ;;  %v3130_v19 = vpop.f32.mrb[80].mxu1 }
 0xd78   :  { %v3136_v50 = vadd.f32 %v3089_v56, %v7638_v61  ;;  %v3091_v0 = vpop.f32.mrb[65].mxu0  ;;  %v5186_v23 = vpop.f32.mrb[81].mxu1  ;;  %v3150_v42 = vadd.f32 %v6900_v24, %v3130_v19  ;;  %v7642_v61 = vld [vmem:[#allocation22_spill] sm:$0xff] }
 0xd79   :  { %v3137_v44 = vadd.f32 %v3091_v0, %v7639_v36  ;;  %v3093_v34 = vpop.f32.mrb[66].mxu0  ;;  %v3133_v35 = vpop.f32.mrb[82].mxu1 }
 0xd7a   :  { %v4616_v25 = vmul.f32 -1.442695, %v3136_v50  ;;  %v3094_v26 = vpop.f32.mrb[67].mxu0  ;;  %v5187_v40 = vpop.f32.mrb[83].mxu1 }
 0xd7b   :  { %v4617_v62 = vmul.f32 -1.442695, %v3137_v44 }
 0xd7c   :  { %5612 = vpow2.f32 %v4616_v25 }
 0xd7d   :  { %5614 = vpow2.f32 %v4617_v62 }
 0xd86   :  { %v5613_v33 = vpop.eup %5612 }
 0xd87   :  { %v3144_v55 = vadd.f32 1.0, %v5613_v33  ;;  %v5615_v48 = vpop.eup %5614 }
 0xd88   :  { %v3145_v46 = vadd.f32 1.0, %v5615_v48 }
 0xd89   :  { %5616 = vrcp.f32 %v3144_v55 }
 0xd8a   :  { %5618 = vrcp.f32 %v3145_v46  ;;  %v7643_v46 = vld [vmem:[#allocation34_spill] sm:$0xff] }
 0xd93   :  { %v5617_v3 = vpop.eup %5616 }
 0xd94   :  { %v3151_v6 = vmul.f32 %v5617_v3, %v3150_v42  ;;  %v5619_v60 = vpop.eup %5618 }
 0xd95   :  { %v3154_v39 = vsub.f32 1.0, %v5619_v60  ;;  %v3156_v28 = vmul.f32 %v5619_v60, %v7084_v27 }
 0xd96   :  { %v3152_v52 = vadd.f32 %v3151_v6, %v7640_v51 }
 0xd98   :  { %5620 = vtanh.f32 %v3152_v52 }
 0xda2   :  { %v5621_v37 = vpop.eup %5620 }
 0xda3   :  { %v3155_v54 = vmul.f32 %v5621_v37, %v3154_v39 }
 0xda5   :  { %v7225_v30 = vadd.f32 %v3156_v28, %v3155_v54  ;;  %v7645_v54 = vld [vmem:[#allocation24_spill] sm:$0xff] }
 0xda7   :  { %v3162_v2 = vpack.c.bf16 %v7225_v30, %v7225_v30 }
 0xda9   :  { %3356 = vmatmul.mubr.bf16.vlgmr.msra.gmra.mrb[68].mxu0 %v3162_v2  ;;  %5205 = vmatmul.mubr.bf16.vlgmr.msra.gmra.mrb[84].mxu1 %v3162_v2 }
 0xdaa   :  { %3592 = vmatpush1.bf16.msra.mxu0 %v7099_v21  ;;  %3623 = vmatprep.mubr.bf16.mxu0 %v7624_v1 }
 0xdab   :  { %3593 = vmatprep.subr.bf16.mxu0 %v7109_v16  ;;  %5224 = vmatprep.mubr.msk.bf16.mxu1 %vm5703_vm0, %v7623_v45 }
 0xdac   :  { %5209 = vmatpush3.bf16.msra.mxu1 %v5452_v7 }
 0xdad   :  { %5210 = vmatprep.subr.bf16.mxu1 %v7623_v45 }
 0xdae   :  { %3594 = vmatpush1.bf16.msra.mxu0 %v7115_v12 }
 0xdaf   :  { %3595 = vmatprep.subr.bf16.mxu0 %v7125_v29 }
 0xdb0   :  { %5211 = vmatpush3.bf16.msra.mxu1 %v5453_v31 }
 0xdb1   :  { %5212 = vmatprep.subr.bf16.mxu1 %v7623_v45 }
 0xdb2   :  { %3596 = vmatpush1.bf16.msra.mxu0 %v7131_v18 }
 0xdb3   :  { %3597 = vmatprep.subr.bf16.mxu0 %v7141_v43 }
 0xdb4   :  { %5213 = vmatpush3.bf16.msra.mxu1 %v5454_v9 }
 0xdb5   :  { %5214 = vmatprep.subr.bf16.mxu1 %v7623_v45 }
 0xdb6   :  { %3598 = vmatpush1.bf16.msra.mxu0 %v7147_v47 }
 0xdb7   :  { %3599 = vmatprep.subr.bf16.mxu0 %v7157_v53 }
 0xdba   :  { %3600 = vmatpush1.bf16.msra.mxu0 %v7163_v8 }
 0xdbb   :  { %3601 = vmatprep.subr.bf16.mxu0 %v7172_v49 }
 0xdbe   :  { %3602 = vmatpush1.bf16.msra.mxu0 %v7178_v57 }
 0xdbf   :  { %3603 = vmatprep.subr.bf16.mxu0 %v7188_v22 }
 0xdc2   :  { %3604 = vmatpush1.bf16.msra.mxu0 %v7194_v11 }
 0xdc3   :  { %3605 = vmatprep.subr.bf16.mxu0 %v7204_v13 }
 0xdc6   :  { %3606 = vmatpush1.bf16.msra.mxu0 %v7210_v17 }
 0xdc7   :  { %3859 = vmatprep.subr.bf16.mxu0 %v7094_v38  ;;  %v5455_v38 = vld [vmem:[%s7581_s7 + $0x50] ss:$12 sps:$4 sm:$0xff]  }
 0xdc8   :  { %5215 = vmatpush3.bf16.msra.mxu1 %v5455_v38 }
 0xdc9   :  { %5216 = vmatprep.subr.bf16.mxu1 %v7623_v45 }
 0xdcc   :  { %5217 = vmatpush3.bf16.msra.mxu1 %v5456_v15 }
 0xdcd   :  { %5218 = vmatprep.subr.bf16.mxu1 %v7623_v45 }
 0xdd0   :  { %5219 = vmatpush3.bf16.msra.mxu1 %v5457_v14 }
 0xdd1   :  { %5220 = vmatprep.subr.bf16.mxu1 %v7623_v45 }
 0xdd4   :  { %5221 = vmatpush3.bf16.msra.mxu1 %v5458_v63 }
 0xdd5   :  { %5222 = vmatprep.subr.bf16.mxu1 %v7623_v45 }
 0xdd8   :  { %5223 = vmatpush3.bf16.msra.mxu1 %v5459_v4 }
 0xdd9   :  { %5228 = vmatprep.subr.bf16.mxu1 %v7623_v45 }
 0xe7c   :  { %v3357_v32 = vpop.f32.mrb[68].mxu0  ;;  %v3398_v20 = vpop.f32.mrb[84].mxu1 }
 0xe7d   :  { %v3404_v41 = vadd.f32 %v3357_v32, %v7641_v10  ;;  %v3359_v56 = vpop.f32.mrb[69].mxu0  ;;  %v5206_v19 = vpop.f32.mrb[85].mxu1  ;;  %v3418_v33 = vadd.f32 %v6900_v24, %v3398_v20 }
 0xe7e   :  { %v3405_v50 = vadd.f32 %v3359_v56, %v7642_v61  ;;  %v3361_v0 = vpop.f32.mrb[70].mxu0  ;;  %v3401_v23 = vpop.f32.mrb[86].mxu1 }
 0xe7f   :  { %v4642_v36 = vmul.f32 -1.442695, %v3404_v41  ;;  %v3362_v44 = vpop.f32.mrb[71].mxu0  ;;  %v5207_v34 = vpop.f32.mrb[87].mxu1  ;;  %v7646_v41 = vld [vmem:[#allocation31_spill] sm:$0xff] }
 0xe80   :  { %v4643_v35 = vmul.f32 -1.442695, %v3405_v50  ;;  %v5468_v44 = vld [vmem:[%s7584_s10] ss:$8 sps:$4 sm:$0xff]   ;;  %v5473_v34 = vld [vmem:[%s7584_s10 + $0x14] ss:$8 sps:$4 sm:$0xff]  }
 0xe81   :  { %5622 = vpow2.f32 %v4642_v36 }
 0xe82   :  { %5624 = vpow2.f32 %v4643_v35  ;;  %v5471_v35 = vld [vmem:[%s7584_s10 + $0x10] ss:$8 sps:$4 sm:$0xff]  }
 0xe8b   :  { %v5623_v25 = vpop.eup %5622 }
 0xe8c   :  { %v3412_v26 = vadd.f32 1.0, %v5623_v25  ;;  %v5625_v40 = vpop.eup %5624  ;;  %v5476_v25 = vld [vmem:[%s7584_s10 + $0x24] ss:$8 sps:$4 sm:$0xff]  }
 0xe8d   :  { %v3413_v62 = vadd.f32 1.0, %v5625_v40  ;;  %v5479_v40 = vld [vmem:[%s7584_s10 + $0x34] ss:$8 sps:$4 sm:$0xff]  }
 0xe8e   :  { %5626 = vrcp.f32 %v3412_v26  ;;  %v5474_v26 = vld [vmem:[%s7584_s10 + $0x20] ss:$8 sps:$4 sm:$0xff]  }
 0xe8f   :  { %5628 = vrcp.f32 %v3413_v62  ;;  %v5477_v62 = vld [vmem:[%s7584_s10 + $0x30] ss:$8 sps:$4 sm:$0xff]  }
 0xe98   :  { %v5627_v55 = vpop.eup %5626 }
 0xe99   :  { %v3419_v48 = vmul.f32 %v5627_v55, %v3418_v33  ;;  %v5629_v3 = vpop.eup %5628  ;;  %v5482_v33 = vld [vmem:[%s7584_s10 + $0x44] ss:$8 sps:$4 sm:$0xff]   ;;  %v5480_v55 = vld [vmem:[%s7584_s10 + $0x40] ss:$8 sps:$4 sm:$0xff]  }
 0xe9a   :  { %v3422_v6 = vsub.f32 1.0, %v5629_v3  ;;  %v3424_v60 = vmul.f32 %v5629_v3, %v7225_v30  ;;  %v5486_v3 = vld [vmem:[%s7584_s10 + $0x60] ss:$8 sps:$4 sm:$0xff]  }
 0xe9b   :  { %v3420_v42 = vadd.f32 %v3419_v48, %v7643_v46  ;;  %v5485_v48 = vld [vmem:[%s7584_s10 + $0x54] ss:$8 sps:$4 sm:$0xff]   ;;  %v5483_v46 = vld [vmem:[%s7584_s10 + $0x50] ss:$8 sps:$4 sm:$0xff]  }
 0xe9d   :  { %5630 = vtanh.f32 %v3420_v42  ;;  %v5488_v42 = vld [vmem:[%s7584_s10 + $0x64] ss:$8 sps:$4 sm:$0xff]  }
 0xea7   :  { %v5631_v51 = vpop.eup %5630 }
 0xea8   :  { %v3423_v52 = vmul.f32 %v5631_v51, %v3422_v6  ;;  %v5491_v6 = vld [vmem:[%s7584_s10 + $0x74] ss:$8 sps:$4 sm:$0xff]   ;;  %v5489_v51 = vld [vmem:[%s7584_s10 + $0x70] ss:$8 sps:$4 sm:$0xff]  }
 0xeaa   :  { %v7285_v39 = vadd.f32 %v3424_v60, %v3423_v52  ;;  %v3971_v52 = vpack.c.bf16 %v6965_v58, %v6905_v59  ;;  %v3972_v60 = vpack.c.bf16 %v7084_v27, %v7025_v5 }
 0xeac   :  { %v3430_v37 = vpack.c.bf16 %v7285_v39, %v7285_v39 }
 0xeae   :  { %3624 = vmatmul.mubr.bf16.vlgmr.msra.gmra.mrb[72].mxu0 %v3430_v37  ;;  %5225 = vmatmul.mubr.bf16.vlgmr.msra.gmra.mrb[88].mxu1 %v3430_v37  ;;  %v3973_v37 = vpack.c.bf16 %v7285_v39, %v7225_v30 }
 0xeaf   :  { %3860 = vmatpush1.bf16.msra.mxu0 %v7099_v21  ;;  %3891 = vmatprep.mubr.bf16.mxu0 %v7624_v1  ;;  %v5460_v21 = vld [vmem:[%s7581_s7 + $0x8] ss:$12 sps:$4 sm:$0xff]  }
 0xeb0   :  { %3861 = vmatprep.subr.bf16.mxu0 %v7109_v16  ;;  %5244 = vmatprep.mubr.msk.bf16.mxu1 %vm5703_vm0, %v7623_v45  ;;  %v5461_v16 = vld [vmem:[%s7581_s7 + $0x20] ss:$12 sps:$4 sm:$0xff]  }
 0xeb1   :  { %5229 = vmatpush3.bf16.msra.mxu1 %v5460_v21 }
 0xeb2   :  { %5230 = vmatprep.subr.bf16.mxu1 %v7623_v45 }
 0xeb3   :  { %3862 = vmatpush1.bf16.msra.mxu0 %v7115_v12  ;;  %v5462_v12 = vld [vmem:[%s7581_s7 + $0x38] ss:$12 sps:$4 sm:$0xff]  }
 0xeb4   :  { %3863 = vmatprep.subr.bf16.mxu0 %v7125_v29  ;;  %v5463_v29 = vld [vmem:[%s7581_s7 + $0x50] ss:$12 sps:$4 sm:$0xff]  }
 0xeb5   :  { %5231 = vmatpush3.bf16.msra.mxu1 %v5461_v16 }
 0xeb6   :  { %5232 = vmatprep.subr.bf16.mxu1 %v7623_v45 }
 0xeb7   :  { %3864 = vmatpush1.bf16.msra.mxu0 %v7131_v18  ;;  %v5464_v18 = vld [vmem:[%s7581_s7 + $0x68] ss:$12 sps:$4 sm:$0xff]  }
 0xeb8   :  { %3865 = vmatprep.subr.bf16.mxu0 %v7141_v43  ;;  %v5470_v43 = vld [vmem:[%s7584_s10 + $0x4] ss:$8 sps:$4 sm:$0xff]  }
 0xeb9   :  { %5233 = vmatpush3.bf16.msra.mxu1 %v5462_v12  ;;  %v7647_v12 = vld [vmem:[#allocation25_spill] sm:$0xff] }
 0xeba   :  { %5234 = vmatprep.subr.bf16.mxu1 %v7623_v45 }
 0xebb   :  { %3866 = vmatpush1.bf16.msra.mxu0 %v7147_v47  ;;  %v5465_v47 = vld [vmem:[%s7581_s7 + $0x80] ss:$12 sps:$4 sm:$0xff]  }
 0xebc   :  { %3867 = vmatprep.subr.bf16.mxu0 %v7157_v53  ;;  %v5466_v53 = vld [vmem:[%s7581_s7 + $0x98] ss:$12 sps:$4 sm:$0xff]  }
 0xebd   :  { %5235 = vmatpush3.bf16.msra.mxu1 %v5463_v29 }
 0xebe   :  { %5236 = vmatprep.subr.bf16.mxu1 %v7623_v45 }
 0xebf   :  { %3868 = vmatpush1.bf16.msra.mxu0 %v7163_v8  ;;  %v5467_v8 = vld [vmem:[%s7581_s7 + $0xb0] ss:$12 sps:$4 sm:$0xff]  }
 0xec0   :  { %3869 = vmatprep.subr.bf16.mxu0 %v7172_v49 }
 0xec1   :  { %5237 = vmatpush3.bf16.msra.mxu1 %v5464_v18  ;;  %v7648_v18 = vld [vmem:[#allocation26_spill] sm:$0xff] }
 0xec2   :  { %5238 = vmatprep.subr.bf16.mxu1 %v7623_v45 }
 0xec3   :  { %3870 = vmatpush1.bf16.msra.mxu0 %v7178_v57 }
 0xec4   :  { %3871 = vmatprep.subr.bf16.mxu0 %v7188_v22  ;;  %v7644_v22 = vld [vmem:[#allocation23_spill] sm:$0xff] }
 0xec5   :  { %5239 = vmatpush3.bf16.msra.mxu1 %v5465_v47 }
 0xec6   :  { %5240 = vmatprep.subr.bf16.mxu1 %v7623_v45 }
 0xec7   :  { %3872 = vmatpush1.bf16.msra.mxu0 %v7194_v11 }
 0xec8   :  { %3873 = vmatprep.subr.bf16.mxu0 %v7204_v13 }
 0xec9   :  { %5241 = vmatpush3.bf16.msra.mxu1 %v5466_v53 }
 0xeca   :  { %5242 = vmatprep.subr.bf16.mxu1 %v7623_v45 }
 0xecb   :  { %3874 = vmatpush1.bf16.msra.mxu0 %v7210_v17 }
 0xecc   :  { %4083 = vmatprep.subr.bf16.mxu0 %v5470_v43 }
 0xecd   :  { %5243 = vmatpush3.bf16.msra.mxu1 %v5467_v8 }
 0xf81   :  { %v3625_v49 = vpop.f32.mrb[72].mxu0  ;;  %v3666_v57 = vpop.f32.mrb[88].mxu1 }
 0xf82   :  { %v3672_v11 = vadd.f32 %v3625_v49, %v7644_v22  ;;  %v3627_v13 = vpop.f32.mrb[73].mxu0  ;;  %v5226_v17 = vpop.f32.mrb[89].mxu1  ;;  %v3686_v32 = vadd.f32 %v6900_v24, %v3666_v57  ;;  %v3991_v22 = vld [vmem:[%s7585_s11] sm:$0x3] }
 0xf83   :  { %v3673_v28 = vadd.f32 %v3627_v13, %v7645_v54  ;;  %v3629_v2 = vpop.f32.mrb[74].mxu0  ;;  %v3669_v7 = vpop.f32.mrb[90].mxu1 }
 0xf84   :  { %v4668_v31 = vmul.f32 -1.442695, %v3672_v11  ;;  %v3630_v9 = vpop.f32.mrb[75].mxu0  ;;  %v5227_v38 = vpop.f32.mrb[91].mxu1  ;;  %v5676_v11 = vld [vmem:[%s7583_s9] ss:$0 sm:$0xff] }
 0xf85   :  { %v4669_v15 = vmul.f32 -1.442695, %v3673_v28  ;;  %v7649_v28 = vld [vmem:[#allocation8_spill] sm:$0xff]  ;;  %v7650_v7 = vld [vmem:[#allocation9_spill] sm:$0xff] }
 0xf86   :  { %5632 = vpow2.f32 %v4668_v31  ;;  %v7414_v2 = vrot.slane %v3991_v22, %v7649_v28  ;;  %v7417_v31 = vrot.slane %v3991_v22, %v7650_v7  ;;  %v7651_v9 = vld [vmem:[#allocation33_spill] sm:$0xff] }
 0xf87   :  { %5634 = vpow2.f32 %v4669_v15 }
 0xf90   :  { %v5633_v14 = vpop.eup %5632 }
 0xf91   :  { %v3680_v63 = vadd.f32 1.0, %v5633_v14  ;;  %v5635_v45 = vpop.eup %5634 }
 0xf92   :  { %v3681_v4 = vadd.f32 1.0, %v5635_v45 }
 0xf93   :  { %5636 = vrcp.f32 %v3680_v63 }
 0xf94   :  { %5638 = vrcp.f32 %v3681_v4 }
 0xf9d   :  { %v5637_v20 = vpop.eup %5636 }
 0xf9e   :  { %v3687_v10 = vmul.f32 %v5637_v20, %v3686_v32  ;;  %v5639_v19 = vpop.eup %5638 }
 0xf9f   :  { %v3690_v61 = vsub.f32 1.0, %v5639_v19  ;;  %v3692_v23 = vmul.f32 %v5639_v19, %v7285_v39 }
 0xfa0   :  { %v3688_v56 = vadd.f32 %v3687_v10, %v7646_v41 }
 0xfa2   :  { %5640 = vtanh.f32 %v3688_v56 }
 0xfac   :  { %v5641_v50 = vpop.eup %5640 }
 0xfad   :  { %v3691_v0 = vmul.f32 %v5641_v50, %v3690_v61 }
 0xfaf   :  { %v7346_v36 = vadd.f32 %v3692_v23, %v3691_v0 }
 0xfb1   :  { %v3698_v24 = vpack.c.bf16 %v7346_v36, %v7346_v36 }
 0xfb3   :  { %3892 = vmatmul.mubr.bf16.vlgmr.msra.gmra.mrb[76].mxu0 %v3698_v24  ;;  %5245 = vmatmul.mubr.bf16.vlgmr.msra.gmra.mrb[92].mxu1 %v3698_v24 }
 0xfb4   :  { %4084 = vmatpush1.bf16.msra.mxu0 %v5468_v44  ;;  %4115 = vmatprep.mubr.bf16.mxu0 %v7624_v1 }
 0xfb5   :  { %4085 = vmatprep.subr.bf16.mxu0 %v5473_v34 }
 0xfb8   :  { %4086 = vmatpush1.bf16.msra.mxu0 %v5471_v35 }
 0xfb9   :  { %4087 = vmatprep.subr.bf16.mxu0 %v5476_v25 }
 0xfbc   :  { %4088 = vmatpush1.bf16.msra.mxu0 %v5474_v26 }
 0xfbd   :  { %4089 = vmatprep.subr.bf16.mxu0 %v5479_v40 }
 0xfc0   :  { %4090 = vmatpush1.bf16.msra.mxu0 %v5477_v62 }
 0xfc1   :  { %4091 = vmatprep.subr.bf16.mxu0 %v5482_v33 }
 0xfc4   :  { %4092 = vmatpush1.bf16.msra.mxu0 %v5480_v55 }
 0xfc5   :  { %4093 = vmatprep.subr.bf16.mxu0 %v5485_v48 }
 0xfc8   :  { %4094 = vmatpush1.bf16.msra.mxu0 %v5483_v46 }
 0xfc9   :  { %4095 = vmatprep.subr.bf16.mxu0 %v5488_v42 }
 0xfcc   :  { %4096 = vmatpush1.bf16.msra.mxu0 %v5486_v3 }
 0xfcd   :  { %4097 = vmatprep.subr.bf16.mxu0 %v5491_v6 }
 0xfd0   :  { %4098 = vmatpush1.bf16.msra.mxu0 %v5489_v51 }
 0xfd3   :  { %4116 = vmatmul.mubr.bf16.vlgmr.msra.gmra.mrb[80].mxu0 %v3971_v52 }
 0xfd4   :  { %4125 = vmatprep.mubr.bf16.mxu0 %v7624_v1 }
 0xfdb   :  { %4126 = vmatmul.mubr.bf16.gmra.mrb[84].mxu0 %v3972_v60 }
 0xfdc   :  { %4135 = vmatprep.mubr.bf16.mxu0 %v7624_v1 }
 0xfe3   :  { %4136 = vmatmul.mubr.bf16.gmra.mrb[88].mxu0 %v3973_v37 }
 0xfe4   :  { %4145 = vmatprep.mubr.bf16.mxu0 %v7624_v1 }
0x1086   :  { %v3893_v21 = vpop.f32.mrb[76].mxu0  ;;  %v3934_v16 = vpop.f32.mrb[92].mxu1 }
0x1087   :  { %v3940_v29 = vadd.f32 %v3893_v21, %v7647_v12  ;;  %v3895_v59 = vpop.f32.mrb[77].mxu0  ;;  %v5246_v58 = vpop.f32.mrb[93].mxu1  ;;  %v3954_v13 = vadd.f32 %v5676_v11, %v3934_v16 }
0x1088   :  { %v3941_v43 = vadd.f32 %v3895_v59, %v7648_v18  ;;  %v3897_v47 = vpop.f32.mrb[78].mxu0  ;;  %v3937_v53 = vpop.f32.mrb[94].mxu1 }
0x1089   :  { %v4694_v5 = vmul.f32 -1.442695, %v3940_v29  ;;  %v3898_v27 = vpop.f32.mrb[79].mxu0  ;;  %v5247_v8 = vpop.f32.mrb[95].mxu1  ;;  %v7652_v29 = vlaneseq }
0x108a   :  { %v4695_v49 = vmul.f32 -1.442695, %v3941_v43 }
0x108b   :  { %5642 = vpow2.f32 %v4694_v5  ;;  %v7487_v59 = vand.u32 127, %v7652_v29 }
0x108c   :  { %5644 = vpow2.f32 %v4695_v49 }
0x108d   :  { %v7490_v18 = vadd.s32 128, %v7487_v59 }
0x1095   :  { %v5643_v30 = vpop.eup %5642 }
0x1096   :  { %v3948_v39 = vadd.f32 1.0, %v5643_v30  ;;  %v5645_v1 = vpop.eup %5644 }
0x1097   :  { %v3949_v57 = vadd.f32 1.0, %v5645_v1 }
0x1098   :  { %5646 = vrcp.f32 %v3948_v39 }
0x1099   :  { %5648 = vrcp.f32 %v3949_v57 }
0x10a2   :  { %v5647_v17 = vpop.eup %5646 }
0x10a3   :  { %v3955_v54 = vmul.f32 %v5647_v17, %v3954_v13  ;;  %v5649_v56 = vpop.eup %5648 }
0x10a4   :  { %v3958_v24 = vsub.f32 1.0, %v5649_v56  ;;  %v3960_v33 = vmul.f32 %v5649_v56, %v7346_v36 }
0x10a5   :  { %v3956_v38 = vadd.f32 %v3955_v54, %v7651_v9 }
0x10a6   :  { %v4117_v15 = vpop.f32.mrb[80].mxu0 }
0x10a7   :  { %5650 = vtanh.f32 %v3956_v38  ;;  %v7421_v14 = vadd.f32 %v4117_v15, %v7414_v2  ;;  %v4119_v63 = vpop.f32.mrb[81].mxu0 }
0x10a8   :  { %v7424_v45 = vadd.f32 %v4119_v63, %v7417_v31  ;;  %v4121_v4 = vpop.f32.mrb[82].mxu0 }
0x10a9   :  { %4156 = vst [vmem:[%s7586_s12] sm:$0xff] %v7421_v14  ;;  %v7431_v32 = vadd.f32 %v4121_v4, %v7414_v2  ;;  %v4123_v20 = vpop.f32.mrb[83].mxu0 }
0x10aa   :  { %4157 = vst [vmem:[%s7586_s12 + $0x8] sm:$0xff] %v7424_v45  ;;  %v7438_v10 = vadd.f32 %v4123_v20, %v7417_v31  ;;  %v4158_v41 = vmax.f32 %v7421_v14, %v7424_v45 }
0x10ab   :  { %4181 = vst [vmem:[%s7586_s12 + $0x10] sm:$0xff] %v7431_v32 }
0x10ac   :  { %4182 = vst [vmem:[%s7586_s12 + $0x18] sm:$0xff] %v7438_v10  ;;  %4159 = vmax.xlane.f32.xlu0 %v4158_v41  ;;  %v4183_v61 = vmax.f32 %v7431_v32, %v7438_v10 }
0x10ae   :  { %v4127_v19 = vpop.f32.mrb[84].mxu0 }
0x10af   :  { %v4128_v50 = vadd.f32 %v4127_v19, %v7414_v2  ;;  %v4129_v0 = vpop.f32.mrb[85].mxu0 }
0x10b0   :  { %v4130_v23 = vadd.f32 %v4129_v0, %v7417_v31  ;;  %v4131_v44 = vpop.f32.mrb[86].mxu0  ;;  %4184 = vmax.xlane.f32.xlu0 %v4183_v61 }
0x10b1   :  { %v5651_v34 = vpop.eup %5650  ;;  %4206 = vst [vmem:[%s7586_s12 + $0x20] sm:$0xff] %v4128_v50  ;;  %v4132_v35 = vadd.f32 %v4131_v44, %v7414_v2  ;;  %v4133_v25 = vpop.f32.mrb[87].mxu0 }
0x10b2   :  { %4207 = vst [vmem:[%s7586_s12 + $0x28] sm:$0xff] %v4130_v23  ;;  %v4134_v26 = vadd.f32 %v4133_v25, %v7417_v31  ;;  %v4208_v40 = vmax.f32 %v4128_v50, %v4130_v23  ;;  %v3959_v62 = vmul.f32 %v5651_v34, %v3958_v24 }
0x10b3   :  { %4231 = vst [vmem:[%s7586_s12 + $0x30] sm:$0xff] %v4132_v35 }
0x10b4   :  { %4232 = vst [vmem:[%s7586_s12 + $0x38] sm:$0xff] %v4134_v26  ;;  %4209 = vmax.xlane.f32.xlu1 %v4208_v40  ;;  %v3961_v55 = vadd.f32 %v3960_v33, %v3959_v62  ;;  %v4233_v46 = vmax.f32 %v4132_v35, %v4134_v26 }
0x10b6   :  { %v4137_v48 = vpop.f32.mrb[88].mxu0  ;;  %v3974_v42 = vpack.c.bf16 %v3961_v55, %v7346_v36 }
0x10b7   :  { %v4138_v3 = vadd.f32 %v4137_v48, %v7414_v2  ;;  %v4139_v6 = vpop.f32.mrb[89].mxu0 }
0x10b8   :  { %v4140_v51 = vadd.f32 %v4139_v6, %v7417_v31  ;;  %v4141_v52 = vpop.f32.mrb[90].mxu0  ;;  %4234 = vmax.xlane.f32.xlu1 %v4233_v46  ;;  %4146 = vmatmul.mubr.bf16.gmra.mrb[92].mxu0 %v3974_v42 }
0x10b9   :  { %4256 = vst [vmem:[%s7586_s12 + $0x40] sm:$0xff] %v4138_v3  ;;  %v4142_v60 = vadd.f32 %v4141_v52, %v7414_v2  ;;  %v4143_v37 = vpop.f32.mrb[91].mxu0 }
0x10ba   :  { %4257 = vst [vmem:[%s7586_s12 + $0x48] sm:$0xff] %v4140_v51  ;;  %v4144_v36 = vadd.f32 %v4143_v37, %v7417_v31  ;;  %v4258_v21 = vmax.f32 %v4138_v3, %v4140_v51 }
0x10bb   :  { %4281 = vst [vmem:[%s7586_s12 + $0x50] sm:$0xff] %v4142_v60 }
0x10bc   :  { %4282 = vst [vmem:[%s7586_s12 + $0x58] sm:$0xff] %v4144_v36  ;;  %4259 = vmax.xlane.f32.xlu0 %v4258_v21  ;;  %v4283_v16 = vmax.f32 %v4142_v60, %v4144_v36 }
0x10be   :  { %4284 = vmax.xlane.f32.xlu1 %v4283_v16 }
0x1139   :  { %v4160_v12 = vpop.xlane.xlu0 %4159 }
0x113a   :  { %vm4161_vm1 = vcmp.eq.f32.partialorder %v7421_v14, %v4160_v12  ;;  %vm4162_vm2 = vcmp.eq.f32.partialorder %v7424_v45, %v4160_v12 }
0x113b   :  { %v4163_v47 = vsel %vm4161_vm1, %v7487_v59, 256  ;;  %v4164_v53 = vsel %vm4162_vm2, %v7490_v18, 256 }
0x113c   :  { %vm4165_vm7 = vcmp.lt.s32.totalorder %v4163_v47, %v4164_v53 }
0x113d   :  { %v4185_v43 = vpop.xlane.xlu0 %4184  ;;  %v7505_v54 = vsel %vm4165_vm7, %v4163_v47, %v4164_v53 }
0x113e   :  { %vm4186_vm3 = vcmp.eq.f32.partialorder %v7431_v32, %v4185_v43  ;;  %vm4187_vm4 = vcmp.eq.f32.partialorder %v7438_v10, %v4185_v43  ;;  %v4168_v32 = vshra.s32 %v7505_v54, 16  ;;  %v4167_v37 = vand.u32 65535, %v7505_v54 }
0x113f   :  { %v4188_v27 = vsel %vm4186_vm3, %v7487_v59, 256  ;;  %v4189_v8 = vsel %vm4187_vm4, %v7490_v18, 256 }
0x1140   :  { %vm4190_vm10 = vcmp.lt.s32.totalorder %v4188_v27, %v4189_v8  ;;  %v4170_v19 = vcvt.s32.f32 %v4168_v32 }
0x1141   :  { %v4210_v58 = vpop.xlane.xlu1 %4209  ;;  %v7515_v63 = vsel %vm4190_vm10, %v4188_v27, %v4189_v8 }
0x1142   :  { %vm4211_vm5 = vcmp.eq.f32.partialorder %v4128_v50, %v4210_v58  ;;  %vm4212_vm6 = vcmp.eq.f32.partialorder %v4130_v23, %v4210_v58  ;;  %v4193_v41 = vshra.s32 %v7515_v63, 16  ;;  %v4192_v12 = vand.u32 65535, %v7515_v63 }
0x1143   :  { %v4213_v30 = vsel %vm4211_vm5, %v7487_v59, 256  ;;  %v4214_v39 = vsel %vm4212_vm6, %v7490_v18, 256  ;;  %v4169_v58 = vcvt.s32.f32 %v4167_v37 }
0x1144   :  { %vm4215_vm13 = vcmp.lt.s32.totalorder %v4213_v30, %v4214_v39  ;;  %v4195_v0 = vcvt.s32.f32 %v4193_v41  ;;  %v4194_v47 = vcvt.s32.f32 %v4192_v12 }
0x1145   :  { %v4235_v5 = vpop.xlane.xlu1 %4234 }
0x1146   :  { %vm4236_vm8 = vcmp.eq.f32.partialorder %v4132_v35, %v4235_v5  ;;  %vm4237_vm9 = vcmp.eq.f32.partialorder %v4134_v26, %v4235_v5 }
0x1147   :  { %v4238_v22 = vsel %vm4236_vm8, %v7487_v59, 256  ;;  %v4239_v11 = vsel %vm4237_vm9, %v7490_v18, 256 }
0x1148   :  { %vm4240_vm0 = vcmp.lt.s32.totalorder %v4238_v22, %v4239_v11 }
0x1149   :  { %v4260_v49 = vpop.xlane.xlu0 %4259  ;;  %v7534_v56 = vsel %vm4240_vm0, %v4238_v22, %v4239_v11 }
0x114a   :  { %vm4261_vm11 = vcmp.eq.f32.partialorder %v4138_v3, %v4260_v49  ;;  %vm4262_vm12 = vcmp.eq.f32.partialorder %v4140_v51, %v4260_v49  ;;  %v4243_v23 = vshra.s32 %v7534_v56, 16  ;;  %v4242_v53 = vand.u32 65535, %v7534_v56 }
0x114b   :  { %v4285_v1 = vpop.xlane.xlu1 %4284  ;;  %v4263_v9 = vsel %vm4261_vm11, %v7487_v59, 256  ;;  %v4264_v38 = vsel %vm4262_vm12, %v7490_v18, 256 }
0x114c   :  { %vm4286_vm14 = vcmp.eq.f32.partialorder %v4142_v60, %v4285_v1  ;;  %vm4287_vm15 = vcmp.eq.f32.partialorder %v4144_v36, %v4285_v1  ;;  %vm4265_vm1 = vcmp.lt.s32.totalorder %v4263_v9, %v4264_v38  ;;  %v4245_v35 = vcvt.s32.f32 %v4243_v23 }
0x114d   :  { %v4288_v20 = vsel %vm4286_vm14, %v7487_v59, 256  ;;  %v4289_v10 = vsel %vm4287_vm15, %v7490_v18, 256  ;;  %v7537_v50 = vsel %vm4265_vm1, %v4263_v9, %v4264_v38  ;;  %v4244_v1 = vcvt.s32.f32 %v4242_v53 }
0x114e   :  { %vm4290_vm2 = vcmp.lt.s32.totalorder %v4288_v20, %v4289_v10  ;;  %v4268_v34 = vshra.s32 %v7537_v50, 16  ;;  %v4267_v49 = vand.u32 65535, %v7537_v50  ;;  %vm4356_vm1 = vcmask 7168  }
0x114f   :  { %v7540_v44 = vsel %vm4290_vm2, %v4288_v20, %v4289_v10  ;;  %vm4358_vm2 = vcmask 15360  }
0x1150   :  { %v4293_v25 = vshra.s32 %v7540_v44, 16  ;;  %v4270_v26 = vcvt.s32.f32 %v4268_v34  ;;  %v4269_v11 = vcvt.s32.f32 %v4267_v49 }
0x1152   :  { %v4295_v40 = vcvt.s32.f32 %v4293_v25 }
0x118b   :  { %v4147_v57 = vpop.f32.mrb[92].mxu0 }
0x118c   :  { %v4148_v13 = vadd.f32 %v4147_v57, %v7414_v2  ;;  %v4149_v17 = vpop.f32.mrb[93].mxu0  ;;  %v4292_v57 = vand.u32 65535, %v7540_v44 }
0x118d   :  { %v4150_v28 = vadd.f32 %v4149_v17, %v7417_v31  ;;  %v4151_v7 = vpop.f32.mrb[94].mxu0 }
0x118e   :  { %4306 = vst [vmem:[%s7586_s12 + $0x60] sm:$0xff] %v4148_v13  ;;  %v4152_v15 = vadd.f32 %v4151_v7, %v7414_v2  ;;  %v4153_v14 = vpop.f32.mrb[95].mxu0  ;;  %v7528_v2 = vsel %vm4215_vm13, %v4213_v30, %v4214_v39  ;;  %v4294_v17 = vcvt.s32.f32 %v4292_v57 }
0x118f   :  { %4307 = vst [vmem:[%s7586_s12 + $0x68] sm:$0xff] %v4150_v28  ;;  %v4154_v45 = vadd.f32 %v4153_v14, %v7417_v31  ;;  %v4308_v4 = vmax.f32 %v4148_v13, %v4150_v28  ;;  %v4218_v61 = vshra.s32 %v7528_v2, 16 }
0x1190   :  { %4331 = vst [vmem:[%s7586_s12 + $0x70] sm:$0xff] %v4152_v15 }
0x1191   :  { %4332 = vst [vmem:[%s7586_s12 + $0x78] sm:$0xff] %v4154_v45  ;;  %4309 = vmax.xlane.f32.xlu0 %v4308_v4  ;;  %v4333_v31 = vmax.f32 %v4152_v15, %v4154_v45  ;;  %v4220_v24 = vcvt.s32.f32 %v4218_v61  ;;  %s5704_s12 = smov [#allocation5]  }
0x1192   :  { %s4380_s29 = sshll.u32 %s5704_s12, 4  ;;  %s4381_s29 = int_to_ptr.vmem [resolvable:$true] %s4380_s29 }
0x1193   :  { %4334 = vmax.xlane.f32.xlu1 %v4333_v31  ;;  %s5677_s30 = scalar_lea.vmem %s4381_s29, 128  ;;  %p5682_p1 = scmp.lt.s32.totalorder %s4381_s29, %s4381_s29 }
0x1194   :  { %p5678_p0 = scmp.ne.s32.totalorder %s4381_s29, %s5677_s30  ;;  %p5683_p2 = scmp.lt.s32.totalorder %s5677_s30, %s5677_s30 }
0x1195   :  { %4171 = vmin.xlane.f32.xlu0 %v4170_v19 }
0x1196   :  { %p5684_p3 = por %p5683_p2, %p5682_p1 }
0x1197   :  { %4196 = vmin.xlane.f32.xlu1 %v4195_v0 }
0x1198   :  { %p5685_p4 = pnand %p5684_p3, %p5678_p0 }
0x1199   :  { %4221 = vmin.xlane.f32.xlu0 %v4220_v24 }
0x119b   :  { %4246 = vmin.xlane.f32.xlu1 %v4245_v35 }
0x119d   :  { %4271 = vmin.xlane.f32.xlu0 %v4270_v26 }
0x119f   :  { %4296 = vmin.xlane.f32.xlu1 %v4295_v40 }
0x121e   :  { %v4310_v62 = vpop.xlane.xlu0 %4309 }
0x121f   :  { %vm4311_vm3 = vcmp.eq.f32.partialorder %v4148_v13, %v4310_v62  ;;  %vm4312_vm4 = vcmp.eq.f32.partialorder %v4150_v28, %v4310_v62 }
0x1220   :  { %v4313_v33 = vsel %vm4311_vm3, %v7487_v59, 256  ;;  %v4314_v55 = vsel %vm4312_vm4, %v7490_v18, 256  ;;  %v4335_v48 = vpop.xlane.xlu1 %4334  ;;  %vm4360_vm3 = vcmask 23552   ;;  %vm4362_vm4 = vcmask 31744  }
0x1221   :  { %vm4315_vm5 = vcmp.lt.s32.totalorder %v4313_v33, %v4314_v55  ;;  %vm4336_vm6 = vcmp.eq.f32.partialorder %v4152_v15, %v4335_v48  ;;  %vm4337_vm7 = vcmp.eq.f32.partialorder %v4154_v45, %v4335_v48 }
0x1222   :  { %v4338_v46 = vsel %vm4336_vm6, %v7487_v59, 256  ;;  %v4339_v42 = vsel %vm4337_vm7, %v7490_v18, 256  ;;  %v7548_v3 = vpop.xlane.xlu0 %4171  ;;  %v4316_v6 = vsel %vm4315_vm5, %v4313_v33, %v4314_v55  ;;  %v4217_v18 = vand.u32 65535, %v7528_v2 }
0x1223   :  { %vm4340_vm8 = vcmp.lt.s32.totalorder %v4338_v46, %v4339_v42  ;;  %v4318_v51 = vshra.s32 %v4316_v6, 16  ;;  %vm4173_vm9 = vcmp.eq.f32.partialorder %v4170_v19, %v7548_v3  ;;  %v4317_v28 = vand.u32 65535, %v4316_v6 }
0x1224   :  { %v4197_v52 = vpop.xlane.xlu1 %4196  ;;  %v4341_v60 = vsel %vm4340_vm8, %v4338_v46, %v4339_v42  ;;  %v4174_v43 = vsel %vm4173_vm9, %v4169_v58, inf  ;;  %v4219_v8 = vcvt.s32.f32 %v4217_v18  ;;  %v4178_v45 = vcvt.f32.s32 %v7548_v3 }
0x1225   :  { %v4320_v36 = vcvt.s32.f32 %v4318_v51  ;;  %v4343_v21 = vshra.s32 %v4341_v60, 16  ;;  %vm4198_vm10 = vcmp.eq.f32.partialorder %v4195_v0, %v4197_v52  ;;  %v4342_v7 = vand.u32 65535, %v4341_v60 }
0x1226   :  { %v4222_v16 = vpop.xlane.xlu0 %4221  ;;  %v4199_v27 = vsel %vm4198_vm10, %v4194_v47, inf  ;;  %v4319_v38 = vcvt.s32.f32 %v4317_v28  ;;  %v4203_v4 = vcvt.f32.s32 %v4197_v52  ;;  %v4179_v41 = vshll.u32 %v4178_v45, 16 }
0x1227   :  { %4321 = vmin.xlane.f32.xlu0 %v4320_v36  ;;  %v4345_v29 = vcvt.s32.f32 %v4343_v21  ;;  %vm4223_vm11 = vcmp.eq.f32.partialorder %v4220_v24, %v4222_v16  ;;  %v4344_v63 = vcvt.s32.f32 %v4342_v7  ;;  %v4228_v10 = vcvt.f32.s32 %v4222_v16 }
0x1228   :  { %v4247_v59 = vpop.xlane.xlu1 %4246  ;;  %v4224_v39 = vsel %vm4223_vm11, %v4219_v8, inf  ;;  %v4204_v56 = vshll.u32 %v4203_v4, 16  ;;  %vm4364_vm5 = vcmask 39936   ;;  %vm4366_vm6 = vcmask 48128  }
0x1229   :  { %4346 = vmin.xlane.f32.xlu1 %v4345_v29  ;;  %vm4248_vm12 = vcmp.eq.f32.partialorder %v4245_v35, %v4247_v59  ;;  %v4253_v19 = vcvt.f32.s32 %v4247_v59  ;;  %v4229_v0 = vshll.u32 %v4228_v10, 16  ;;  %vm4368_vm7 = vcmask 56320  }
0x122a   :  { %v7555_v5 = vpop.xlane.xlu0 %4271  ;;  %v4249_v22 = vsel %vm4248_vm12, %v4244_v1, inf  ;;  %vm4370_vm8 = vcmask 64512  }
0x122b   :  { %4175 = vmin.xlane.f32.xlu0 %v4174_v43  ;;  %vm4273_vm13 = vcmp.eq.f32.partialorder %v4270_v26, %v7555_v5  ;;  %v4254_v35 = vshll.u32 %v4253_v19, 16  ;;  %v4278_v46 = vcvt.f32.s32 %v7555_v5 }
0x122c   :  { %v4297_v30 = vpop.xlane.xlu1 %4296  ;;  %v4274_v13 = vsel %vm4273_vm13, %v4269_v11, inf }
0x122d   :  { %4200 = vmin.xlane.f32.xlu1 %v4199_v27  ;;  %vm4298_vm14 = vcmp.eq.f32.partialorder %v4295_v40, %v4297_v30  ;;  %v4303_v6 = vcvt.f32.s32 %v4297_v30  ;;  %v4279_v51 = vshll.u32 %v4278_v46, 16 }
0x122e   :  { %v4299_v54 = vsel %vm4298_vm14, %v4294_v17, inf }
0x122f   :  { %4225 = vmin.xlane.f32.xlu0 %v4224_v39 }
0x1231   :  { %4250 = vmin.xlane.f32.xlu1 %v4249_v22 }
0x1233   :  { %4275 = vmin.xlane.f32.xlu0 %v4274_v13 }
0x1235   :  { %4300 = vmin.xlane.f32.xlu1 %v4299_v54 }
0x12b4   :  { %v4322_v9 = vpop.xlane.xlu0 %4321 }
0x12b5   :  { %vm4323_vm15 = vcmp.eq.f32.partialorder %v4320_v36, %v4322_v9  ;;  %v4328_v60 = vcvt.f32.s32 %v4322_v9  ;;  %v4304_v36 = vshll.u32 %v4303_v6, 16 }
0x12b6   :  { %v4347_v15 = vpop.xlane.xlu1 %4346  ;;  %v4324_v14 = vsel %vm4323_vm15, %v4319_v38, inf }
0x12b7   :  { %4325 = vmin.xlane.f32.xlu0 %v4324_v14  ;;  %vm4348_vm0 = vcmp.eq.f32.partialorder %v4345_v29, %v4347_v15  ;;  %v4353_v21 = vcvt.f32.s32 %v4347_v15  ;;  %v4329_v29 = vshll.u32 %v4328_v60, 16 }
0x12b8   :  { %v4176_v32 = vpop.xlane.xlu0 %4175  ;;  %v4349_v20 = vsel %vm4348_vm0, %v4344_v63, inf }
0x12b9   :  { %v4177_v2 = vcvt.f32.s32 %v4176_v32  ;;  %4350 = vmin.xlane.f32.xlu1 %v4349_v20  ;;  %v4354_v43 = vshll.u32 %v4353_v21, 16 }
0x12ba   :  { %v4201_v31 = vpop.xlane.xlu1 %4200 }
0x12bb   :  { %v4202_v61 = vcvt.f32.s32 %v4201_v31  ;;  %v4180_v23 = vadd.s32 %v4179_v41, %v4177_v2 }
0x12bc   :  { %v4226_v50 = vpop.xlane.xlu0 %4225 }
0x12bd   :  { %v4205_v44 = vadd.s32 %v4204_v56, %v4202_v61  ;;  %v4227_v24 = vcvt.f32.s32 %v4226_v50 }
0x12be   :  { %v4251_v34 = vpop.xlane.xlu1 %4250 }
0x12bf   :  { %v4357_v25 = vsel %vm4356_vm1, %v4180_v23, %v4205_v44  ;;  %v4230_v26 = vadd.s32 %v4229_v0, %v4227_v24  ;;  %v4252_v40 = vcvt.f32.s32 %v4251_v34 }
0x12c0   :  { %v4276_v48 = vpop.xlane.xlu0 %4275 }
0x12c1   :  { %v4359_v62 = vsel %vm4358_vm2, %v4357_v25, %v4230_v26  ;;  %v4255_v33 = vadd.s32 %v4254_v35, %v4252_v40  ;;  %v4277_v42 = vcvt.f32.s32 %v4276_v48 }
0x12c2   :  { %v4301_v3 = vpop.xlane.xlu1 %4300 }
0x12c3   :  { %v4361_v55 = vsel %vm4360_vm3, %v4359_v62, %v4255_v33  ;;  %v4302_v52 = vcvt.f32.s32 %v4301_v3  ;;  %v4280_v37 = vadd.s32 %v4279_v51, %v4277_v42 }
0x12c5   :  { %v4305_v16 = vadd.s32 %v4304_v36, %v4302_v52  ;;  %v4363_v59 = vsel %vm4362_vm4, %v4361_v55, %v4280_v37 }
0x12c7   :  { %v4365_v5 = vsel %vm4364_vm5, %v4363_v59, %v4305_v16 }
0x1344   :  { %v4326_v12 = vpop.xlane.xlu0 %4325 }
0x1345   :  { %v4327_v58 = vcvt.f32.s32 %v4326_v12 }
0x1346   :  { %v4351_v18 = vpop.xlane.xlu1 %4350 }
0x1347   :  { %v4330_v47 = vadd.s32 %v4329_v29, %v4327_v58  ;;  %v4352_v53 = vcvt.f32.s32 %v4351_v18 }
0x1349   :  { %v4355_v27 = vadd.s32 %v4354_v43, %v4352_v53  ;;  %v4367_v8 = vsel %vm4366_vm6, %v4365_v5, %v4330_v47 }
0x134b   :  { %v4369_v49 = vsel %vm4368_vm7, %v4367_v8, %v4355_v27 }
0x134c   :  { %4371 = vst.msk [vmem:[#allocation5] sm:$0xff] %vm4370_vm8, %v4369_v49 }
0x134d   :  { %5688 = shalt.err (!%p5685_p4)
}
0x134e   :  { %s5689_s14 = scalar_lea.hbm %s7587_s13, 128 }
0x134f   :  { %p5690_p5 = scmp.ne.s32.totalorder %s7587_s13, %s5689_s14  ;;  %p5693_p6 = scmp.lt.u32.totalorder %s5689_s14, %s7587_s13 }
0x1351   :  { %p5695_p7 = pnand %p5693_p6, %p5690_p5 }
0x1353   :  { %5698 = shalt.err (!%p5695_p7)
}
0x1354   :  { %4383 = dma.vmem_to_hbm [thread:$0]  %s4381_s29, 128, %s7587_s13, [#allocation6]  }
0x1355   :  { %5699 = dma.done.wait [#allocation6], 128  }
0x1356   :  { %5700 = vsyncadd [#allocation6], 4294967168 }
0x1357   :  { %4389 = vsyncpa [#allocation6], 1 }

</bundles_post_ra>
